<compile_context>
chip_gen: v5e
topology: v5e:2x2
jax: 0.10.0
libtpu: 0.0.40
codegen_flags: <defaults>
</compile_context>

<pallas_src>
import jax
import jax.numpy as jnp
import numpy as np
from jax.experimental import pallas as pl
from jax.experimental.pallas import tpu as pltpu


# ----------------------------------------------------------------------------
# Init-time weight folding (pure numpy, done once outside jit)
# ----------------------------------------------------------------------------
def _fold_conv1(w, b):
    """Fold conv1 (6,3,5,5) + 2x2 pool + row-parity split into one (768, 672) matmul.

    LHS rows  : stacked images, 8 rows per image (row = b*8 + r4).
    LHS lanes : slab (j, m) at lanes (j*4+m)*96 + w*3 + c holding input row 4*(r4+j)+m
                (m = input row mod 4, j = plane shift in {0,1}).
    Out lanes : e*336 + dd*168 + dw*84 + q*6 + o  with
                e  = parity of pooled output row r = 2*r4 + e,
                dd/dw = pre-pool row/col inside the 2x2 window,
                q  = pooled col (0..13), o = out channel (0..5).
    """
    w = np.asarray(w, np.float32)
    b = np.asarray(b, np.float32)
    O, C, KH, KW = w.shape
    M = np.zeros((8 * 96, 672), np.float32)
    for e in range(2):
        for dd in range(2):
            for dw in range(2):
                for q in range(14):
                    for o in range(O):
                        col = e * 336 + dd * 168 + dw * 84 + q * 6 + o
                        for ki in range(KH):
                            t = 2 * e + dd + ki
                            j, m = t // 4, t % 4
                            for kj in range(KW):
                                wc = 2 * q + dw + kj
                                for c in range(C):
                                    M[(j * 4 + m) * 96 + wc * 3 + c, col] = w[o, c, ki, kj]
    return M, np.tile(b, 672 // O)[None, :]


def _fold_conv2(w, b):
    """Fold conv2 (16,6,5,5) + 2x2 pool into one (504, 320) matmul.

    LHS lanes : slab (j, p) at lanes (j*2+p)*84 + q*6 + c holding h1 row 2*(r2+j)+p
                (p = h1 row parity, j = plane shift in {0,1,2}).
    Out lanes : dd*160 + dw*80 + q2*16 + o  (q2 = pooled col 0..4, o = channel 0..15).
    """
    w = np.asarray(w, np.float32)
    b = np.asarray(b, np.float32)
    O, C, KH, KW = w.shape
    M = np.zeros((6 * 84, 320), np.float32)
    for dd in range(2):
        for dw in range(2):
            for q2 in range(5):
                for o in range(O):
                    col = dd * 160 + dw * 80 + q2 * 16 + o
                    for ki in range(KH):
                        t = dd + ki
                        j, p = t // 2, t % 2
                        for kj in range(KW):
                            q = 2 * q2 + dw + kj
                            for c in range(C):
                                M[(j * 2 + p) * 84 + q * 6 + c, col] = w[o, c, ki, kj]
    return M, np.tile(b, 320 // O)[None, :]


# ----------------------------------------------------------------------------
# The single fused Pallas kernel: conv1+pool1 -> conv2+pool2 -> fc1 -> fc2 -> fc3
# ----------------------------------------------------------------------------
def _net_kernel(x_ref, w1, b1, w2, b2, fw1, fb1, fw2, fb2, fw3, fb3, o_ref):
    f32, bf16 = jnp.float32, jnp.bfloat16
    BT = x_ref.shape[0]
    R = BT * 8
    x = x_ref[...]                                            # (BT, 4, 8, 96) f32

    # ---- conv1 + bias + ReLU + 2x2 max-pool: ONE wide-K bf16 MXU dot.
    slabs = []
    for j in range(2):                                        # plane-row shift
        for m in range(4):                                    # input row mod 4
            pm = x[:, m].reshape(R, 96)
            slabs.append(pm if j == 0 else
                         jnp.concatenate([pm[j:], pm[:j]], axis=0))
    lhs1 = jnp.concatenate(slabs, axis=1).astype(bf16)        # (R, 768)
    y1 = jnp.dot(lhs1, w1[...], preferred_element_type=f32) + b1[...]
    y1 = jnp.maximum(y1, 0.0)                                 # (R, 672)
    # pool = max over the four (row, col) parity quadrants (contiguous lane slices)
    h1 = []
    for e in range(2):                                        # h1 row parity
        b0 = e * 336
        h1.append(jnp.maximum(
            jnp.maximum(y1[:, b0:b0 + 84], y1[:, b0 + 84:b0 + 168]),
            jnp.maximum(y1[:, b0 + 168:b0 + 252], y1[:, b0 + 252:b0 + 336])))

    # ---- conv2 + bias + ReLU + 2x2 max-pool: ONE wide-K bf16 MXU dot.
    slabs2 = []
    for j in range(3):                                        # h1 plane-row shift
        for p in range(2):                                    # h1 row parity
            hp = h1[p]
            slabs2.append(hp if j == 0 else
                          jnp.concatenate([hp[j:], hp[:j]], axis=0))
    lhs2 = jnp.concatenate(slabs2, axis=1).astype(bf16)       # (R, 504)
    y2 = jnp.dot(lhs2, w2[...], preferred_element_type=f32) + b2[...]
    y2 = jnp.maximum(y2, 0.0)                                 # (R, 320)
    feats = jnp.maximum(jnp.maximum(y2[:, 0:80], y2[:, 80:160]),
                        jnp.maximum(y2[:, 160:240], y2[:, 240:320]))  # (R, 80)

    # ---- fc1 -> fc2 -> fc3 on the (BT, 400) flattened features (weights VMEM-resident).
    f3 = feats.reshape(BT, 8, 80)
    f400 = jnp.concatenate([f3[:, h, :] for h in range(5)], axis=-1).astype(bf16)
    h = jnp.dot(f400, fw1[...], preferred_element_type=f32) + fb1[...]
    h = jnp.maximum(h, 0.0).astype(bf16)
    h = jnp.dot(h, fw2[...], preferred_element_type=f32) + fb2[...]
    h = jnp.maximum(h, 0.0).astype(bf16)
    o_ref[...] = jnp.dot(h, fw3[...], preferred_element_type=f32) + fb3[...]


def _pick_bt(batch):
    # Fill the MXU M dimension (BT*8 rows) while keeping >=2 grid steps (v7x megacore)
    # whenever the batch allows; small batches run as one tile.
    if batch >= 64:
        return 32
    if batch >= 32:
        return 16
    if batch >= 8:
        return 8
    return batch


def net_pallas(xp, prep, bt):
    Bp = xp.shape[0]
    full = lambda i: (0, 0)
    return pl.pallas_call(
        _net_kernel,
        out_shape=jax.ShapeDtypeStruct((Bp, 10), jnp.float32),
        grid=(Bp // bt,),
        in_specs=[
            pl.BlockSpec((bt, 4, 8, 96), lambda i: (i, 0, 0, 0)),   # input batch tile
            pl.BlockSpec((768, 672), full),                          # folded conv1 (+pool1)
            pl.BlockSpec((1, 672), full),                            # conv1 bias (tiled)
            pl.BlockSpec((504, 320), full),                          # folded conv2 (+pool2)
            pl.BlockSpec((1, 320), full),                            # conv2 bias (tiled)
            pl.BlockSpec((400, 120), full),                          # fc1
            pl.BlockSpec((1, 120), full),
            pl.BlockSpec((120, 84), full),                           # fc2
            pl.BlockSpec((1, 84), full),
            pl.BlockSpec((84, 10), full),                            # fc3
            pl.BlockSpec((1, 10), full),
        ],
        out_specs=pl.BlockSpec((bt, 10), lambda i: (i, 0)),
        compiler_params=pltpu.CompilerParams(
            dimension_semantics=("parallel",),
            vmem_limit_bytes=32 * 1024 * 1024,
        ),
    )(xp, prep["conv1_m"], prep["conv1_b"], prep["conv2_m"], prep["conv2_b"],
      prep["fc1_w"], prep["fc1_b"], prep["fc2_w"], prep["fc2_b"],
      prep["fc3_w"], prep["fc3_b"])


# ----------------------------------------------------------------------------
# Parameters (PyTorch layout) + one-time folding into kernel-friendly layouts
# ----------------------------------------------------------------------------
def init_params(seed=0):
    key = jax.random.PRNGKey(seed)
    keys = jax.random.split(key, 10)

    def u(k, shape, fan_in):
        bound = 1.0 / np.sqrt(fan_in)
        return jax.random.uniform(k, shape, jnp.float32, -bound, bound)

    p = {}
    p["conv1_w"] = u(keys[0], (6, 3, 5, 5), 3 * 5 * 5)
    p["conv1_b"] = u(keys[1], (6,), 3 * 5 * 5)
    p["conv2_w"] = u(keys[2], (16, 6, 5, 5), 6 * 5 * 5)
    p["conv2_b"] = u(keys[3], (16,), 6 * 5 * 5)
    p["fc1_w"] = u(keys[4], (120, 400), 400)
    p["fc1_b"] = u(keys[5], (120,), 400)
    p["fc2_w"] = u(keys[6], (84, 120), 120)
    p["fc2_b"] = u(keys[7], (84,), 120)
    p["fc3_w"] = u(keys[8], (10, 84), 84)
    p["fc3_b"] = u(keys[9], (10,), 84)
    return p


def prepare_params(p):
    """One-time relayout of PyTorch-layout params into kernel-ready (bf16) matrices."""
    w1m, b1m = _fold_conv1(p["conv1_w"], p["conv1_b"])          # (768, 672), (1, 672)
    w2m, b2m = _fold_conv2(p["conv2_w"], p["conv2_b"])          # (504, 320), (1, 320)
    # fc1 input index in torch is o*25 + h*5 + q2; our feature layout is h*80 + q2*16 + o.
    fc1 = (np.asarray(p["fc1_w"], np.float32)
           .reshape(120, 16, 5, 5).transpose(0, 2, 3, 1).reshape(120, 400).T.copy())
    prep = {
        "conv1_m": jnp.asarray(w1m, jnp.bfloat16),
        "conv1_b": jnp.asarray(b1m, jnp.float32),
        "conv2_m": jnp.asarray(w2m, jnp.bfloat16),
        "conv2_b": jnp.asarray(b2m, jnp.float32),
        "fc1_w": jnp.asarray(fc1, jnp.bfloat16),                # (400, 120)
        "fc1_b": jnp.asarray(np.asarray(p["fc1_b"], np.float32)[None, :]),
        "fc2_w": jnp.asarray(np.asarray(p["fc2_w"], np.float32).T, jnp.bfloat16),
        "fc2_b": jnp.asarray(np.asarray(p["fc2_b"], np.float32)[None, :]),
        "fc3_w": jnp.asarray(np.asarray(p["fc3_w"], np.float32).T, jnp.bfloat16),
        "fc3_b": jnp.asarray(np.asarray(p["fc3_b"], np.float32)[None, :]),
    }
    return prep


# ----------------------------------------------------------------------------
# Forward pass (mirrors Net.forward)
# ----------------------------------------------------------------------------
@jax.jit
def net_forward(x, prep):
    # x: (B, 3, 32, 32) float32 (32x32 is required by the x.view(-1, 16*5*5))
    B, C, H, W = x.shape
    assert (C, H, W) == (3, 32, 32)
    # Layout plumbing (XLA, once per call): NCHW -> (b, h%4, h//4, w*3+c) planes so the
    # kernel builds every conv window from contiguous, unstrided row slabs.
    xp = (jnp.transpose(x, (0, 2, 3, 1))       # NHWC
          .reshape(B, 8, 4, 96)                # (b, h//4, h%4, w*3+c)
          .transpose(0, 2, 1, 3))              # (b, h%4, h//4, w*3+c)
    bt = _pick_bt(B)
    Bp = ((B + bt - 1) // bt) * bt
    if Bp != B:
        xp = jnp.pad(xp, ((0, Bp - B), (0, 0), (0, 0), (0, 0)))
    out = net_pallas(xp, prep, bt)
    return out[:B]


# ----------------------------------------------------------------------------
# Pure-JAX reference (mirrors the PyTorch module exactly, for verification)
# ----------------------------------------------------------------------------
def reference_forward(x, p):
    hp = jax.lax.Precision.HIGHEST

    def conv_relu(x, w, b):
        O, C, KH, KW = w.shape
        B, _, H, W = x.shape
        OH, OW = H - KH + 1, W - KW + 1
        cols = [x[:, :, i:i + OH, j:j + OW] for i in range(KH) for j in range(KW)]
        patches = jnp.stack(cols, axis=2)                       # (B, C, 25, OH, OW)
        patches = patches.transpose(0, 3, 4, 1, 2).reshape(B * OH * OW, C * KH * KW)
        y = jnp.dot(patches, w.reshape(O, -1).T, precision=hp) + b
        y = jnp.maximum(y, 0.0)
        return y.reshape(B, OH, OW, O).transpose(0, 3, 1, 2)

    def pool(x):
        B, C, H, W = x.shape
        return x.reshape(B, C, H // 2, 2, W // 2, 2).max(axis=(3, 5))

    x = pool(conv_relu(x, p["conv1_w"], p["conv1_b"]))
    x = pool(conv_relu(x, p["conv2_w"], p["conv2_b"]))
    x = x.reshape(-1, 16 * 5 * 5)
    x = jnp.maximum(jnp.dot(x, p["fc1_w"].T, precision=hp) + p["fc1_b"], 0.0)
    x = jnp.maximum(jnp.dot(x, p["fc2_w"].T, precision=hp) + p["fc2_b"], 0.0)
    return jnp.dot(x, p["fc3_w"].T, precision=hp) + p["fc3_b"]


if __name__ == "__main__":
    key = jax.random.PRNGKey(0)
    x = jax.random.normal(key, (2, 3, 32, 32), jnp.float32)   # NCHW, CIFAR-sized
    params = init_params(seed=0)
    prep = prepare_params(params)

    out = jax.block_until_ready(net_forward(x, prep))
    assert out.shape == (2, 10), out.shape
    assert bool(jnp.all(jnp.isfinite(out)))

    ref = jax.block_until_ready(reference_forward(x, params))
    # bf16 matmul operands with f32 accumulation: keep tolerance at the review-endorsed 2e-2.
    np.testing.assert_allclose(np.asarray(out), np.asarray(ref), rtol=2e-2, atol=2e-2)

    print("KERNEL_OK")
</pallas_src>

<mosaic_0001>
module attributes {stable_mosaic.version = 11 : i64} {
  func.func @_net_kernel(%arg0: i32, %arg1: memref<2x4x8x96xf32, #tpu.memory_space<vmem>>, %arg2: memref<768x672xbf16, #tpu.memory_space<vmem>>, %arg3: memref<1x672xf32, #tpu.memory_space<vmem>>, %arg4: memref<504x320xbf16, #tpu.memory_space<vmem>>, %arg5: memref<1x320xf32, #tpu.memory_space<vmem>>, %arg6: memref<400x120xbf16, #tpu.memory_space<vmem>>, %arg7: memref<1x120xf32, #tpu.memory_space<vmem>>, %arg8: memref<120x84xbf16, #tpu.memory_space<vmem>>, %arg9: memref<1x84xf32, #tpu.memory_space<vmem>>, %arg10: memref<84x10xbf16, #tpu.memory_space<vmem>>, %arg11: memref<1x10xf32, #tpu.memory_space<vmem>>, %arg12: memref<2x10xf32, #tpu.memory_space<vmem>>) attributes {dimension_semantics = [#tpu.dimension_semantics<parallel>], iteration_bounds = array<i64: 1>, scalar_prefetch = 0 : i64, scratch_operands = 0 : i64, tpu.core_type = #tpu.core_type<tc>, window_params = [{transform_indices = @transform_0, window_bounds = array<i64: 2, 4, 8, 96>}, {pipeline_mode = #tpu.pipeline_mode<synchronous>, transform_indices = @transform_1, window_bounds = array<i64: 768, 672>}, {pipeline_mode = #tpu.pipeline_mode<synchronous>, transform_indices = @transform_2, window_bounds = array<i64: 1, 672>}, {pipeline_mode = #tpu.pipeline_mode<synchronous>, transform_indices = @transform_3, window_bounds = array<i64: 504, 320>}, {pipeline_mode = #tpu.pipeline_mode<synchronous>, transform_indices = @transform_4, window_bounds = array<i64: 1, 320>}, {pipeline_mode = #tpu.pipeline_mode<synchronous>, transform_indices = @transform_5, window_bounds = array<i64: 400, 120>}, {pipeline_mode = #tpu.pipeline_mode<synchronous>, transform_indices = @transform_6, window_bounds = array<i64: 1, 120>}, {pipeline_mode = #tpu.pipeline_mode<synchronous>, transform_indices = @transform_7, window_bounds = array<i64: 120, 84>}, {pipeline_mode = #tpu.pipeline_mode<synchronous>, transform_indices = @transform_8, window_bounds = array<i64: 1, 84>}, {pipeline_mode = #tpu.pipeline_mode<synchronous>, transform_indices = @transform_9, window_bounds = array<i64: 84, 10>}, {pipeline_mode = #tpu.pipeline_mode<synchronous>, transform_indices = @transform_10, window_bounds = array<i64: 1, 10>}, {transform_indices = @transform_11, window_bounds = array<i64: 2, 10>}]} {
    %c0 = arith.constant 0 : index
    %c0_0 = arith.constant 0 : index
    %c0_1 = arith.constant 0 : index
    %c0_2 = arith.constant 0 : index
    %0 = vector.load %arg1[%c0, %c0_0, %c0_1, %c0_2] : memref<2x4x8x96xf32, #tpu.memory_space<vmem>>, vector<2x4x8x96xf32>
    %1 = vector.extract_strided_slice %0 {offsets = [0, 0, 0, 0], sizes = [2, 1, 8, 96], strides = [1, 1, 1, 1]} : vector<2x4x8x96xf32> to vector<2x1x8x96xf32>
    %2 = vector.shape_cast %1 : vector<2x1x8x96xf32> to vector<2x8x96xf32>
    %3 = vector.shape_cast %2 : vector<2x8x96xf32> to vector<16x96xf32>
    %4 = vector.extract_strided_slice %0 {offsets = [0, 1, 0, 0], sizes = [2, 1, 8, 96], strides = [1, 1, 1, 1]} : vector<2x4x8x96xf32> to vector<2x1x8x96xf32>
    %5 = vector.shape_cast %4 : vector<2x1x8x96xf32> to vector<2x8x96xf32>
    %6 = vector.shape_cast %5 : vector<2x8x96xf32> to vector<16x96xf32>
    %7 = vector.extract_strided_slice %0 {offsets = [0, 2, 0, 0], sizes = [2, 1, 8, 96], strides = [1, 1, 1, 1]} : vector<2x4x8x96xf32> to vector<2x1x8x96xf32>
    %8 = vector.shape_cast %7 : vector<2x1x8x96xf32> to vector<2x8x96xf32>
    %9 = vector.shape_cast %8 : vector<2x8x96xf32> to vector<16x96xf32>
    %10 = vector.extract_strided_slice %0 {offsets = [0, 3, 0, 0], sizes = [2, 1, 8, 96], strides = [1, 1, 1, 1]} : vector<2x4x8x96xf32> to vector<2x1x8x96xf32>
    %11 = vector.shape_cast %10 : vector<2x1x8x96xf32> to vector<2x8x96xf32>
    %12 = vector.shape_cast %11 : vector<2x8x96xf32> to vector<16x96xf32>
    %13 = vector.extract_strided_slice %0 {offsets = [0, 0, 0, 0], sizes = [2, 1, 8, 96], strides = [1, 1, 1, 1]} : vector<2x4x8x96xf32> to vector<2x1x8x96xf32>
    %14 = vector.shape_cast %13 : vector<2x1x8x96xf32> to vector<2x8x96xf32>
    %15 = vector.shape_cast %14 : vector<2x8x96xf32> to vector<16x96xf32>
    %16 = vector.extract_strided_slice %15 {offsets = [1, 0], sizes = [15, 96], strides = [1, 1]} : vector<16x96xf32> to vector<15x96xf32>
    %17 = vector.extract_strided_slice %15 {offsets = [0, 0], sizes = [1, 96], strides = [1, 1]} : vector<16x96xf32> to vector<1x96xf32>
    %18 = tpu.concatenate %16, %17 in 0 : vector<15x96xf32>, vector<1x96xf32> -> vector<16x96xf32>
    %19 = vector.extract_strided_slice %0 {offsets = [0, 1, 0, 0], sizes = [2, 1, 8, 96], strides = [1, 1, 1, 1]} : vector<2x4x8x96xf32> to vector<2x1x8x96xf32>
    %20 = vector.shape_cast %19 : vector<2x1x8x96xf32> to vector<2x8x96xf32>
    %21 = vector.shape_cast %20 : vector<2x8x96xf32> to vector<16x96xf32>
    %22 = vector.extract_strided_slice %21 {offsets = [1, 0], sizes = [15, 96], strides = [1, 1]} : vector<16x96xf32> to vector<15x96xf32>
    %23 = vector.extract_strided_slice %21 {offsets = [0, 0], sizes = [1, 96], strides = [1, 1]} : vector<16x96xf32> to vector<1x96xf32>
    %24 = tpu.concatenate %22, %23 in 0 : vector<15x96xf32>, vector<1x96xf32> -> vector<16x96xf32>
    %25 = vector.extract_strided_slice %0 {offsets = [0, 2, 0, 0], sizes = [2, 1, 8, 96], strides = [1, 1, 1, 1]} : vector<2x4x8x96xf32> to vector<2x1x8x96xf32>
    %26 = vector.shape_cast %25 : vector<2x1x8x96xf32> to vector<2x8x96xf32>
    %27 = vector.shape_cast %26 : vector<2x8x96xf32> to vector<16x96xf32>
    %28 = vector.extract_strided_slice %27 {offsets = [1, 0], sizes = [15, 96], strides = [1, 1]} : vector<16x96xf32> to vector<15x96xf32>
    %29 = vector.extract_strided_slice %27 {offsets = [0, 0], sizes = [1, 96], strides = [1, 1]} : vector<16x96xf32> to vector<1x96xf32>
    %30 = tpu.concatenate %28, %29 in 0 : vector<15x96xf32>, vector<1x96xf32> -> vector<16x96xf32>
    %31 = vector.extract_strided_slice %0 {offsets = [0, 3, 0, 0], sizes = [2, 1, 8, 96], strides = [1, 1, 1, 1]} : vector<2x4x8x96xf32> to vector<2x1x8x96xf32>
    %32 = vector.shape_cast %31 : vector<2x1x8x96xf32> to vector<2x8x96xf32>
    %33 = vector.shape_cast %32 : vector<2x8x96xf32> to vector<16x96xf32>
    %34 = vector.extract_strided_slice %33 {offsets = [1, 0], sizes = [15, 96], strides = [1, 1]} : vector<16x96xf32> to vector<15x96xf32>
    %35 = vector.extract_strided_slice %33 {offsets = [0, 0], sizes = [1, 96], strides = [1, 1]} : vector<16x96xf32> to vector<1x96xf32>
    %36 = tpu.concatenate %34, %35 in 0 : vector<15x96xf32>, vector<1x96xf32> -> vector<16x96xf32>
    %37 = tpu.concatenate %3, %6, %9, %12, %18, %24, %30, %36 in 1 : vector<16x96xf32>, vector<16x96xf32>, vector<16x96xf32>, vector<16x96xf32>, vector<16x96xf32>, vector<16x96xf32>, vector<16x96xf32>, vector<16x96xf32> -> vector<16x768xf32>
    %38 = arith.truncf %37 : vector<16x768xf32> to vector<16x768xbf16>
    %c0_3 = arith.constant 0 : index
    %c0_4 = arith.constant 0 : index
    %39 = vector.load %arg2[%c0_3, %c0_4] : memref<768x672xbf16, #tpu.memory_space<vmem>>, vector<768x672xbf16>
    %cst = arith.constant dense<0.000000e+00> : vector<16x672xf32>
    %40 = tpu.matmul %38, %39, %cst {dimension_numbers = #tpu.dot_dimension_numbers<[1], [0], [0], [1], [0, 0, 1, 1], [], []>} : vector<16x768xbf16>, vector<768x672xbf16>, vector<16x672xf32> -> vector<16x672xf32>
    %c0_5 = arith.constant 0 : index
    %c0_6 = arith.constant 0 : index
    %41 = vector.load %arg3[%c0_5, %c0_6] : memref<1x672xf32, #tpu.memory_space<vmem>>, vector<1x672xf32>
    %42 = vector.broadcast %41 : vector<1x672xf32> to vector<16x672xf32>
    %43 = arith.addf %40, %42 : vector<16x672xf32>
    %cst_7 = arith.constant 0.000000e+00 : f32
    %44 = vector.broadcast %cst_7 : f32 to vector<16x672xf32>
    %45 = arith.maximumf %43, %44 : vector<16x672xf32>
    %46 = vector.extract_strided_slice %45 {offsets = [0, 0], sizes = [16, 84], strides = [1, 1]} : vector<16x672xf32> to vector<16x84xf32>
    %47 = vector.extract_strided_slice %45 {offsets = [0, 84], sizes = [16, 84], strides = [1, 1]} : vector<16x672xf32> to vector<16x84xf32>
    %48 = arith.maximumf %46, %47 : vector<16x84xf32>
    %49 = vector.extract_strided_slice %45 {offsets = [0, 168], sizes = [16, 84], strides = [1, 1]} : vector<16x672xf32> to vector<16x84xf32>
    %50 = vector.extract_strided_slice %45 {offsets = [0, 252], sizes = [16, 84], strides = [1, 1]} : vector<16x672xf32> to vector<16x84xf32>
    %51 = arith.maximumf %49, %50 : vector<16x84xf32>
    %52 = arith.maximumf %48, %51 : vector<16x84xf32>
    %53 = vector.extract_strided_slice %45 {offsets = [0, 336], sizes = [16, 84], strides = [1, 1]} : vector<16x672xf32> to vector<16x84xf32>
    %54 = vector.extract_strided_slice %45 {offsets = [0, 420], sizes = [16, 84], strides = [1, 1]} : vector<16x672xf32> to vector<16x84xf32>
    %55 = arith.maximumf %53, %54 : vector<16x84xf32>
    %56 = vector.extract_strided_slice %45 {offsets = [0, 504], sizes = [16, 84], strides = [1, 1]} : vector<16x672xf32> to vector<16x84xf32>
    %57 = vector.extract_strided_slice %45 {offsets = [0, 588], sizes = [16, 84], strides = [1, 1]} : vector<16x672xf32> to vector<16x84xf32>
    %58 = arith.maximumf %56, %57 : vector<16x84xf32>
    %59 = arith.maximumf %55, %58 : vector<16x84xf32>
    %60 = vector.extract_strided_slice %52 {offsets = [1, 0], sizes = [15, 84], strides = [1, 1]} : vector<16x84xf32> to vector<15x84xf32>
    %61 = vector.extract_strided_slice %52 {offsets = [0, 0], sizes = [1, 84], strides = [1, 1]} : vector<16x84xf32> to vector<1x84xf32>
    %62 = tpu.concatenate %60, %61 in 0 : vector<15x84xf32>, vector<1x84xf32> -> vector<16x84xf32>
    %63 = vector.extract_strided_slice %59 {offsets = [1, 0], sizes = [15, 84], strides = [1, 1]} : vector<16x84xf32> to vector<15x84xf32>
    %64 = vector.extract_strided_slice %59 {offsets = [0, 0], sizes = [1, 84], strides = [1, 1]} : vector<16x84xf32> to vector<1x84xf32>
    %65 = tpu.concatenate %63, %64 in 0 : vector<15x84xf32>, vector<1x84xf32> -> vector<16x84xf32>
    %66 = vector.extract_strided_slice %52 {offsets = [2, 0], sizes = [14, 84], strides = [1, 1]} : vector<16x84xf32> to vector<14x84xf32>
    %67 = vector.extract_strided_slice %52 {offsets = [0, 0], sizes = [2, 84], strides = [1, 1]} : vector<16x84xf32> to vector<2x84xf32>
    %68 = tpu.concatenate %66, %67 in 0 : vector<14x84xf32>, vector<2x84xf32> -> vector<16x84xf32>
    %69 = vector.extract_strided_slice %59 {offsets = [2, 0], sizes = [14, 84], strides = [1, 1]} : vector<16x84xf32> to vector<14x84xf32>
    %70 = vector.extract_strided_slice %59 {offsets = [0, 0], sizes = [2, 84], strides = [1, 1]} : vector<16x84xf32> to vector<2x84xf32>
    %71 = tpu.concatenate %69, %70 in 0 : vector<14x84xf32>, vector<2x84xf32> -> vector<16x84xf32>
    %72 = tpu.concatenate %52, %59, %62, %65, %68, %71 in 1 : vector<16x84xf32>, vector<16x84xf32>, vector<16x84xf32>, vector<16x84xf32>, vector<16x84xf32>, vector<16x84xf32> -> vector<16x504xf32>
    %73 = arith.truncf %72 : vector<16x504xf32> to vector<16x504xbf16>
    %c0_8 = arith.constant 0 : index
    %c0_9 = arith.constant 0 : index
    %74 = vector.load %arg4[%c0_8, %c0_9] : memref<504x320xbf16, #tpu.memory_space<vmem>>, vector<504x320xbf16>
    %cst_10 = arith.constant dense<0.000000e+00> : vector<16x320xf32>
    %75 = tpu.matmul %73, %74, %cst_10 {dimension_numbers = #tpu.dot_dimension_numbers<[1], [0], [0], [1], [0, 0, 1, 1], [], []>} : vector<16x504xbf16>, vector<504x320xbf16>, vector<16x320xf32> -> vector<16x320xf32>
    %c0_11 = arith.constant 0 : index
    %c0_12 = arith.constant 0 : index
    %76 = vector.load %arg5[%c0_11, %c0_12] : memref<1x320xf32, #tpu.memory_space<vmem>>, vector<1x320xf32>
    %77 = vector.broadcast %76 : vector<1x320xf32> to vector<16x320xf32>
    %78 = arith.addf %75, %77 : vector<16x320xf32>
    %cst_13 = arith.constant 0.000000e+00 : f32
    %79 = vector.broadcast %cst_13 : f32 to vector<16x320xf32>
    %80 = arith.maximumf %78, %79 : vector<16x320xf32>
    %81 = vector.extract_strided_slice %80 {offsets = [0, 0], sizes = [16, 80], strides = [1, 1]} : vector<16x320xf32> to vector<16x80xf32>
    %82 = vector.extract_strided_slice %80 {offsets = [0, 80], sizes = [16, 80], strides = [1, 1]} : vector<16x320xf32> to vector<16x80xf32>
    %83 = arith.maximumf %81, %82 : vector<16x80xf32>
    %84 = vector.extract_strided_slice %80 {offsets = [0, 160], sizes = [16, 80], strides = [1, 1]} : vector<16x320xf32> to vector<16x80xf32>
    %85 = vector.extract_strided_slice %80 {offsets = [0, 240], sizes = [16, 80], strides = [1, 1]} : vector<16x320xf32> to vector<16x80xf32>
    %86 = arith.maximumf %84, %85 : vector<16x80xf32>
    %87 = arith.maximumf %83, %86 : vector<16x80xf32>
    %88 = vector.shape_cast %87 : vector<16x80xf32> to vector<2x8x80xf32>
    %89 = vector.extract_strided_slice %88 {offsets = [0, 0, 0], sizes = [2, 1, 80], strides = [1, 1, 1]} : vector<2x8x80xf32> to vector<2x1x80xf32>
    %90 = vector.shape_cast %89 : vector<2x1x80xf32> to vector<2x80xf32>
    %91 = vector.extract_strided_slice %88 {offsets = [0, 1, 0], sizes = [2, 1, 80], strides = [1, 1, 1]} : vector<2x8x80xf32> to vector<2x1x80xf32>
    %92 = vector.shape_cast %91 : vector<2x1x80xf32> to vector<2x80xf32>
    %93 = vector.extract_strided_slice %88 {offsets = [0, 2, 0], sizes = [2, 1, 80], strides = [1, 1, 1]} : vector<2x8x80xf32> to vector<2x1x80xf32>
    %94 = vector.shape_cast %93 : vector<2x1x80xf32> to vector<2x80xf32>
    %95 = vector.extract_strided_slice %88 {offsets = [0, 3, 0], sizes = [2, 1, 80], strides = [1, 1, 1]} : vector<2x8x80xf32> to vector<2x1x80xf32>
    %96 = vector.shape_cast %95 : vector<2x1x80xf32> to vector<2x80xf32>
    %97 = vector.extract_strided_slice %88 {offsets = [0, 4, 0], sizes = [2, 1, 80], strides = [1, 1, 1]} : vector<2x8x80xf32> to vector<2x1x80xf32>
    %98 = vector.shape_cast %97 : vector<2x1x80xf32> to vector<2x80xf32>
    %99 = tpu.concatenate %90, %92, %94, %96, %98 in 1 : vector<2x80xf32>, vector<2x80xf32>, vector<2x80xf32>, vector<2x80xf32>, vector<2x80xf32> -> vector<2x400xf32>
    %100 = arith.truncf %99 : vector<2x400xf32> to vector<2x400xbf16>
    %c0_14 = arith.constant 0 : index
    %c0_15 = arith.constant 0 : index
    %101 = vector.load %arg6[%c0_14, %c0_15] : memref<400x120xbf16, #tpu.memory_space<vmem>>, vector<400x120xbf16>
    %cst_16 = arith.constant dense<0.000000e+00> : vector<2x120xf32>
    %102 = tpu.matmul %100, %101, %cst_16 {dimension_numbers = #tpu.dot_dimension_numbers<[1], [0], [0], [1], [0, 0, 1, 1], [], []>} : vector<2x400xbf16>, vector<400x120xbf16>, vector<2x120xf32> -> vector<2x120xf32>
    %c0_17 = arith.constant 0 : index
    %c0_18 = arith.constant 0 : index
    %103 = vector.load %arg7[%c0_17, %c0_18] : memref<1x120xf32, #tpu.memory_space<vmem>>, vector<1x120xf32>
    %104 = vector.broadcast %103 : vector<1x120xf32> to vector<2x120xf32>
    %105 = arith.addf %102, %104 : vector<2x120xf32>
    %cst_19 = arith.constant 0.000000e+00 : f32
    %106 = vector.broadcast %cst_19 : f32 to vector<2x120xf32>
    %107 = arith.maximumf %105, %106 : vector<2x120xf32>
    %108 = arith.truncf %107 : vector<2x120xf32> to vector<2x120xbf16>
    %c0_20 = arith.constant 0 : index
    %c0_21 = arith.constant 0 : index
    %109 = vector.load %arg8[%c0_20, %c0_21] : memref<120x84xbf16, #tpu.memory_space<vmem>>, vector<120x84xbf16>
    %cst_22 = arith.constant dense<0.000000e+00> : vector<2x84xf32>
    %110 = tpu.matmul %108, %109, %cst_22 {dimension_numbers = #tpu.dot_dimension_numbers<[1], [0], [0], [1], [0, 0, 1, 1], [], []>} : vector<2x120xbf16>, vector<120x84xbf16>, vector<2x84xf32> -> vector<2x84xf32>
    %c0_23 = arith.constant 0 : index
    %c0_24 = arith.constant 0 : index
    %111 = vector.load %arg9[%c0_23, %c0_24] : memref<1x84xf32, #tpu.memory_space<vmem>>, vector<1x84xf32>
    %112 = vector.broadcast %111 : vector<1x84xf32> to vector<2x84xf32>
    %113 = arith.addf %110, %112 : vector<2x84xf32>
    %cst_25 = arith.constant 0.000000e+00 : f32
    %114 = vector.broadcast %cst_25 : f32 to vector<2x84xf32>
    %115 = arith.maximumf %113, %114 : vector<2x84xf32>
    %116 = arith.truncf %115 : vector<2x84xf32> to vector<2x84xbf16>
    %c0_26 = arith.constant 0 : index
    %c0_27 = arith.constant 0 : index
    %117 = vector.load %arg10[%c0_26, %c0_27] : memref<84x10xbf16, #tpu.memory_space<vmem>>, vector<84x10xbf16>
    %cst_28 = arith.constant dense<0.000000e+00> : vector<2x10xf32>
    %118 = tpu.matmul %116, %117, %cst_28 {dimension_numbers = #tpu.dot_dimension_numbers<[1], [0], [0], [1], [0, 0, 1, 1], [], []>} : vector<2x84xbf16>, vector<84x10xbf16>, vector<2x10xf32> -> vector<2x10xf32>
    %c0_29 = arith.constant 0 : index
    %c0_30 = arith.constant 0 : index
    %119 = vector.load %arg11[%c0_29, %c0_30] : memref<1x10xf32, #tpu.memory_space<vmem>>, vector<1x10xf32>
    %120 = vector.broadcast %119 : vector<1x10xf32> to vector<2x10xf32>
    %121 = arith.addf %118, %120 : vector<2x10xf32>
    %c0_31 = arith.constant 0 : index
    %c0_32 = arith.constant 0 : index
    %122 = vector.load %arg12[%c0_31, %c0_32] : memref<2x10xf32, #tpu.memory_space<vmem>>, vector<2x10xf32>
    tpu.vector_store %arg12[%c0_31, %c0_32], %121 {strides = array<i32>} : memref<2x10xf32, #tpu.memory_space<vmem>>, vector<2x10xf32>,
    return
  }
  func.func @transform_0(%arg0: i32) -> (i32, i32, i32, i32) {
    %c0_i32 = arith.constant 0 : i32
    %c0_i32_0 = arith.constant 0 : i32
    %c0_i32_1 = arith.constant 0 : i32
    %c0_i32_2 = arith.constant 0 : i32
    return %arg0, %c0_i32, %c0_i32_0, %c0_i32_1 : i32, i32, i32, i32
  }
  func.func @transform_1(%arg0: i32) -> (i32, i32) {
    %c0_i32 = arith.constant 0 : i32
    %c0_i32_0 = arith.constant 0 : i32
    %c0_i32_1 = arith.constant 0 : i32
    return %c0_i32, %c0_i32_0 : i32, i32
  }
  func.func @transform_2(%arg0: i32) -> (i32, i32) {
    %c0_i32 = arith.constant 0 : i32
    %c0_i32_0 = arith.constant 0 : i32
    %c0_i32_1 = arith.constant 0 : i32
    return %c0_i32, %c0_i32_0 : i32, i32
  }
  func.func @transform_3(%arg0: i32) -> (i32, i32) {
    %c0_i32 = arith.constant 0 : i32
    %c0_i32_0 = arith.constant 0 : i32
    %c0_i32_1 = arith.constant 0 : i32
    return %c0_i32, %c0_i32_0 : i32, i32
  }
  func.func @transform_4(%arg0: i32) -> (i32, i32) {
    %c0_i32 = arith.constant 0 : i32
    %c0_i32_0 = arith.constant 0 : i32
    %c0_i32_1 = arith.constant 0 : i32
    return %c0_i32, %c0_i32_0 : i32, i32
  }
  func.func @transform_5(%arg0: i32) -> (i32, i32) {
    %c0_i32 = arith.constant 0 : i32
    %c0_i32_0 = arith.constant 0 : i32
    %c0_i32_1 = arith.constant 0 : i32
    return %c0_i32, %c0_i32_0 : i32, i32
  }
  func.func @transform_6(%arg0: i32) -> (i32, i32) {
    %c0_i32 = arith.constant 0 : i32
    %c0_i32_0 = arith.constant 0 : i32
    %c0_i32_1 = arith.constant 0 : i32
    return %c0_i32, %c0_i32_0 : i32, i32
  }
  func.func @transform_7(%arg0: i32) -> (i32, i32) {
    %c0_i32 = arith.constant 0 : i32
    %c0_i32_0 = arith.constant 0 : i32
    %c0_i32_1 = arith.constant 0 : i32
    return %c0_i32, %c0_i32_0 : i32, i32
  }
  func.func @transform_8(%arg0: i32) -> (i32, i32) {
    %c0_i32 = arith.constant 0 : i32
    %c0_i32_0 = arith.constant 0 : i32
    %c0_i32_1 = arith.constant 0 : i32
    return %c0_i32, %c0_i32_0 : i32, i32
  }
  func.func @transform_9(%arg0: i32) -> (i32, i32) {
    %c0_i32 = arith.constant 0 : i32
    %c0_i32_0 = arith.constant 0 : i32
    %c0_i32_1 = arith.constant 0 : i32
    return %c0_i32, %c0_i32_0 : i32, i32
  }
  func.func @transform_10(%arg0: i32) -> (i32, i32) {
    %c0_i32 = arith.constant 0 : i32
    %c0_i32_0 = arith.constant 0 : i32
    %c0_i32_1 = arith.constant 0 : i32
    return %c0_i32, %c0_i32_0 : i32, i32
  }
  func.func @transform_11(%arg0: i32) -> (i32, i32) {
    %c0_i32 = arith.constant 0 : i32
    %c0_i32_0 = arith.constant 0 : i32
    return %arg0, %c0_i32 : i32, i32
  }
}

</mosaic_0001>

<bundles_post_ra>
// kernel: net_forward.1
= control target key start
LH: loop header
LB: loop body
LE: loop exit
PB: predicated region body
PF: predicated region fallthrough
CT: control target
= control target key end

     0   :  { %vm50_vm0 = vcmask 1046528   ;;  %s6230_s12 = smov 64   ;;  %s6231_s17 = smov 96   ;;  %s9038_s0 = inlined_call_operand.vmem [shape: f32[2,4,8,96], index: 0, kind: input, shape index: {}]   ;;  %s9039_s1 = inlined_call_operand.vmem [shape: bf16[768,672], index: 1, kind: input, shape index: {}]   ;;  %s9040_s2 = inlined_call_operand.vmem [shape: f32[1,672], index: 2, kind: input, shape index: {}]   ;;  %s9041_s3 = inlined_call_operand.vmem [shape: bf16[504,320], index: 3, kind: input, shape index: {}]   ;;  %s9042_s4 = inlined_call_operand.vmem [shape: f32[1,320], index: 4, kind: input, shape index: {}]   ;;  %s9043_s5 = inlined_call_operand.vmem [shape: bf16[400,120], index: 5, kind: input, shape index: {}]   ;;  %s9044_s6 = inlined_call_operand.vmem [shape: f32[1,120], index: 6, kind: input, shape index: {}]   ;;  %s9045_s7 = inlined_call_operand.vmem [shape: bf16[120,84], index: 7, kind: input, shape index: {}]   ;;  %s9046_s8 = inlined_call_operand.vmem [shape: f32[1,84], index: 8, kind: input, shape index: {}]   ;;  %s9047_s9 = inlined_call_operand.vmem [shape: bf16[84,10], index: 9, kind: input, shape index: {}]   ;;  %s9048_s10 = inlined_call_operand.vmem [shape: f32[1,10], index: 10, kind: input, shape index: {}]   ;;  %s9049_s11 = inlined_call_operand.hbm [shape: f32[2,10], index: 11, kind: output, shape index: {}]  }
   0x1   :  { %v42_v0 = vld [vmem:[%s9038_s0 + $0x10] sm:$0xff]  ;;  %v41_v2 = vld [vmem:[%s9038_s0 + $0x8] sm:$0xff]  ;;  %v43_v10 = vld [vmem:[%s9038_s0 + $0x18] sm:$0xff]  ;;  %s6232_s18 = smov 32  }
   0x2   :  { %v46_v1 = vld [vmem:[%s9038_s0 + $0x30] sm:$0xff]  ;;  %v68_v5 = vrot.slane %v42_v0, 1  ;;  %v45_v6 = vld [vmem:[%s9038_s0 + $0x28] sm:$0xff]  ;;  %v60_v7 = vrot.slane %v41_v2, 1  ;;  %v47_v11 = vld [vmem:[%s9038_s0 + $0x38] sm:$0xff]  ;;  %v76_v14 = vrot.slane %v43_v10, 1 }
   0x3   :  { %v69_v3 = vrot.slane %v46_v1, 1  ;;  %v6065_v4 = vpack.i.bf16 %v46_v1, %v42_v0  ;;  %v61_v8 = vrot.slane %v45_v6, 1  ;;  %v6075_v9 = vpack.i.bf16 %v45_v6, %v41_v2  ;;  %v4127_v12 = vld [vmem:[%s9039_s1 + $0x150] sm:$0xf]  ;;  %v5680_v17 = vld [vmem:[%s9039_s1 + $0x164] sm:$0xf0] }
   0x4   :  { %v77_v13 = vrot.slane %v47_v11, 1  ;;  %v4319_v18 = vld [vmem:[%s9039_s1 + $0x2d0] sm:$0xf]  ;;  %v4128_v20 = vor.u32 %v5680_v17, %v4127_v12  ;;  %v5728_v21 = vld [vmem:[%s9039_s1 + $0x2e4] sm:$0xf0]  ;;  %v6070_v32 = vpack.i.bf16 %v47_v11, %v43_v10 }
   0x5   :  { %6066 = vrot.lane.b32.xlu0 %v6065_v4, %s6230_s12  ;;  %v70_v15 = vsel %vm50_vm0, %v68_v5, %v69_v3  ;;  %v73_v16 = vsel %vm50_vm0, %v69_v3, %v68_v5  ;;  %6076 = vrot.lane.b32.xlu1 %v6075_v9, %s6231_s17  ;;  %v4103_v22 = vld [vmem:[%s9039_s1 + $0x120] sm:$0xf]  ;;  %v5674_v23 = vld [vmem:[%s9039_s1 + $0x134] sm:$0xf0]  ;;  %v62_v24 = vsel %vm50_vm0, %v60_v7, %v61_v8 }
   0x6   :  { %v6085_v19 = vpack.i.bf16 %v73_v16, %v70_v15  ;;  %v65_v25 = vsel %vm50_vm0, %v61_v8, %v60_v7  ;;  %v4320_v26 = vor.u32 %v5728_v21, %v4319_v18  ;;  %v4295_v27 = vld [vmem:[%s9039_s1 + $0x2a0] sm:$0xf]  ;;  %v5722_v28 = vld [vmem:[%s9039_s1 + $0x2b4] sm:$0xf0]  ;;  %1884 = vmatpush.bf16.msra.mxu0 %v4128_v20  ;;  %v4104_v29 = vor.u32 %v5674_v23, %v4103_v22  ;;  %v4079_v30 = vld [vmem:[%s9039_s1 + $0xf0] sm:$0xf] }
   0x7   :  { %v5668_v31 = vld [vmem:[%s9039_s1 + $0x104] sm:$0xf0]  ;;  %v78_v33 = vsel %vm50_vm0, %v76_v14, %v77_v13  ;;  %v81_v34 = vsel %vm50_vm0, %v77_v13, %v76_v14  ;;  %v4296_v35 = vor.u32 %v5722_v28, %v4295_v27  ;;  %v4511_v36 = vld [vmem:[%s9039_s1 + $0x450] sm:$0xf]  ;;  %v6080_v39 = vpack.i.bf16 %v65_v25, %v62_v24  ;;  %v4487_v45 = vld [vmem:[%s9039_s1 + $0x420] sm:$0xf] }
   0x8   :  { %6086 = vrot.lane.b32.xlu2 %v6085_v19, %s6230_s12  ;;  %1898 = vmatpush.bf16.msra.mxu1 %v4320_v26  ;;  %v5776_v37 = vld [vmem:[%s9039_s1 + $0x464] sm:$0xf0]  ;;  %v4703_v38 = vld [vmem:[%s9039_s1 + $0x5d0] sm:$0xf]  ;;  %v6090_v46 = vpack.i.bf16 %v81_v34, %v78_v33  ;;  %v4080_v47 = vor.u32 %v5668_v31, %v4079_v30  ;;  %v5770_v48 = vld [vmem:[%s9039_s1 + $0x434] sm:$0xf0] }
   0x9   :  { %v4271_v40 = vld [vmem:[%s9039_s1 + $0x270] sm:$0xf]  ;;  %v5716_v41 = vld [vmem:[%s9039_s1 + $0x284] sm:$0xf0]  ;;  %v4512_v42 = vor.u32 %v5776_v37, %v4511_v36  ;;  %v4679_v49 = vld [vmem:[%s9039_s1 + $0x5a0] sm:$0xf]  ;;  %v4488_v55 = vor.u32 %v5770_v48, %v4487_v45 }
   0xa   :  { %v5824_v43 = vld [vmem:[%s9039_s1 + $0x5e4] sm:$0xf0]  ;;  %1885 = vmatpush.bf16.msra.mxu0 %v4104_v29  ;;  %v5818_v50 = vld [vmem:[%s9039_s1 + $0x5b4] sm:$0xf0]  ;;  %v4272_v51 = vor.u32 %v5716_v41, %v4271_v40  ;;  %v4055_v52 = vld [vmem:[%s9039_s1 + $0xc0] sm:$0xf] }
   0xb   :  { %v4704_v44 = vor.u32 %v5824_v43, %v4703_v38  ;;  %1912 = vmatpush.bf16.msra.mxu2 %v4512_v42  ;;  %v5662_v53 = vld [vmem:[%s9039_s1 + $0xd4] sm:$0xf0]  ;;  %v4247_v54 = vld [vmem:[%s9039_s1 + $0x240] sm:$0xf]  ;;  %v4680_v57 = vor.u32 %v5818_v50, %v4679_v49  ;;  %v4463_v58 = vld [vmem:[%s9039_s1 + $0x3f0] sm:$0xf] }
   0xc   :  { %1899 = vmatpush.bf16.msra.mxu1 %v4296_v35  ;;  %v5710_v56 = vld [vmem:[%s9039_s1 + $0x254] sm:$0xf0]  ;;  %v5764_v59 = vld [vmem:[%s9039_s1 + $0x404] sm:$0xf0]  ;;  %v4655_v60 = vld [vmem:[%s9039_s1 + $0x570] sm:$0xf]  ;;  %v4056_v62 = vor.u32 %v5662_v53, %v4055_v52 }
   0xd   :  { %6071 = vrot.lane.b32.xlu0 %v6070_v32, %s6232_s18  ;;  %6081 = vrot.lane.b32.xlu1 %v6080_v39, %s6231_s17  ;;  %v5812_v61 = vld [vmem:[%s9039_s1 + $0x584] sm:$0xf0]  ;;  %v4248_v63 = vor.u32 %v5710_v56, %v4247_v54  ;;  %v4031_v0 = vld [vmem:[%s9039_s1 + $0x90] sm:$0xf]  ;;  %v4464_v3 = vor.u32 %v5764_v59, %v4463_v58 }
   0xe   :  { %1926 = vmatpush.bf16.msra.mxu3 %v4704_v44  ;;  %1886 = vmatpush.bf16.msra.mxu0 %v4080_v47  ;;  %v5656_v1 = vld [vmem:[%s9039_s1 + $0xa4] sm:$0xf0]  ;;  %v4223_v2 = vld [vmem:[%s9039_s1 + $0x210] sm:$0xf]  ;;  %v4656_v5 = vor.u32 %v5812_v61, %v4655_v60  ;;  %v4439_v6 = vld [vmem:[%s9039_s1 + $0x3c0] sm:$0xf] }
   0xf   :  { %1913 = vmatpush.bf16.msra.mxu2 %v4488_v55  ;;  %v5704_v4 = vld [vmem:[%s9039_s1 + $0x224] sm:$0xf0]  ;;  %v5758_v7 = vld [vmem:[%s9039_s1 + $0x3d4] sm:$0xf0]  ;;  %v4631_v8 = vld [vmem:[%s9039_s1 + $0x540] sm:$0xf]  ;;  %v4032_v10 = vor.u32 %v5656_v1, %v4031_v0 }
  0x10   :  { %6091 = vrot.lane.b32.xlu2 %v6090_v46, %s6232_s18  ;;  %1900 = vmatpush.bf16.msra.mxu1 %v4272_v51  ;;  %v5806_v9 = vld [vmem:[%s9039_s1 + $0x554] sm:$0xf0]  ;;  %v4224_v11 = vor.u32 %v5704_v4, %v4223_v2  ;;  %v4007_v12 = vld [vmem:[%s9039_s1 + $0x60] sm:$0xf]  ;;  %v4440_v15 = vor.u32 %v5758_v7, %v4439_v6  ;;  %v4415_v18 = vld [vmem:[%s9039_s1 + $0x390] sm:$0xf] }
  0x11   :  { %v5650_v13 = vld [vmem:[%s9039_s1 + $0x74] sm:$0xf0]  ;;  %v4199_v14 = vld [vmem:[%s9039_s1 + $0x1e0] sm:$0xf]  ;;  %v4632_v17 = vor.u32 %v5806_v9, %v4631_v8  ;;  %v5752_v19 = vld [vmem:[%s9039_s1 + $0x3a4] sm:$0xf0] }
  0x12   :  { %1927 = vmatpush.bf16.msra.mxu3 %v4680_v57  ;;  %1887 = vmatpush.bf16.msra.mxu0 %v4056_v62  ;;  %v5698_v16 = vld [vmem:[%s9039_s1 + $0x1f4] sm:$0xf0]  ;;  %v4607_v20 = vld [vmem:[%s9039_s1 + $0x510] sm:$0xf]  ;;  %v5800_v21 = vld [vmem:[%s9039_s1 + $0x524] sm:$0xf0]  ;;  %v4008_v22 = vor.u32 %v5650_v13, %v4007_v12  ;;  %v4416_v27 = vor.u32 %v5752_v19, %v4415_v18 }
  0x13   :  { %1914 = vmatpush.bf16.msra.mxu2 %v4464_v3  ;;  %v4200_v23 = vor.u32 %v5698_v16, %v4199_v14  ;;  %v3983_v24 = vld [vmem:[%s9039_s1 + $0x30] sm:$0xf]  ;;  %v5644_v25 = vld [vmem:[%s9039_s1 + $0x44] sm:$0xf0]  ;;  %v4608_v29 = vor.u32 %v5800_v21, %v4607_v20  ;;  %v4391_v30 = vld [vmem:[%s9039_s1 + $0x360] sm:$0xf] }
  0x14   :  { %1901 = vmatpush.bf16.msra.mxu1 %v4248_v63  ;;  %v4175_v26 = vld [vmem:[%s9039_s1 + $0x1b0] sm:$0xf]  ;;  %v5692_v28 = vld [vmem:[%s9039_s1 + $0x1c4] sm:$0xf0]  ;;  %v5746_v31 = vld [vmem:[%s9039_s1 + $0x374] sm:$0xf0]  ;;  %v3984_v34 = vor.u32 %v5644_v25, %v3983_v24 }
  0x15   :  { %v4583_v32 = vld [vmem:[%s9039_s1 + $0x4e0] sm:$0xf]  ;;  %v5794_v33 = vld [vmem:[%s9039_s1 + $0x4f4] sm:$0xf0]  ;;  %v4176_v36 = vor.u32 %v5692_v28, %v4175_v26  ;;  %v4392_v40 = vor.u32 %v5746_v31, %v4391_v30  ;;  %v4895_v42 = vld [vmem:[%s9039_s1 + $0x750] sm:$0xf] }
  0x16   :  { %1928 = vmatpush.bf16.msra.mxu3 %v4656_v5  ;;  %1888 = vmatpush.bf16.msra.mxu0 %v4032_v10  ;;  %v3959_v35 = vld [vmem:[%s9039_s1] sm:$0xf]  ;;  %v5638_v37 = vld [vmem:[%s9039_s1 + $0x14] sm:$0xf0]  ;;  %v4584_v41 = vor.u32 %v5794_v33, %v4583_v32  ;;  %v5872_v43 = vld [vmem:[%s9039_s1 + $0x764] sm:$0xf0] }
  0x17   :  { %1915 = vmatpush.bf16.msra.mxu2 %v4440_v15  ;;  %v4151_v38 = vld [vmem:[%s9039_s1 + $0x180] sm:$0xf]  ;;  %v5686_v39 = vld [vmem:[%s9039_s1 + $0x194] sm:$0xf0]  ;;  %v5087_v44 = vld [vmem:[%s9039_s1 + $0x8d0] sm:$0xf]  ;;  %v3960_v48 = vor.u32 %v5638_v37, %v3959_v35  ;;  %v4896_v52 = vor.u32 %v5872_v43, %v4895_v42 }
  0x18   :  { %1902 = vmatpush.bf16.msra.mxu1 %v4224_v11  ;;  %v5920_v45 = vld [vmem:[%s9039_s1 + $0x8e4] sm:$0xf0]  ;;  %v4367_v46 = vld [vmem:[%s9039_s1 + $0x330] sm:$0xf]  ;;  %v4152_v51 = vor.u32 %v5686_v39, %v4151_v38  ;;  %v4871_v53 = vld [vmem:[%s9039_s1 + $0x720] sm:$0xf] }
  0x19   :  { %v5740_v47 = vld [vmem:[%s9039_s1 + $0x344] sm:$0xf0]  ;;  %v4559_v49 = vld [vmem:[%s9039_s1 + $0x4b0] sm:$0xf]  ;;  %v5088_v54 = vor.u32 %v5920_v45, %v5087_v44  ;;  %v5866_v56 = vld [vmem:[%s9039_s1 + $0x734] sm:$0xf0] }
  0x1a   :  { %1929 = vmatpush.bf16.msra.mxu3 %v4632_v17  ;;  %1889 = vmatpush.bf16.msra.mxu0 %v4008_v22  ;;  %v5788_v50 = vld [vmem:[%s9039_s1 + $0x4c4] sm:$0xf0]  ;;  %v4368_v55 = vor.u32 %v5740_v47, %v4367_v46  ;;  %v5063_v57 = vld [vmem:[%s9039_s1 + $0x8a0] sm:$0xf]  ;;  %v5914_v58 = vld [vmem:[%s9039_s1 + $0x8b4] sm:$0xf0]  ;;  %v4872_v2 = vor.u32 %v5866_v56, %v4871_v53 }
  0x1b   :  { %1916 = vmatpush.bf16.msra.mxu2 %v4416_v27  ;;  %v4560_v59 = vor.u32 %v5788_v50, %v4559_v49  ;;  %v4343_v60 = vld [vmem:[%s9039_s1 + $0x300] sm:$0xf]  ;;  %v5734_v61 = vld [vmem:[%s9039_s1 + $0x314] sm:$0xf0]  ;;  %v5677_v0 = vld [vmem:[%s9039_s1 + $0x154] sm:$0xf]  ;;  %v5064_v6 = vor.u32 %v5914_v58, %v5063_v57 }
  0x1c   :  { %1903 = vmatpush.bf16.msra.mxu1 %v4200_v23  ;;  %v4535_v62 = vld [vmem:[%s9039_s1 + $0x480] sm:$0xf]  ;;  %v5782_v63 = vld [vmem:[%s9039_s1 + $0x494] sm:$0xf0]  ;;  %v4129_v1 = vld [vmem:[%s9039_s1 + $0x168] sm:$0xf0]  ;;  %v4344_v7 = vor.u32 %v5734_v61, %v4343_v60 }
  0x1d   :  { %v4847_v3 = vld [vmem:[%s9039_s1 + $0x6f0] sm:$0xf]  ;;  %v5725_v4 = vld [vmem:[%s9039_s1 + $0x2d4] sm:$0xf]  ;;  %v4321_v5 = vld [vmem:[%s9039_s1 + $0x2e8] sm:$0xf0]  ;;  %v4536_v11 = vor.u32 %v5782_v63, %v4535_v62  ;;  %v4132_v12 = vor.u32 %v5677_v0, %v4129_v1 }
  0x1e   :  { %1930 = vmatpush.bf16.msra.mxu3 %v4608_v29  ;;  %1890 = vmatpush.bf16.msra.mxu0 %v3984_v34  ;;  %v5860_v8 = vld [vmem:[%s9039_s1 + $0x704] sm:$0xf0]  ;;  %v5039_v9 = vld [vmem:[%s9039_s1 + $0x870] sm:$0xf]  ;;  %v5671_v13 = vld [vmem:[%s9039_s1 + $0x124] sm:$0xf]  ;;  %v4324_v15 = vor.u32 %v5725_v4, %v4321_v5 }
  0x1f   :  { %1917 = vmatpush.bf16.msra.mxu2 %v4392_v40  ;;  %v5908_v10 = vld [vmem:[%s9039_s1 + $0x884] sm:$0xf0]  ;;  %v4105_v14 = vld [vmem:[%s9039_s1 + $0x138] sm:$0xf0] }
  0x20   :  { %1904 = vmatpush.bf16.msra.mxu1 %v4176_v36 }
  0x22   :  { %1931 = vmatpush.bf16.msra.mxu3 %v4584_v41  ;;  %1891 = vmatpush.bf16.msra.mxu0 %v3960_v48 }
  0x23   :  { %1918 = vmatpush.bf16.msra.mxu2 %v4368_v55 }
  0x24   :  { %1905 = vmatpush.bf16.msra.mxu1 %v4152_v51 }
  0x26   :  { %1940 = vmatpush.bf16.msrb.mxu0 %v4896_v52  ;;  %1932 = vmatpush.bf16.msra.mxu3 %v4560_v59 }
  0x28   :  { %1954 = vmatpush.bf16.msrb.mxu1 %v5088_v54 }
  0x29   :  { %16 = vsyncpa [#allocation3], 0  ;;  %v4848_v16 = vor.u32 %v5860_v8, %v4847_v3  ;;  %v5719_v17 = vld [vmem:[%s9039_s1 + $0x2a4] sm:$0xf]  ;;  %v4297_v18 = vld [vmem:[%s9039_s1 + $0x2b8] sm:$0xf0]  ;;  %1919 = vmatpush.bf16.msra.mxu2 %v4344_v7  ;;  %v5040_v19 = vor.u32 %v5908_v10, %v5039_v9  ;;  %v4108_v24 = vor.u32 %v5671_v13, %v4105_v14 }
  0x2a   :  { %1941 = vmatpush.bf16.msrb.mxu0 %v4872_v2  ;;  %v4823_v20 = vld [vmem:[%s9039_s1 + $0x6c0] sm:$0xf]  ;;  %v5854_v21 = vld [vmem:[%s9039_s1 + $0x6d4] sm:$0xf0]  ;;  %1933 = vmatpush.bf16.msra.mxu3 %v4536_v11  ;;  %v4300_v25 = vor.u32 %v5719_v17, %v4297_v18  ;;  %v5665_v26 = vld [vmem:[%s9039_s1 + $0xf4] sm:$0xf] }
  0x2b   :  { %v5015_v22 = vld [vmem:[%s9039_s1 + $0x840] sm:$0xf]  ;;  %v5902_v23 = vld [vmem:[%s9039_s1 + $0x854] sm:$0xf0]  ;;  %v4081_v27 = vld [vmem:[%s9039_s1 + $0x108] sm:$0xf0]  ;;  %v4824_v28 = vor.u32 %v5854_v21, %v4823_v20 }
  0x2c   :  { %1955 = vmatpush.bf16.msrb.mxu1 %v5064_v6  ;;  %v5713_v29 = vld [vmem:[%s9039_s1 + $0x274] sm:$0xf]  ;;  %v4273_v30 = vld [vmem:[%s9039_s1 + $0x288] sm:$0xf0]  ;;  %v5016_v31 = vor.u32 %v5902_v23, %v5015_v22  ;;  %v4799_v32 = vld [vmem:[%s9039_s1 + $0x690] sm:$0xf]  ;;  %v4084_v36 = vor.u32 %v5665_v26, %v4081_v27 }
  0x2d   :  { %1968 = vmatpush.bf16.msrb.mxu2 %v4132_v12  ;;  %v5848_v33 = vld [vmem:[%s9039_s1 + $0x6a4] sm:$0xf0]  ;;  %v4991_v34 = vld [vmem:[%s9039_s1 + $0x810] sm:$0xf]  ;;  %v4276_v37 = vor.u32 %v5713_v29, %v4273_v30  ;;  %v5659_v38 = vld [vmem:[%s9039_s1 + $0xc4] sm:$0xf] }
  0x2e   :  { %1982 = vmatpush.bf16.msrb.mxu3 %v4324_v15  ;;  %1942 = vmatpush.bf16.msrb.mxu0 %v4848_v16  ;;  %v5896_v35 = vld [vmem:[%s9039_s1 + $0x824] sm:$0xf0]  ;;  %v4057_v39 = vld [vmem:[%s9039_s1 + $0xd8] sm:$0xf0]  ;;  %v4800_v40 = vor.u32 %v5848_v33, %v4799_v32  ;;  %v5707_v41 = vld [vmem:[%s9039_s1 + $0x244] sm:$0xf] }
  0x2f   :  { %v4249_v42 = vld [vmem:[%s9039_s1 + $0x258] sm:$0xf0]  ;;  %v4992_v43 = vor.u32 %v5896_v35, %v4991_v34  ;;  %v4775_v44 = vld [vmem:[%s9039_s1 + $0x660] sm:$0xf]  ;;  %v5842_v45 = vld [vmem:[%s9039_s1 + $0x674] sm:$0xf0]  ;;  %v4060_v48 = vor.u32 %v5659_v38, %v4057_v39 }
  0x30   :  { %1956 = vmatpush.bf16.msrb.mxu1 %v5040_v19  ;;  %v4967_v46 = vld [vmem:[%s9039_s1 + $0x7e0] sm:$0xf]  ;;  %v5890_v47 = vld [vmem:[%s9039_s1 + $0x7f4] sm:$0xf0]  ;;  %v4252_v49 = vor.u32 %v5707_v41, %v4249_v42  ;;  %v4776_v50 = vor.u32 %v5842_v45, %v4775_v44  ;;  %v4751_v52 = vld [vmem:[%s9039_s1 + $0x630] sm:$0xf] }
  0x31   :  { %1969 = vmatpush.bf16.msrb.mxu2 %v4108_v24  ;;  %v4968_v51 = vor.u32 %v5890_v47, %v4967_v46  ;;  %v5836_v53 = vld [vmem:[%s9039_s1 + $0x644] sm:$0xf0]  ;;  %v4943_v54 = vld [vmem:[%s9039_s1 + $0x7b0] sm:$0xf]  ;;  %v5653_v57 = vld [vmem:[%s9039_s1 + $0x94] sm:$0xf] }
  0x32   :  { %1983 = vmatpush.bf16.msrb.mxu3 %v4300_v25  ;;  %1943 = vmatpush.bf16.msrb.mxu0 %v4824_v28  ;;  %v4752_v55 = vor.u32 %v5836_v53, %v4751_v52  ;;  %v5884_v56 = vld [vmem:[%s9039_s1 + $0x7c4] sm:$0xf0]  ;;  %v4033_v58 = vld [vmem:[%s9039_s1 + $0xa8] sm:$0xf0]  ;;  %v5701_v61 = vld [vmem:[%s9039_s1 + $0x214] sm:$0xf] }
  0x33   :  { %v4944_v59 = vor.u32 %v5884_v56, %v4943_v54  ;;  %v4036_v60 = vor.u32 %v5653_v57, %v4033_v58  ;;  %v4225_v62 = vld [vmem:[%s9039_s1 + $0x228] sm:$0xf0]  ;;  %v4727_v0 = vld [vmem:[%s9039_s1 + $0x600] sm:$0xf]  ;;  %v5830_v1 = vld [vmem:[%s9039_s1 + $0x614] sm:$0xf0] }
  0x34   :  { %1957 = vmatpush.bf16.msrb.mxu1 %v5016_v31  ;;  %v4228_v63 = vor.u32 %v5701_v61, %v4225_v62  ;;  %v4728_v2 = vor.u32 %v5830_v1, %v4727_v0  ;;  %v4919_v3 = vld [vmem:[%s9039_s1 + $0x780] sm:$0xf]  ;;  %v5878_v4 = vld [vmem:[%s9039_s1 + $0x794] sm:$0xf0]  ;;  %v5647_v6 = vld [vmem:[%s9039_s1 + $0x64] sm:$0xf] }
  0x35   :  { %1970 = vmatpush.bf16.msrb.mxu2 %v4084_v36  ;;  %v4920_v5 = vor.u32 %v5878_v4, %v4919_v3  ;;  %v4009_v7 = vld [vmem:[%s9039_s1 + $0x78] sm:$0xf0]  ;;  %v5695_v8 = vld [vmem:[%s9039_s1 + $0x1e4] sm:$0xf]  ;;  %v5641_v12 = vld [vmem:[%s9039_s1 + $0x34] sm:$0xf] }
  0x36   :  { %1984 = vmatpush.bf16.msrb.mxu3 %v4276_v37  ;;  %1944 = vmatpush.bf16.msrb.mxu0 %v4800_v40  ;;  %v4012_v9 = vor.u32 %v5647_v6, %v4009_v7  ;;  %v4201_v10 = vld [vmem:[%s9039_s1 + $0x1f8] sm:$0xf0]  ;;  %v3985_v13 = vld [vmem:[%s9039_s1 + $0x48] sm:$0xf0]  ;;  %v5689_v15 = vld [vmem:[%s9039_s1 + $0x1b4] sm:$0xf] }
  0x37   :  { %v4204_v11 = vor.u32 %v5695_v8, %v4201_v10  ;;  %v3988_v14 = vor.u32 %v5641_v12, %v3985_v13  ;;  %v4177_v16 = vld [vmem:[%s9039_s1 + $0x1c8] sm:$0xf0]  ;;  %v5635_v18 = vld [vmem:[%s9039_s1 + $0x4] sm:$0xf]  ;;  %v3961_v19 = vld [vmem:[%s9039_s1 + $0x18] sm:$0xf0] }
  0x38   :  { %1958 = vmatpush.bf16.msrb.mxu1 %v4992_v43  ;;  %v4180_v17 = vor.u32 %v5689_v15, %v4177_v16  ;;  %v5683_v20 = vld [vmem:[%s9039_s1 + $0x184] sm:$0xf]  ;;  %v3964_v21 = vor.u32 %v5635_v18, %v3961_v19  ;;  %v4153_v22 = vld [vmem:[%s9039_s1 + $0x198] sm:$0xf0]  ;;  %v5773_v25 = vld [vmem:[%s9039_s1 + $0x454] sm:$0xf] }
  0x39   :  { %1971 = vmatpush.bf16.msrb.mxu2 %v4060_v48  ;;  %v4156_v23 = vor.u32 %v5683_v20, %v4153_v22  ;;  %v4513_v27 = vld [vmem:[%s9039_s1 + $0x468] sm:$0xf0]  ;;  %v5821_v28 = vld [vmem:[%s9039_s1 + $0x5d4] sm:$0xf]  ;;  %v44_v32 = vld [vmem:[%s9038_s0 + $0x20] sm:$0xff]  ;;  %vm121_vm1 = vcmask 785408  }
  0x3a   :  { %1985 = vmatpush.bf16.msrb.mxu3 %v4252_v49  ;;  %1945 = vmatpush.bf16.msrb.mxu0 %v4776_v50  ;;  %v4705_v29 = vld [vmem:[%s9039_s1 + $0x5e8] sm:$0xf0]  ;;  %vm124_vm2 = vcmask 523264   ;;  %v40_v34 = vld [vmem:[%s9038_s0] sm:$0xff]  ;;  %v52_v37 = vrot.slane %v44_v32, 1  ;;  %v4516_v39 = vor.u32 %v5773_v25, %v4513_v27  ;;  %vm127_vm3 = vcmask 261120  }
  0x3b   :  { %v51_v38 = vrot.slane %v40_v34, 1  ;;  %v4708_v40 = vor.u32 %v5821_v28, %v4705_v29  ;;  %v5767_v45 = vld [vmem:[%s9039_s1 + $0x424] sm:$0xf]  ;;  %v4489_v48 = vld [vmem:[%s9039_s1 + $0x438] sm:$0xf0]  ;;  %s6233_s28 = smov 44  }
  0x3c   :  { %1959 = vmatpush.bf16.msrb.mxu1 %v4968_v51  ;;  %v5815_v49 = vld [vmem:[%s9039_s1 + $0x5a4] sm:$0xf]  ;;  %v4681_v50 = vld [vmem:[%s9039_s1 + $0x5b8] sm:$0xf0]  ;;  %v5761_v51 = vld [vmem:[%s9039_s1 + $0x3f4] sm:$0xf]  ;;  %v4492_v56 = vor.u32 %v5767_v45, %v4489_v48 }
  0x3d   :  { %1972 = vmatpush.bf16.msrb.mxu2 %v4036_v60  ;;  %v4465_v52 = vld [vmem:[%s9039_s1 + $0x408] sm:$0xf0]  ;;  %v5869_v53 = vld [vmem:[%s9039_s1 + $0x754] sm:$0xf]  ;;  %v4684_v57 = vor.u32 %v5815_v49, %v4681_v50  ;;  %v53_v0 = vsel %vm50_vm0, %v51_v38, %v52_v37  ;;  %v57_v1 = vsel %vm50_vm0, %v52_v37, %v51_v38  ;;  %v5755_v12 = vld [vmem:[%s9039_s1 + $0x3c4] sm:$0xf] }
  0x3e   :  { %1946 = vmatpush.bf16.msrb.mxu0 %v4752_v55  ;;  %1986 = vmatpush.bf16.msrb.mxu3 %v4228_v63  ;;  %v4897_v54 = vld [vmem:[%s9039_s1 + $0x768] sm:$0xf0]  ;;  %v5917_v58 = vld [vmem:[%s9039_s1 + $0x8d4] sm:$0xf]  ;;  %v4468_v4 = vor.u32 %v5761_v51, %v4465_v52  ;;  %v5863_v18 = vld [vmem:[%s9039_s1 + $0x724] sm:$0xf] }
  0x3f   :  { %v4657_v6 = vld [vmem:[%s9039_s1 + $0x588] sm:$0xf0]  ;;  %v4900_v7 = vor.u32 %v5869_v53, %v4897_v54  ;;  %v4873_v19 = vld [vmem:[%s9039_s1 + $0x738] sm:$0xf0]  ;;  %v5911_v22 = vld [vmem:[%s9039_s1 + $0x8a4] sm:$0xf] }
  0x40   :  { %1960 = vmatpush.bf16.msrb.mxu1 %v4944_v59  ;;  %v5089_v59 = vld [vmem:[%s9039_s1 + $0x8e8] sm:$0xf0]  ;;  %v5803_v27 = vld [vmem:[%s9039_s1 + $0x544] sm:$0xf]  ;;  %v4633_v28 = vld [vmem:[%s9039_s1 + $0x558] sm:$0xf0] }
  0x41   :  { %1973 = vmatpush.bf16.msrb.mxu2 %v4012_v9  ;;  %v5092_v10 = vor.u32 %v5917_v58, %v5089_v59  ;;  %v5857_v37 = vld [vmem:[%s9039_s1 + $0x6f4] sm:$0xf]  ;;  %v4849_v38 = vld [vmem:[%s9039_s1 + $0x708] sm:$0xf0]  ;;  %v5743_v49 = vld [vmem:[%s9039_s1 + $0x364] sm:$0xf] }
  0x42   :  { %1947 = vmatpush.bf16.msrb.mxu0 %v4728_v2  ;;  %1987 = vmatpush.bf16.msrb.mxu3 %v4204_v11  ;;  %v4852_v48 = vor.u32 %v5857_v37, %v4849_v38  ;;  %v4393_v50 = vld [vmem:[%s9039_s1 + $0x378] sm:$0xf0]  ;;  %v5791_v54 = vld [vmem:[%s9039_s1 + $0x4e4] sm:$0xf]  ;;  %v5675_v37 = vld [vmem:[%s9039_s1 + $0x13c] sm:$0xf0] }
  0x43   :  { %v5899_v58 = vld [vmem:[%s9039_s1 + $0x844] sm:$0xf]  ;;  %v5017_v59 = vld [vmem:[%s9039_s1 + $0x858] sm:$0xf0]  ;;  %v4303_v38 = vld [vmem:[%s9039_s1 + $0x2a8] sm:$0xf] }
  0x44   :  { %1961 = vmatpush.bf16.msrb.mxu1 %v4920_v5  ;;  %v5809_v5 = vld [vmem:[%s9039_s1 + $0x574] sm:$0xf]  ;;  %vm2412_vm4 = vcmask 359424   ;;  %vm2522_vm5 = vcmask 1045504   ;;  %s6235_s16 = smov 80   ;;  %vm2487_vm6 = vcmask 719872  }
  0x45   :  { %1974 = vmatpush.bf16.msrb.mxu2 %v3988_v14  ;;  %s6236_s23 = smov 4   ;;  %s6237_s24 = smov 84   ;;  %vm3261_vm7 = vcmask 1043456   ;;  %vm2609_vm8 = vcmask 654336   ;;  %vm2612_vm9 = vcmask 293888   ;;  %vm2596_vm10 = vcmask 687104  }
  0x46   :  { %1988 = vmatpush.bf16.msrb.mxu3 %v4180_v17  ;;  %v4441_v17 = vld [vmem:[%s9039_s1 + $0x3d8] sm:$0xf0]  ;;  %vm3257_vm11 = vcmask 982016   ;;  %vm2549_vm12 = vcmask 31744   ;;  %vm2603_vm13 = vcmask 326656   ;;  %vm2606_vm14 = vcmask 1014784  }
  0x47   :  { %v4444_v29 = vor.u32 %v5755_v12, %v4441_v17  ;;  %v5779_v12 = vld [vmem:[%s9039_s1 + $0x484] sm:$0xf]  ;;  %vm3457_vm15 = vcmask 392192   ;;  %s6241_s27 = smov [#allocation2]   ;;  %s3948_s13 = sshll.u32 %s9049_s11, 4  ;;  %s3949_s13 = int_to_ptr.hbm [resolvable:$true] %s3948_s13 }
  0x48   :  { %v5839_v17 = vld [vmem:[%s9039_s1 + $0x664] sm:$0xf]  ;;  %s3946_s29 = sshll.u32 %s6241_s27, 4  ;;  %s3947_s29 = int_to_ptr.vmem [resolvable:$true] %s3946_s29 }
  0x49   :  { %1975 = vmatpush.bf16.msrb.mxu2 %v3964_v21  ;;  %v4660_v21 = vor.u32 %v5809_v5, %v4657_v6  ;;  %v4561_v5 = vld [vmem:[%s9039_s1 + $0x4c8] sm:$0xf0]  ;;  %v5893_v6 = vld [vmem:[%s9039_s1 + $0x814] sm:$0xf] }
  0x4a   :  { %1989 = vmatpush.bf16.msrb.mxu3 %v4156_v23  ;;  %v5065_v23 = vld [vmem:[%s9039_s1 + $0x8b8] sm:$0xf0] }
  0x62   :  { %v6716_v24 = vpop.permute.xlu2 %6086 }
  0x63   :  { %v6089_v25 = vunpack.i.h.bf16 %v6716_v24 }
  0x6a   :  { %v6092_v60 = vpop.permute.xlu2 %6091 }
  0x6b   :  { %v6094_v11 = vunpack.i.h.bf16 %v6092_v60  ;;  %v6093_v16 = vunpack.i.l.bf16 %v6092_v60  ;;  %v4396_v60 = vor.u32 %v5743_v49, %v4393_v50 }
  0x77   :  { %v6067_v26 = vpop.permute.xlu0 %6066  ;;  %v6077_v33 = vpop.permute.xlu1 %6076 }
  0x78   :  { %v6069_v30 = vunpack.i.h.bf16 %v6067_v26  ;;  %v6068_v31 = vunpack.i.l.bf16 %v6067_v26  ;;  %v6079_v35 = vunpack.i.h.bf16 %v6077_v33  ;;  %v6078_v36 = vunpack.i.l.bf16 %v6077_v33  ;;  %v5749_v33 = vld [vmem:[%s9039_s1 + $0x394] sm:$0xf] }
  0x79   :  { %v6088_v26 = vunpack.i.l.bf16 %v6716_v24  ;;  %v135_v24 = vsel %vm127_vm3, %v6089_v25, %v6094_v11  ;;  %v4345_v11 = vld [vmem:[%s9039_s1 + $0x318] sm:$0xf0] }
  0x7a   :  { %v123_v41 = vsel %vm121_vm1, %v44_v32, %v6079_v35  ;;  %v126_v42 = vsel %vm124_vm2, %v6079_v35, %v6069_v30  ;;  %v122_v43 = vsel %vm121_vm1, %v40_v34, %v6078_v36  ;;  %v125_v44 = vsel %vm124_vm2, %v6078_v36, %v6068_v31  ;;  %v4417_v34 = vld [vmem:[%s9039_s1 + $0x3a8] sm:$0xf0]  ;;  %v5797_v36 = vld [vmem:[%s9039_s1 + $0x514] sm:$0xf] }
  0x7b   :  { %v6743_v46 = vpack.c.bf16 %v123_v41, %v122_v43  ;;  %v6745_v47 = vpack.c.bf16 %v126_v42, %v125_v44  ;;  %v5068_v32 = vor.u32 %v5911_v22, %v5065_v23  ;;  %v4636_v35 = vor.u32 %v5803_v27, %v4633_v28  ;;  %v4609_v41 = vld [vmem:[%s9039_s1 + $0x528] sm:$0xf0]  ;;  %v5905_v42 = vld [vmem:[%s9039_s1 + $0x874] sm:$0xf]  ;;  %v4135_v22 = vld [vmem:[%s9039_s1 + $0x158] sm:$0xf] }
  0x7c   :  { %v5041_v43 = vld [vmem:[%s9039_s1 + $0x888] sm:$0xf0]  ;;  %v4420_v45 = vor.u32 %v5749_v33, %v4417_v34  ;;  %v4612_v52 = vor.u32 %v5797_v36, %v4609_v41  ;;  %v5681_v23 = vld [vmem:[%s9039_s1 + $0x16c] sm:$0xf0]  ;;  %v5881_v34 = vld [vmem:[%s9039_s1 + $0x7b4] sm:$0xf] }
  0x7d   :  { %1892 = vmatmul.bf16.vlgmr.msra.gmra.mxu0 %v6743_v46  ;;  %1906 = vmatmul.bf16.vlgmr.msra.gmra.mxu1 %v6745_v47  ;;  %v5044_v53 = vor.u32 %v5905_v42, %v5041_v43  ;;  %v4111_v36 = vld [vmem:[%s9039_s1 + $0x128] sm:$0xf]  ;;  %v5827_v41 = vld [vmem:[%s9039_s1 + $0x604] sm:$0xf]  ;;  %v4729_v43 = vld [vmem:[%s9039_s1 + $0x618] sm:$0xf0] }
  0x7e   :  { %1996 = vmatpush.bf16.msra.mxu0 %v4516_v39  ;;  %2010 = vmatpush.bf16.msra.mxu1 %v4708_v40  ;;  %v4112_v49 = vor.u32 %v5675_v37, %v4111_v36 }
  0x7f   :  { %v6072_v55 = vpop.permute.xlu0 %6071  ;;  %v6082_v63 = vpop.permute.xlu1 %6081 }
  0x80   :  { %v6074_v61 = vunpack.i.h.bf16 %v6072_v55  ;;  %v6073_v62 = vunpack.i.l.bf16 %v6072_v55  ;;  %v6084_v2 = vunpack.i.h.bf16 %v6082_v63  ;;  %v6083_v3 = vunpack.i.l.bf16 %v6082_v63  ;;  %v5851_v55 = vld [vmem:[%s9039_s1 + $0x6c4] sm:$0xf]  ;;  %v4369_v63 = vld [vmem:[%s9039_s1 + $0x348] sm:$0xf0] }
  0x82   :  { %v128_v8 = vsel %vm127_vm3, %v6068_v31, %v6073_v62  ;;  %v129_v9 = vsel %vm127_vm3, %v6069_v30, %v6074_v61  ;;  %v130_v14 = vsel %vm121_vm1, %v53_v0, %v6083_v3  ;;  %v131_v15 = vsel %vm121_vm1, %v57_v1, %v6084_v2  ;;  %1997 = vmatpush.bf16.msra.mxu0 %v4492_v56  ;;  %v4825_v56 = vld [vmem:[%s9039_s1 + $0x6d8] sm:$0xf0]  ;;  %v5737_v62 = vld [vmem:[%s9039_s1 + $0x334] sm:$0xf] }
  0x83   :  { %v6789_v13 = vpack.c.bf16 %v129_v9, %v128_v8  ;;  %v6802_v20 = vpack.c.bf16 %v131_v15, %v130_v14  ;;  %2011 = vmatpush.bf16.msra.mxu1 %v4684_v57  ;;  %v4876_v30 = vor.u32 %v5863_v18, %v4873_v19  ;;  %v134_v31 = vsel %vm127_vm3, %v6088_v26, %v6093_v16  ;;  %v4585_v57 = vld [vmem:[%s9039_s1 + $0x4f8] sm:$0xf0]  ;;  %v5887_v19 = vld [vmem:[%s9039_s1 + $0x7e4] sm:$0xf] }
  0x84   :  { %v133_v39 = vsel %vm124_vm2, %v6084_v2, %v6089_v25  ;;  %v132_v40 = vsel %vm124_vm2, %v6083_v3, %v6088_v26  ;;  %v6848_v44 = vpack.c.bf16 %v135_v24, %v134_v31  ;;  %v4828_v61 = vor.u32 %v5851_v55, %v4825_v56  ;;  %v5785_v2 = vld [vmem:[%s9039_s1 + $0x4b4] sm:$0xf]  ;;  %v4537_v16 = vld [vmem:[%s9039_s1 + $0x498] sm:$0xf0]  ;;  %v4327_v25 = vld [vmem:[%s9039_s1 + $0x2d8] sm:$0xf] }
  0x85   :  { %1920 = vmatmul.bf16.vlgmr.msra.gmra.mxu2 %v6789_v13  ;;  %1934 = vmatmul.bf16.vlgmr.msra.gmra.mxu3 %v6802_v20  ;;  %v6856_v51 = vpack.c.bf16 %v133_v39, %v132_v40  ;;  %v4588_v0 = vor.u32 %v5791_v54, %v4585_v57  ;;  %v5020_v1 = vor.u32 %v5899_v58, %v5017_v59  ;;  %v5845_v3 = vld [vmem:[%s9039_s1 + $0x694] sm:$0xf]  ;;  %v4777_v18 = vld [vmem:[%s9039_s1 + $0x678] sm:$0xf0]  ;;  %v5729_v26 = vld [vmem:[%s9039_s1 + $0x2ec] sm:$0xf0] }
  0x86   :  { %2024 = vmatpush.bf16.msra.mxu2 %v4900_v7  ;;  %1998 = vmatpush.bf16.msra.mxu0 %v4468_v4  ;;  %v4801_v4 = vld [vmem:[%s9039_s1 + $0x6a8] sm:$0xf0]  ;;  %v4372_v8 = vor.u32 %v5737_v62, %v4369_v63  ;;  %v4564_v14 = vor.u32 %v5785_v2, %v4561_v5  ;;  %v4780_v28 = vor.u32 %v5839_v17, %v4777_v18  ;;  %v5833_v31 = vld [vmem:[%s9039_s1 + $0x634] sm:$0xf]  ;;  %v5723_v39 = vld [vmem:[%s9039_s1 + $0x2bc] sm:$0xf0] }
  0x87   :  { %2038 = vmatpush.bf16.msra.mxu3 %v5092_v10  ;;  %2012 = vmatpush.bf16.msra.mxu1 %v4660_v21  ;;  %v4993_v7 = vld [vmem:[%s9039_s1 + $0x828] sm:$0xf0]  ;;  %v4804_v9 = vor.u32 %v5845_v3, %v4801_v4  ;;  %v5731_v10 = vld [vmem:[%s9039_s1 + $0x304] sm:$0xf]  ;;  %v4969_v21 = vld [vmem:[%s9039_s1 + $0x7f8] sm:$0xf0]  ;;  %v4328_v33 = vor.u32 %v5729_v26, %v4327_v25  ;;  %v4304_v50 = vor.u32 %v5723_v39, %v4303_v38 }
  0x88   :  { %v4996_v15 = vor.u32 %v5893_v6, %v4993_v7  ;;  %v4348_v27 = vor.u32 %v5731_v10, %v4345_v11  ;;  %v4753_v24 = vld [vmem:[%s9039_s1 + $0x648] sm:$0xf0]  ;;  %v5777_v54 = vld [vmem:[%s9039_s1 + $0x46c] sm:$0xf0]  ;;  %v4279_v56 = vld [vmem:[%s9039_s1 + $0x278] sm:$0xf]  ;;  %v4732_v58 = vor.u32 %v5827_v41, %v4729_v43 }
  0x89   :  { %v4756_v40 = vor.u32 %v5833_v31, %v4753_v24  ;;  %v5669_v55 = vld [vmem:[%s9039_s1 + $0x10c] sm:$0xf0]  ;;  %v4711_v59 = vld [vmem:[%s9039_s1 + $0x5d8] sm:$0xf]  ;;  %v4495_v2 = vld [vmem:[%s9039_s1 + $0x428] sm:$0xf] }
  0x8a   :  { %2025 = vmatpush.bf16.msra.mxu2 %v4876_v30  ;;  %1999 = vmatpush.bf16.msra.mxu0 %v4444_v29  ;;  %v4540_v29 = vor.u32 %v5779_v12, %v4537_v16  ;;  %v4972_v30 = vor.u32 %v5887_v19, %v4969_v21  ;;  %v5717_v57 = vld [vmem:[%s9039_s1 + $0x28c] sm:$0xf0]  ;;  %v5771_v3 = vld [vmem:[%s9039_s1 + $0x43c] sm:$0xf0]  ;;  %v4255_v6 = vld [vmem:[%s9039_s1 + $0x248] sm:$0xf] }
  0x8b   :  { %2039 = vmatpush.bf16.msra.mxu3 %v5068_v32  ;;  %2013 = vmatpush.bf16.msra.mxu1 %v4636_v35  ;;  %v4136_v32 = vor.u32 %v5681_v23, %v4135_v22  ;;  %v4945_v35 = vld [vmem:[%s9039_s1 + $0x7c8] sm:$0xf0]  ;;  %v5663_v5 = vld [vmem:[%s9039_s1 + $0xdc] sm:$0xf0]  ;;  %v4496_v10 = vor.u32 %v5771_v3, %v4495_v2  ;;  %v5765_v16 = vld [vmem:[%s9039_s1 + $0x40c] sm:$0xf0] }
  0x8c   :  { %v4948_v42 = vor.u32 %v5881_v34, %v4945_v35  ;;  %v5711_v7 = vld [vmem:[%s9039_s1 + $0x25c] sm:$0xf0]  ;;  %v5657_v18 = vld [vmem:[%s9039_s1 + $0xac] sm:$0xf0]  ;;  %v4231_v19 = vld [vmem:[%s9039_s1 + $0x218] sm:$0xf] }
  0x8d   :  { %1948 = vmatmul.bf16.vlgmr.msrb.gmra.mxu0 %v6856_v51  ;;  %1962 = vmatmul.bf16.vlgmr.msrb.gmra.mxu1 %v6848_v44  ;;  %v4256_v12 = vor.u32 %v5711_v7, %v4255_v6  ;;  %v5705_v21 = vld [vmem:[%s9039_s1 + $0x22c] sm:$0xf0]  ;;  %v4663_v22 = vld [vmem:[%s9039_s1 + $0x578] sm:$0xf]  ;;  %v5651_v24 = vld [vmem:[%s9039_s1 + $0x7c] sm:$0xf0] }
  0x8e   :  { %2000 = vmatpush.bf16.msra.mxu0 %v4420_v45  ;;  %2026 = vmatpush.bf16.msra.mxu2 %v4852_v48  ;;  %v5875_v45 = vld [vmem:[%s9039_s1 + $0x784] sm:$0xf]  ;;  %v4921_v48 = vld [vmem:[%s9039_s1 + $0x798] sm:$0xf0]  ;;  %v5813_v23 = vld [vmem:[%s9039_s1 + $0x58c] sm:$0xf0] }
  0x8f   :  { %2014 = vmatpush.bf16.msra.mxu1 %v4612_v52  ;;  %2040 = vmatpush.bf16.msra.mxu3 %v5044_v53  ;;  %v4087_v52 = vld [vmem:[%s9039_s1 + $0xf8] sm:$0xf]  ;;  %v4664_v31 = vor.u32 %v5813_v23, %v4663_v22  ;;  %v4639_v34 = vld [vmem:[%s9039_s1 + $0x548] sm:$0xf]  ;;  %v5807_v35 = vld [vmem:[%s9039_s1 + $0x55c] sm:$0xf0] }
  0x90   :  { %v4519_v53 = vld [vmem:[%s9039_s1 + $0x458] sm:$0xf]  ;;  %v4088_v63 = vor.u32 %v5669_v55, %v4087_v52  ;;  %v5753_v41 = vld [vmem:[%s9039_s1 + $0x3ac] sm:$0xf0]  ;;  %vm3728_vm1 = vcmask 130048  }
  0x91   :  { %v4520_v62 = vor.u32 %v5777_v54, %v4519_v53  ;;  %v3991_v39 = vld [vmem:[%s9039_s1 + $0x38] sm:$0xf]  ;;  %v5645_v43 = vld [vmem:[%s9039_s1 + $0x4c] sm:$0xf0]  ;;  %v3967_v53 = vld [vmem:[%s9039_s1 + $0x8] sm:$0xf] }
  0x92   :  { %2001 = vmatpush.bf16.msra.mxu0 %v4396_v60  ;;  %2027 = vmatpush.bf16.msra.mxu2 %v4828_v61  ;;  %v5825_v60 = vld [vmem:[%s9039_s1 + $0x5ec] sm:$0xf0]  ;;  %v4924_v61 = vor.u32 %v5875_v45, %v4921_v48  ;;  %v4183_v45 = vld [vmem:[%s9039_s1 + $0x1b8] sm:$0xf]  ;;  %v3992_v54 = vor.u32 %v5645_v43, %v3991_v39  ;;  %v5023_v43 = vld [vmem:[%s9039_s1 + $0x848] sm:$0xf] }
  0x93   :  { %2015 = vmatpush.bf16.msra.mxu1 %v4588_v0  ;;  %2041 = vmatpush.bf16.msra.mxu3 %v5020_v1  ;;  %v4280_v0 = vor.u32 %v5717_v57, %v4279_v56  ;;  %v4063_v1 = vld [vmem:[%s9039_s1 + $0xc8] sm:$0xf]  ;;  %v4712_v4 = vor.u32 %v5825_v60, %v4711_v59  ;;  %v5693_v48 = vld [vmem:[%s9039_s1 + $0x1cc] sm:$0xf0]  ;;  %v5639_v56 = vld [vmem:[%s9039_s1 + $0x1c] sm:$0xf0] }
  0x94   :  { %v4064_v11 = vor.u32 %v5663_v5, %v4063_v1  ;;  %v4184_v55 = vor.u32 %v5693_v48, %v4183_v45  ;;  %v4399_v57 = vld [vmem:[%s9039_s1 + $0x368] sm:$0xf]  ;;  %v5873_v1 = vld [vmem:[%s9039_s1 + $0x76c] sm:$0xf0]  ;;  %v5095_v3 = vld [vmem:[%s9039_s1 + $0x8d8] sm:$0xf]  ;;  %v3968_v5 = vor.u32 %v5639_v56, %v3967_v53 }
  0x95   :  { %1976 = vmatmul.bf16.vlgmr.msrb.gmra.mxu2 %v6743_v46  ;;  %1990 = vmatmul.bf16.vlgmr.msrb.gmra.mxu3 %v6745_v47  ;;  %v4159_v60 = vld [vmem:[%s9039_s1 + $0x188] sm:$0xf]  ;;  %v5903_v48 = vld [vmem:[%s9039_s1 + $0x85c] sm:$0xf0]  ;;  %v4305_v53 = vld [vmem:[%s9039_s1 + $0x2c0] sm:$0xf0] }
  0x96   :  { %2002 = vmatpush.bf16.msra.mxu0 %v4372_v8  ;;  %2028 = vmatpush.bf16.msra.mxu2 %v4804_v9  ;;  %v4687_v8 = vld [vmem:[%s9039_s1 + $0x5a8] sm:$0xf]  ;;  %v5819_v9 = vld [vmem:[%s9039_s1 + $0x5bc] sm:$0xf0] }
  0x97   :  { %2016 = vmatpush.bf16.msra.mxu1 %v4564_v14  ;;  %2042 = vmatpush.bf16.msra.mxu3 %v4996_v15  ;;  %v4039_v14 = vld [vmem:[%s9039_s1 + $0x98] sm:$0xf]  ;;  %v4688_v17 = vor.u32 %v5819_v9, %v4687_v8 }
  0x98   :  { %v4471_v15 = vld [vmem:[%s9039_s1 + $0x3f8] sm:$0xf]  ;;  %v4040_v26 = vor.u32 %v5657_v18, %v4039_v14  ;;  %v5789_v14 = vld [vmem:[%s9039_s1 + $0x4cc] sm:$0xf0]  ;;  %v5915_v18 = vld [vmem:[%s9039_s1 + $0x8bc] sm:$0xf0] }
  0x99   :  { %v4472_v25 = vor.u32 %v5765_v16, %v4471_v15  ;;  %v4375_v9 = vld [vmem:[%s9039_s1 + $0x338] sm:$0xf]  ;;  %v4879_v15 = vld [vmem:[%s9039_s1 + $0x728] sm:$0xf]  ;;  %v5867_v16 = vld [vmem:[%s9039_s1 + $0x73c] sm:$0xf0] }
  0x9a   :  { %2003 = vmatpush.bf16.msra.mxu0 %v4348_v27  ;;  %2029 = vmatpush.bf16.msra.mxu2 %v4780_v28  ;;  %v4232_v27 = vor.u32 %v5705_v21, %v4231_v19  ;;  %v4015_v28 = vld [vmem:[%s9039_s1 + $0x68] sm:$0xf]  ;;  %v4880_v23 = vor.u32 %v5867_v16, %v4879_v15 }
  0x9b   :  { %2017 = vmatpush.bf16.msra.mxu1 %v4540_v29  ;;  %2043 = vmatpush.bf16.msra.mxu3 %v4972_v30  ;;  %v4447_v29 = vld [vmem:[%s9039_s1 + $0x3c8] sm:$0xf]  ;;  %v5759_v30 = vld [vmem:[%s9039_s1 + $0x3dc] sm:$0xf0]  ;;  %v4016_v37 = vor.u32 %v5651_v24, %v4015_v28  ;;  %v5909_v24 = vld [vmem:[%s9039_s1 + $0x88c] sm:$0xf0] }
  0x9c   :  { %v4448_v36 = vor.u32 %v5759_v30, %v4447_v29  ;;  %v4351_v21 = vld [vmem:[%s9039_s1 + $0x308] sm:$0xf]  ;;  %v4855_v29 = vld [vmem:[%s9039_s1 + $0x6f8] sm:$0xf]  ;;  %v5861_v30 = vld [vmem:[%s9039_s1 + $0x70c] sm:$0xf0] }
  0x9d   :  { %2004 = vmatmul.bf16.vlgmr.msra.gmra.mxu0 %v6789_v13 }
  0x9e   :  { %2052 = vmatpush.bf16.msrb.mxu0 %v4136_v32  ;;  %2018 = vmatmul.bf16.vlgmr.msra.gmra.mxu1 %v6802_v20  ;;  %v4207_v32 = vld [vmem:[%s9039_s1 + $0x1e8] sm:$0xf] }
  0x9f   :  { %2066 = vmatpush.bf16.msrb.mxu1 %v4328_v33  ;;  %2030 = vmatpush.bf16.msra.mxu2 %v4756_v40  ;;  %v5699_v33 = vld [vmem:[%s9039_s1 + $0x1fc] sm:$0xf0]  ;;  %v4423_v40 = vld [vmem:[%s9039_s1 + $0x398] sm:$0xf] }
  0xa0   :  { %2044 = vmatpush.bf16.msra.mxu3 %v4948_v42  ;;  %v4208_v38 = vor.u32 %v5699_v33, %v4207_v32  ;;  %v4640_v42 = vor.u32 %v5807_v35, %v4639_v34  ;;  %v4424_v52 = vor.u32 %v5753_v41, %v4423_v40  ;;  %v5678_v32 = vld [vmem:[%s9039_s1 + $0x15c] sm:$0xf]  ;;  %v4137_v33 = vld [vmem:[%s9039_s1 + $0x170] sm:$0xf0]  ;;  %v4831_v41 = vld [vmem:[%s9039_s1 + $0x6c8] sm:$0xf] }
  0xa1   :  { %v5726_v35 = vld [vmem:[%s9039_s1 + $0x2dc] sm:$0xf]  ;;  %v4140_v40 = vor.u32 %v5678_v32, %v4137_v33  ;;  %v5831_v32 = vld [vmem:[%s9039_s1 + $0x61c] sm:$0xf0]  ;;  %v4927_v33 = vld [vmem:[%s9039_s1 + $0x788] sm:$0xf] }
  0xa2   :  { %2053 = vmatpush.bf16.msrb.mxu0 %v4112_v49  ;;  %v4615_v49 = vld [vmem:[%s9039_s1 + $0x518] sm:$0xf] }
  0xa3   :  { %2067 = vmatpush.bf16.msrb.mxu1 %v4304_v50  ;;  %2031 = vmatpush.bf16.msra.mxu2 %v4732_v58  ;;  %v5801_v50 = vld [vmem:[%s9039_s1 + $0x52c] sm:$0xf0]  ;;  %v5747_v58 = vld [vmem:[%s9039_s1 + $0x37c] sm:$0xf0] }
  0xa4   :  { %2045 = vmatpush.bf16.msra.mxu3 %v4924_v61  ;;  %v4616_v59 = vor.u32 %v5801_v50, %v4615_v49  ;;  %v5687_v61 = vld [vmem:[%s9039_s1 + $0x19c] sm:$0xf0]  ;;  %v4400_v2 = vor.u32 %v5747_v58, %v4399_v57  ;;  %v5672_v49 = vld [vmem:[%s9039_s1 + $0x12c] sm:$0xf]  ;;  %v4113_v50 = vld [vmem:[%s9039_s1 + $0x140] sm:$0xf0] }
  0xa5   :  { %v4160_v6 = vor.u32 %v5687_v61, %v4159_v60  ;;  %v4116_v56 = vor.u32 %v5672_v49, %v4113_v50  ;;  %v4807_v57 = vld [vmem:[%s9039_s1 + $0x698] sm:$0xf]  ;;  %v5849_v58 = vld [vmem:[%s9039_s1 + $0x6ac] sm:$0xf0] }
  0xa6   :  { %2054 = vmatpush.bf16.msrb.mxu0 %v4088_v63  ;;  %2032 = vmatmul.bf16.vlgmr.msra.gmra.mxu2 %v6856_v51  ;;  %v5795_v63 = vld [vmem:[%s9039_s1 + $0x4fc] sm:$0xf0]  ;;  %v5897_v61 = vld [vmem:[%s9039_s1 + $0x82c] sm:$0xf0] }
  0xa7   :  { %2080 = vmatpush.bf16.msrb.mxu2 %v4520_v62  ;;  %2068 = vmatpush.bf16.msrb.mxu1 %v4280_v0  ;;  %v4591_v62 = vld [vmem:[%s9039_s1 + $0x4e8] sm:$0xf]  ;;  %v4903_v0 = vld [vmem:[%s9039_s1 + $0x758] sm:$0xf] }
  0xa8   :  { %2094 = vmatpush.bf16.msrb.mxu3 %v4712_v4  ;;  %v5921_v4 = vld [vmem:[%s9039_s1 + $0x8ec] sm:$0xf0]  ;;  %v4592_v7 = vor.u32 %v5795_v63, %v4591_v62  ;;  %v4904_v8 = vor.u32 %v5873_v1, %v4903_v0  ;;  %v5666_v62 = vld [vmem:[%s9039_s1 + $0xfc] sm:$0xf]  ;;  %v4089_v63 = vld [vmem:[%s9039_s1 + $0x110] sm:$0xf0] }
  0xa9   :  { %2046 = vmatmul.bf16.vlgmr.msra.gmra.mxu3 %v6848_v44  ;;  %v5714_v0 = vld [vmem:[%s9039_s1 + $0x27c] sm:$0xf]  ;;  %v4281_v1 = vld [vmem:[%s9039_s1 + $0x290] sm:$0xf0] }
  0xaa   :  { %2055 = vmatpush.bf16.msrb.mxu0 %v4064_v11  ;;  %v4567_v11 = vld [vmem:[%s9039_s1 + $0x4b8] sm:$0xf] }
  0xab   :  { %2081 = vmatpush.bf16.msrb.mxu2 %v4496_v10  ;;  %2069 = vmatpush.bf16.msrb.mxu1 %v4256_v12  ;;  %v5741_v10 = vld [vmem:[%s9039_s1 + $0x34c] sm:$0xf0]  ;;  %v5096_v12 = vor.u32 %v5921_v4, %v5095_v3  ;;  %v4568_v22 = vor.u32 %v5789_v14, %v4567_v11  ;;  %v4092_v4 = vor.u32 %v5666_v62, %v4089_v63  ;;  %v4065_v11 = vld [vmem:[%s9039_s1 + $0xe0] sm:$0xf0]  ;;  %v5636_v63 = vld [vmem:[%s9039_s1 + $0xc] sm:$0xf] }
  0xac   :  { %2095 = vmatpush.bf16.msrb.mxu3 %v4688_v17  ;;  %v5071_v17 = vld [vmem:[%s9039_s1 + $0x8a8] sm:$0xf]  ;;  %v4376_v19 = vor.u32 %v5741_v10, %v4375_v9  ;;  %v5891_v9 = vld [vmem:[%s9039_s1 + $0x7fc] sm:$0xf0]  ;;  %v5660_v10 = vld [vmem:[%s9039_s1 + $0xcc] sm:$0xf] }
  0xad   :  { %v5072_v28 = vor.u32 %v5915_v18, %v5071_v17  ;;  %v4257_v14 = vld [vmem:[%s9039_s1 + $0x260] sm:$0xf0]  ;;  %v4068_v17 = vor.u32 %v5660_v10, %v4065_v11  ;;  %v4759_v18 = vld [vmem:[%s9039_s1 + $0x638] sm:$0xf]  ;;  %v5870_v10 = vld [vmem:[%s9039_s1 + $0x75c] sm:$0xf] }
  0xae   :  { %2056 = vmatpush.bf16.msrb.mxu0 %v4040_v26  ;;  %v4543_v26 = vld [vmem:[%s9039_s1 + $0x488] sm:$0xf]  ;;  %v4905_v11 = vld [vmem:[%s9039_s1 + $0x770] sm:$0xf0] }
  0xaf   :  { %2082 = vmatpush.bf16.msrb.mxu2 %v4472_v25  ;;  %2070 = vmatpush.bf16.msrb.mxu1 %v4232_v27  ;;  %v5735_v25 = vld [vmem:[%s9039_s1 + $0x31c] sm:$0xf0] }
  0xb0   :  { %2096 = vmatpush.bf16.msrb.mxu3 %v4664_v31  ;;  %v5783_v27 = vld [vmem:[%s9039_s1 + $0x49c] sm:$0xf0]  ;;  %v5047_v31 = vld [vmem:[%s9039_s1 + $0x878] sm:$0xf]  ;;  %v4352_v34 = vor.u32 %v5735_v25, %v4351_v21  ;;  %v5654_v25 = vld [vmem:[%s9039_s1 + $0x9c] sm:$0xf] }
  0xb1   :  { %v5048_v39 = vor.u32 %v5909_v24, %v5047_v31  ;;  %v4951_v21 = vld [vmem:[%s9039_s1 + $0x7b8] sm:$0xf] }
  0xb2   :  { %2057 = vmatpush.bf16.msrb.mxu0 %v4016_v37  ;;  %v4544_v37 = vor.u32 %v5783_v27, %v4543_v26  ;;  %v4041_v26 = vld [vmem:[%s9039_s1 + $0xb0] sm:$0xf0]  ;;  %v5702_v27 = vld [vmem:[%s9039_s1 + $0x21c] sm:$0xf] }
  0xb3   :  { %2083 = vmatpush.bf16.msrb.mxu2 %v4448_v36  ;;  %2071 = vmatpush.bf16.msrb.mxu1 %v4208_v38  ;;  %v4329_v36 = vld [vmem:[%s9039_s1 + $0x2f0] sm:$0xf0]  ;;  %v4856_v38 = vor.u32 %v5861_v30, %v4855_v29  ;;  %v4735_v30 = vld [vmem:[%s9039_s1 + $0x608] sm:$0xf]  ;;  %v4044_v24 = vor.u32 %v5654_v25, %v4041_v26  ;;  %v4641_v26 = vld [vmem:[%s9039_s1 + $0x560] sm:$0xf0] }
  0xb4   :  { %2097 = vmatpush.bf16.msrb.mxu3 %v4640_v42  ;;  %v5855_v42 = vld [vmem:[%s9039_s1 + $0x6dc] sm:$0xf0]  ;;  %v4332_v45 = vor.u32 %v5726_v35, %v4329_v36  ;;  %v5648_v36 = vld [vmem:[%s9039_s1 + $0x6c] sm:$0xf] }
  0xb6   :  { %2058 = vmatpush.bf16.msrb.mxu0 %v3992_v54  ;;  %v4832_v54 = vor.u32 %v5855_v42, %v4831_v41  ;;  %v4521_v41 = vld [vmem:[%s9039_s1 + $0x470] sm:$0xf0]  ;;  %v4736_v42 = vor.u32 %v5831_v32, %v4735_v30  ;;  %v5073_v30 = vld [vmem:[%s9039_s1 + $0x8c0] sm:$0xf0] }
  0xb7   :  { %2084 = vmatpush.bf16.msrb.mxu2 %v4424_v52  ;;  %2072 = vmatpush.bf16.msrb.mxu1 %v4184_v55  ;;  %v5720_v52 = vld [vmem:[%s9039_s1 + $0x2ac] sm:$0xf]  ;;  %v5024_v55 = vor.u32 %v5903_v48, %v5023_v43  ;;  %v5822_v43 = vld [vmem:[%s9039_s1 + $0x5dc] sm:$0xf] }
  0xb8   :  { %2098 = vmatpush.bf16.msrb.mxu3 %v4616_v59  ;;  %v4999_v59 = vld [vmem:[%s9039_s1 + $0x818] sm:$0xf]  ;;  %v4308_v60 = vor.u32 %v5720_v52, %v4305_v53  ;;  %v5642_v53 = vld [vmem:[%s9039_s1 + $0x3c] sm:$0xf] }
  0xb9   :  { %v5000_v3 = vor.u32 %v5897_v61, %v4999_v59  ;;  %v4497_v59 = vld [vmem:[%s9039_s1 + $0x440] sm:$0xf0] }
  0xba   :  { %2059 = vmatpush.bf16.msrb.mxu0 %v3968_v5  ;;  %v4783_v5 = vld [vmem:[%s9039_s1 + $0x668] sm:$0xf]  ;;  %v4689_v61 = vld [vmem:[%s9039_s1 + $0x5c0] sm:$0xf0] }
  0xbb   :  { %2085 = vmatpush.bf16.msrb.mxu2 %v4400_v2  ;;  %2073 = vmatpush.bf16.msrb.mxu1 %v4160_v6  ;;  %v4808_v2 = vor.u32 %v5849_v58, %v4807_v57  ;;  %v5843_v6 = vld [vmem:[%s9039_s1 + $0x67c] sm:$0xf0]  ;;  %v4185_v57 = vld [vmem:[%s9039_s1 + $0x1d0] sm:$0xf0]  ;;  %v5768_v58 = vld [vmem:[%s9039_s1 + $0x42c] sm:$0xf] }
  0xbc   :  { %2099 = vmatpush.bf16.msrb.mxu3 %v4592_v7  ;;  %v4975_v7 = vld [vmem:[%s9039_s1 + $0x7e8] sm:$0xf]  ;;  %v4784_v15 = vor.u32 %v5843_v6, %v4783_v5  ;;  %v5762_v6 = vld [vmem:[%s9039_s1 + $0x3fc] sm:$0xf] }
  0xbd   :  { %2060 = vmatmul.bf16.vlgmr.msrb.gmra.mxu0 %v6743_v46  ;;  %v4976_v16 = vor.u32 %v5891_v9, %v4975_v7  ;;  %v4473_v7 = vld [vmem:[%s9039_s1 + $0x410] sm:$0xf0] }
  0xbe   :  { %2108 = vmatpush.bf16.msra.mxu0 %v4904_v8  ;;  %2074 = vmatmul.bf16.vlgmr.msrb.gmra.mxu1 %v6745_v47  ;;  %v4284_v8 = vor.u32 %v5714_v0, %v4281_v1  ;;  %v4500_v1 = vor.u32 %v5768_v58, %v4497_v59  ;;  %v4665_v9 = vld [vmem:[%s9039_s1 + $0x590] sm:$0xf0] }
  0xbf   :  { %2122 = vmatpush.bf16.msra.mxu1 %v5096_v12  ;;  %2086 = vmatpush.bf16.msrb.mxu2 %v4376_v19  ;;  %v5708_v12 = vld [vmem:[%s9039_s1 + $0x24c] sm:$0xf]  ;;  %v5837_v19 = vld [vmem:[%s9039_s1 + $0x64c] sm:$0xf0] }
  0xc0   :  { %2100 = vmatpush.bf16.msrb.mxu3 %v4568_v22  ;;  %v4260_v22 = vor.u32 %v5708_v12, %v4257_v14  ;;  %v4760_v29 = vor.u32 %v5837_v19, %v4759_v18  ;;  %v5918_v14 = vld [vmem:[%s9039_s1 + $0x8dc] sm:$0xf]  ;;  %v4908_v19 = vor.u32 %v5870_v10, %v4905_v11  ;;  %v4353_v10 = vld [vmem:[%s9039_s1 + $0x320] sm:$0xf0]  ;;  %v5780_v11 = vld [vmem:[%s9039_s1 + $0x48c] sm:$0xf] }
  0xc2   :  { %2109 = vmatpush.bf16.msra.mxu0 %v4880_v23  ;;  %v5885_v23 = vld [vmem:[%s9039_s1 + $0x7cc] sm:$0xf0] }
  0xc3   :  { %2123 = vmatpush.bf16.msra.mxu1 %v5072_v28  ;;  %2087 = vmatpush.bf16.msrb.mxu2 %v4352_v34  ;;  %v4233_v28 = vld [vmem:[%s9039_s1 + $0x230] sm:$0xf0]  ;;  %v4952_v31 = vor.u32 %v5885_v23, %v4951_v21  ;;  %v5879_v34 = vld [vmem:[%s9039_s1 + $0x79c] sm:$0xf0]  ;;  %v5756_v21 = vld [vmem:[%s9039_s1 + $0x3cc] sm:$0xf] }
  0xc4   :  { %2101 = vmatpush.bf16.msrb.mxu3 %v4544_v37  ;;  %v4236_v35 = vor.u32 %v5702_v27, %v4233_v28  ;;  %v4017_v37 = vld [vmem:[%s9039_s1 + $0x80] sm:$0xf0]  ;;  %v4928_v48 = vor.u32 %v5879_v34, %v4927_v33  ;;  %v5804_v23 = vld [vmem:[%s9039_s1 + $0x54c] sm:$0xf]  ;;  %v5750_v33 = vld [vmem:[%s9039_s1 + $0x39c] sm:$0xf] }
  0xc5   :  { %v4020_v49 = vor.u32 %v5648_v36, %v4017_v37  ;;  %v5864_v27 = vld [vmem:[%s9039_s1 + $0x72c] sm:$0xf]  ;;  %v4881_v28 = vld [vmem:[%s9039_s1 + $0x740] sm:$0xf0]  ;;  %v4425_v34 = vld [vmem:[%s9039_s1 + $0x3b0] sm:$0xf0] }
  0xc6   :  { %2110 = vmatpush.bf16.msra.mxu0 %v4856_v38  ;;  %2088 = vmatmul.bf16.vlgmr.msrb.gmra.mxu2 %v6789_v13  ;;  %v5696_v38 = vld [vmem:[%s9039_s1 + $0x1ec] sm:$0xf]  ;;  %v4884_v32 = vor.u32 %v5864_v27, %v4881_v28  ;;  %v4617_v37 = vld [vmem:[%s9039_s1 + $0x530] sm:$0xf0] }
  0xc7   :  { %2124 = vmatpush.bf16.msra.mxu1 %v5048_v39  ;;  %2136 = vmatpush.bf16.msra.mxu2 %v4140_v40  ;;  %v4209_v39 = vld [vmem:[%s9039_s1 + $0x200] sm:$0xf0]  ;;  %v5774_v40 = vld [vmem:[%s9039_s1 + $0x45c] sm:$0xf] }
  0xc8   :  { %2150 = vmatpush.bf16.msra.mxu3 %v4332_v45  ;;  %v4713_v45 = vld [vmem:[%s9039_s1 + $0x5f0] sm:$0xf0]  ;;  %v4212_v50 = vor.u32 %v5696_v38, %v4209_v39  ;;  %v4524_v52 = vor.u32 %v5774_v40, %v4521_v41  ;;  %v5858_v38 = vld [vmem:[%s9039_s1 + $0x6fc] sm:$0xf] }
  0xc9   :  { %2102 = vmatmul.bf16.vlgmr.msrb.gmra.mxu3 %v6802_v20  ;;  %v4857_v39 = vld [vmem:[%s9039_s1 + $0x710] sm:$0xf0]  ;;  %v5906_v40 = vld [vmem:[%s9039_s1 + $0x87c] sm:$0xf] }
  0xca   :  { %2111 = vmatpush.bf16.msra.mxu0 %v4832_v54  ;;  %v3993_v54 = vld [vmem:[%s9039_s1 + $0x50] sm:$0xf0] }
  0xcb   :  { %2125 = vmatpush.bf16.msra.mxu1 %v5024_v55  ;;  %2137 = vmatpush.bf16.msra.mxu2 %v4116_v56  ;;  %v5690_v55 = vld [vmem:[%s9039_s1 + $0x1bc] sm:$0xf]  ;;  %v4716_v56 = vor.u32 %v5822_v43, %v4713_v45  ;;  %v3996_v62 = vor.u32 %v5642_v53, %v3993_v54  ;;  %v5049_v41 = vld [vmem:[%s9039_s1 + $0x890] sm:$0xf0]  ;;  %v4860_v45 = vor.u32 %v5858_v38, %v4857_v39  ;;  %v4593_v53 = vld [vmem:[%s9039_s1 + $0x500] sm:$0xf0] }
  0xcc   :  { %2151 = vmatpush.bf16.msra.mxu3 %v4308_v60  ;;  %v5816_v60 = vld [vmem:[%s9039_s1 + $0x5ac] sm:$0xf]  ;;  %v4188_v0 = vor.u32 %v5690_v55, %v4185_v57  ;;  %v4833_v55 = vld [vmem:[%s9039_s1 + $0x6e0] sm:$0xf0] }
  0xcd   :  { %v4692_v5 = vor.u32 %v5816_v60, %v4689_v61  ;;  %v5852_v54 = vld [vmem:[%s9039_s1 + $0x6cc] sm:$0xf]  ;;  %v5025_v57 = vld [vmem:[%s9039_s1 + $0x860] sm:$0xf0]  ;;  %v5738_v61 = vld [vmem:[%s9039_s1 + $0x33c] sm:$0xf] }
  0xce   :  { %2112 = vmatpush.bf16.msra.mxu0 %v4808_v2  ;;  %v3969_v2 = vld [vmem:[%s9039_s1 + $0x20] sm:$0xf0]  ;;  %v4836_v60 = vor.u32 %v5852_v54, %v4833_v55  ;;  %v5828_v39 = vld [vmem:[%s9039_s1 + $0x60c] sm:$0xf]  ;;  %v5718_v54 = vld [vmem:[%s9039_s1 + $0x294] sm:$0xf0] }
  0xcf   :  { %2126 = vmatpush.bf16.msra.mxu1 %v5000_v3  ;;  %2138 = vmatpush.bf16.msra.mxu2 %v4092_v4  ;;  %v5684_v3 = vld [vmem:[%s9039_s1 + $0x18c] sm:$0xf]  ;;  %v4161_v4 = vld [vmem:[%s9039_s1 + $0x1a0] sm:$0xf0]  ;;  %v3972_v12 = vor.u32 %v5636_v63, %v3969_v2  ;;  %v5786_v63 = vld [vmem:[%s9039_s1 + $0x4bc] sm:$0xf] }
  0xd0   :  { %2152 = vmatpush.bf16.msra.mxu3 %v4284_v8  ;;  %v5810_v8 = vld [vmem:[%s9039_s1 + $0x57c] sm:$0xf]  ;;  %v4527_v55 = vld [vmem:[%s9039_s1 + $0x460] sm:$0xf] }
  0xd1   :  { %v4668_v18 = vor.u32 %v5810_v8, %v4665_v9  ;;  %v5846_v2 = vld [vmem:[%s9039_s1 + $0x69c] sm:$0xf] }
  0xd2   :  { %2113 = vmatpush.bf16.msra.mxu0 %v4784_v15  ;;  %v5097_v15 = vld [vmem:[%s9039_s1 + $0x8f0] sm:$0xf0] }
  0xd3   :  { %2127 = vmatpush.bf16.msra.mxu1 %v4976_v16  ;;  %2139 = vmatpush.bf16.msra.mxu2 %v4068_v17  ;;  %v4164_v16 = vor.u32 %v5684_v3, %v4161_v4  ;;  %v4476_v17 = vor.u32 %v5762_v6, %v4473_v7  ;;  %v5100_v25 = vor.u32 %v5918_v14, %v5097_v15  ;;  %v4809_v3 = vld [vmem:[%s9039_s1 + $0x6b0] sm:$0xf0]  ;;  %v5894_v4 = vld [vmem:[%s9039_s1 + $0x81c] sm:$0xf]  ;;  %v5732_v7 = vld [vmem:[%s9039_s1 + $0x30c] sm:$0xf] }
  0xd4   :  { %2153 = vmatpush.bf16.msra.mxu3 %v4260_v22  ;;  %v4449_v22 = vld [vmem:[%s9039_s1 + $0x3e0] sm:$0xf0]  ;;  %v4812_v9 = vor.u32 %v5846_v2, %v4809_v3  ;;  %v5840_v15 = vld [vmem:[%s9039_s1 + $0x66c] sm:$0xf]  ;;  %v4071_v3 = vld [vmem:[%s9039_s1 + $0xd0] sm:$0xf] }
  0xd6   :  { %2114 = vmatpush.bf16.msra.mxu0 %v4760_v29  ;;  %v5912_v29 = vld [vmem:[%s9039_s1 + $0x8ac] sm:$0xf] }
  0xd7   :  { %2128 = vmatpush.bf16.msra.mxu1 %v4952_v31  ;;  %2140 = vmatpush.bf16.msra.mxu2 %v4044_v24  ;;  %v4452_v31 = vor.u32 %v5756_v21, %v4449_v22  ;;  %v4644_v24 = vor.u32 %v5804_v23, %v4641_v26  ;;  %v5076_v36 = vor.u32 %v5912_v29, %v5073_v30  ;;  %v5682_v21 = vld [vmem:[%s9039_s1 + $0x174] sm:$0xf0]  ;;  %v4335_v23 = vld [vmem:[%s9039_s1 + $0x2e0] sm:$0xf]  ;;  %v5834_v30 = vld [vmem:[%s9039_s1 + $0x63c] sm:$0xf] }
  0xd8   :  { %2154 = vmatpush.bf16.msra.mxu3 %v4236_v35  ;;  %v5798_v35 = vld [vmem:[%s9039_s1 + $0x51c] sm:$0xf]  ;;  %v4356_v22 = vor.u32 %v5732_v7, %v4353_v10  ;;  %v5772_v10 = vld [vmem:[%s9039_s1 + $0x444] sm:$0xf0] }
  0xd9   :  { %v4620_v43 = vor.u32 %v5798_v35, %v4617_v37  ;;  %v5676_v35 = vld [vmem:[%s9039_s1 + $0x144] sm:$0xf0] }
  0xda   :  { %2115 = vmatpush.bf16.msra.mxu0 %v4736_v42  ;;  %v4428_v42 = vor.u32 %v5750_v33, %v4425_v34  ;;  %v4953_v33 = vld [vmem:[%s9039_s1 + $0x7d0] sm:$0xf0]  ;;  %v4119_v34 = vld [vmem:[%s9039_s1 + $0x130] sm:$0xf]  ;;  %v5724_v37 = vld [vmem:[%s9039_s1 + $0x2c4] sm:$0xf0] }
  0xdb   :  { %2129 = vmatpush.bf16.msra.mxu1 %v4928_v48  ;;  %2141 = vmatpush.bf16.msra.mxu2 %v4020_v49  ;;  %v5744_v48 = vld [vmem:[%s9039_s1 + $0x36c] sm:$0xf]  ;;  %v4401_v49 = vld [vmem:[%s9039_s1 + $0x380] sm:$0xf0] }
  0xdc   :  { %2155 = vmatpush.bf16.msra.mxu3 %v4212_v50  ;;  %v5792_v50 = vld [vmem:[%s9039_s1 + $0x4ec] sm:$0xf]  ;;  %v4404_v58 = vor.u32 %v5744_v48, %v4401_v49  ;;  %v4929_v48 = vld [vmem:[%s9039_s1 + $0x7a0] sm:$0xf0]  ;;  %v4095_v49 = vld [vmem:[%s9039_s1 + $0x100] sm:$0xf] }
  0xdd   :  { %2116 = vmatmul.bf16.vlgmr.msra.gmra.mxu0 %v6856_v51  ;;  %v4596_v59 = vor.u32 %v5792_v50, %v4593_v53  ;;  %v4287_v53 = vld [vmem:[%s9039_s1 + $0x280] sm:$0xf] }
  0xde   :  { %2164 = vmatpush.bf16.msrb.mxu0 %v4524_v52  ;;  %2130 = vmatmul.bf16.vlgmr.msra.gmra.mxu1 %v6848_v44  ;;  %v5052_v52 = vor.u32 %v5906_v40, %v5049_v41  ;;  %v4737_v40 = vld [vmem:[%s9039_s1 + $0x620] sm:$0xf0] }
  0xdf   :  { %2178 = vmatpush.bf16.msrb.mxu1 %v4716_v56  ;;  %2142 = vmatpush.bf16.msra.mxu2 %v3996_v62  ;;  %v5900_v56 = vld [vmem:[%s9039_s1 + $0x84c] sm:$0xf]  ;;  %v4377_v62 = vld [vmem:[%s9039_s1 + $0x350] sm:$0xf0]  ;;  %v7561_v41 = vld [vmem:[%s9040_s2] sm:$0x3f] }
  0xe0   :  { %2156 = vmatpush.bf16.msra.mxu3 %v4188_v0  ;;  %v5028_v0 = vor.u32 %v5900_v56, %v5025_v57  ;;  %v4380_v6 = vor.u32 %v5738_v61, %v4377_v62  ;;  %v5778_v56 = vld [vmem:[%s9039_s1 + $0x474] sm:$0xf0]  ;;  %v432_v57 = vperm.slane %v7561_v41, 0 }
  0xe2   :  { %2165 = vmatpush.bf16.msrb.mxu0 %v4500_v1  ;;  %v4569_v1 = vld [vmem:[%s9039_s1 + $0x4d0] sm:$0xf0] }
  0xe3   :  { %2179 = vmatpush.bf16.msrb.mxu1 %v4692_v5  ;;  %2143 = vmatpush.bf16.msra.mxu2 %v3972_v12  ;;  %v5001_v5 = vld [vmem:[%s9039_s1 + $0x830] sm:$0xf0]  ;;  %v4572_v8 = vor.u32 %v5786_v63, %v4569_v1  ;;  %v4545_v12 = vld [vmem:[%s9039_s1 + $0x4a0] sm:$0xf0]  ;;  %v4288_v63 = vor.u32 %v5718_v54, %v4287_v53 }
  0xe4   :  { %2157 = vmatpush.bf16.msra.mxu3 %v4164_v16  ;;  %v5004_v14 = vor.u32 %v5894_v4, %v5001_v5  ;;  %v4785_v16 = vld [vmem:[%s9039_s1 + $0x680] sm:$0xf0]  ;;  %v4548_v26 = vor.u32 %v5780_v11, %v4545_v12  ;;  %v5664_v4 = vld [vmem:[%s9039_s1 + $0xe4] sm:$0xf0]  ;;  %v4263_v5 = vld [vmem:[%s9039_s1 + $0x250] sm:$0xf] }
  0xe5   :  { %v4788_v27 = vor.u32 %v5840_v15, %v4785_v16  ;;  %v4695_v11 = vld [vmem:[%s9039_s1 + $0x5b0] sm:$0xf]  ;;  %v5820_v12 = vld [vmem:[%s9039_s1 + $0x5c4] sm:$0xf0]  ;;  %v4072_v15 = vor.u32 %v5664_v4, %v4071_v3 }
  0xe6   :  { %2166 = vmatpush.bf16.msrb.mxu0 %v4476_v17  ;;  %2144 = vmatmul.bf16.vlgmr.msra.gmra.mxu2 %v6743_v46  ;;  %v5888_v17 = vld [vmem:[%s9039_s1 + $0x7ec] sm:$0xf]  ;;  %v5640_v4 = vld [vmem:[%s9039_s1 + $0x24] sm:$0xf0] }
  0xe7   :  { %2180 = vmatpush.bf16.msrb.mxu1 %v4668_v18  ;;  %2192 = vmatpush.bf16.msrb.mxu2 %v4908_v19  ;;  %v4977_v18 = vld [vmem:[%s9039_s1 + $0x800] sm:$0xf0]  ;;  %v4143_v19 = vld [vmem:[%s9039_s1 + $0x160] sm:$0xf] }
  0xe8   :  { %2206 = vmatpush.bf16.msrb.mxu3 %v5100_v25  ;;  %v5730_v25 = vld [vmem:[%s9039_s1 + $0x2f4] sm:$0xf0]  ;;  %v4980_v28 = vor.u32 %v5888_v17, %v4977_v18  ;;  %v4144_v29 = vor.u32 %v5682_v21, %v4143_v19  ;;  %v4047_v18 = vld [vmem:[%s9039_s1 + $0xa0] sm:$0xf] }
  0xe9   :  { %2158 = vmatmul.bf16.vlgmr.msra.gmra.mxu3 %v6745_v47  ;;  %v5658_v19 = vld [vmem:[%s9039_s1 + $0xb4] sm:$0xf0]  ;;  %v4239_v21 = vld [vmem:[%s9039_s1 + $0x220] sm:$0xf] }
  0xea   :  { %2167 = vmatpush.bf16.msrb.mxu0 %v4452_v31  ;;  %v4761_v31 = vld [vmem:[%s9039_s1 + $0x650] sm:$0xf0] }
  0xeb   :  { %2181 = vmatpush.bf16.msrb.mxu1 %v4644_v24  ;;  %2193 = vmatpush.bf16.msrb.mxu2 %v4884_v32  ;;  %v5882_v24 = vld [vmem:[%s9039_s1 + $0x7bc] sm:$0xf]  ;;  %v4336_v32 = vor.u32 %v5730_v25, %v4335_v23  ;;  %v4764_v38 = vor.u32 %v5834_v30, %v4761_v31  ;;  %v5706_v23 = vld [vmem:[%s9039_s1 + $0x234] sm:$0xf0]  ;;  %v4479_v25 = vld [vmem:[%s9039_s1 + $0x400] sm:$0xf] }
  0xec   :  { %2207 = vmatpush.bf16.msrb.mxu3 %v5076_v36  ;;  %v4311_v36 = vld [vmem:[%s9039_s1 + $0x2b0] sm:$0xf]  ;;  %v4240_v30 = vor.u32 %v5706_v23, %v4239_v21  ;;  %v5922_v21 = vld [vmem:[%s9039_s1 + $0x8f4] sm:$0xf0] }
  0xed   :  { %v4312_v50 = vor.u32 %v5724_v37, %v4311_v36  ;;  %v5700_v37 = vld [vmem:[%s9039_s1 + $0x204] sm:$0xf0] }
  0xee   :  { %2168 = vmatpush.bf16.msrb.mxu0 %v4428_v42  ;;  %v4956_v42 = vor.u32 %v5882_v24, %v4953_v33  ;;  %v5652_v33 = vld [vmem:[%s9039_s1 + $0x84] sm:$0xf0] }
  0xef   :  { %2182 = vmatpush.bf16.msrb.mxu1 %v4620_v43  ;;  %2194 = vmatpush.bf16.msrb.mxu2 %v4860_v45  ;;  %v4120_v43 = vor.u32 %v5676_v35, %v4119_v34  ;;  %v5876_v45 = vld [vmem:[%s9039_s1 + $0x78c] sm:$0xf]  ;;  %v4215_v34 = vld [vmem:[%s9039_s1 + $0x1f0] sm:$0xf] }
  0xf0   :  { %2208 = vmatpush.bf16.msrb.mxu3 %v5052_v52  ;;  %v5670_v52 = vld [vmem:[%s9039_s1 + $0x114] sm:$0xf0]  ;;  %v4932_v61 = vor.u32 %v5876_v45, %v4929_v48  ;;  %v4216_v45 = vor.u32 %v5700_v37, %v4215_v34  ;;  %v5868_v37 = vld [vmem:[%s9039_s1 + $0x744] sm:$0xf0] }
  0xf1   :  { %v4096_v62 = vor.u32 %v5670_v52, %v4095_v49  ;;  %v3999_v49 = vld [vmem:[%s9039_s1 + $0x40] sm:$0xf]  ;;  %v5790_v34 = vld [vmem:[%s9039_s1 + $0x4d4] sm:$0xf0] }
  0xf2   :  { %2169 = vmatpush.bf16.msrb.mxu0 %v4404_v58  ;;  %v4740_v58 = vor.u32 %v5828_v39, %v4737_v40  ;;  %v5760_v39 = vld [vmem:[%s9039_s1 + $0x3e4] sm:$0xf0]  ;;  %v4647_v40 = vld [vmem:[%s9039_s1 + $0x550] sm:$0xf]  ;;  %v4191_v52 = vld [vmem:[%s9039_s1 + $0x1c0] sm:$0xf] }
  0xf3   :  { %2183 = vmatpush.bf16.msrb.mxu1 %v4596_v59  ;;  %2195 = vmatpush.bf16.msrb.mxu2 %v4836_v60  ;;  %v4719_v59 = vld [vmem:[%s9039_s1 + $0x5e0] sm:$0xf]  ;;  %v5826_v60 = vld [vmem:[%s9039_s1 + $0x5f4] sm:$0xf0] }
  0xf4   :  { %2209 = vmatpush.bf16.msrb.mxu3 %v5028_v0  ;;  %v4528_v0 = vor.u32 %v5778_v56, %v4527_v55  ;;  %v5694_v55 = vld [vmem:[%s9039_s1 + $0x1d4] sm:$0xf0]  ;;  %v4431_v56 = vld [vmem:[%s9039_s1 + $0x3a0] sm:$0xf] }
  0xf6   :  { %2170 = vmatpush.bf16.msrb.mxu0 %v4380_v6  ;;  %v4720_v6 = vor.u32 %v5826_v60, %v4719_v59 }
  0xf7   :  { %2184 = vmatpush.bf16.msrb.mxu1 %v4572_v8  ;;  %2196 = vmatpush.bf16.msrb.mxu2 %v4812_v9  ;;  %v5712_v8 = vld [vmem:[%s9039_s1 + $0x264] sm:$0xf0]  ;;  %v4503_v9 = vld [vmem:[%s9039_s1 + $0x430] sm:$0xf] }
  0xf8   :  { %2210 = vmatpush.bf16.msrb.mxu3 %v5004_v14  ;;  %v4264_v16 = vor.u32 %v5712_v8, %v4263_v5  ;;  %v4504_v17 = vor.u32 %v5772_v10, %v4503_v9  ;;  %v4167_v5 = vld [vmem:[%s9039_s1 + $0x190] sm:$0xf]  ;;  %v5748_v10 = vld [vmem:[%s9039_s1 + $0x384] sm:$0xf0] }
  0xf9   :  { %v4407_v9 = vld [vmem:[%s9039_s1 + $0x370] sm:$0xf] }
  0xfa   :  { %2171 = vmatpush.bf16.msrb.mxu0 %v4356_v22  ;;  %v1893_v1 = vpop.f32.mrf.mxu0  ;;  %v1907_v2 = vpop.f32.mrf.mxu1  ;;  %v4696_v22 = vor.u32 %v5820_v12, %v4695_v11  ;;  %v4599_v11 = vld [vmem:[%s9039_s1 + $0x4f0] sm:$0xf] }
  0xfb   :  { %2185 = vmatpush.bf16.msrb.mxu1 %v4548_v26  ;;  %2197 = vmatpush.bf16.msrb.mxu2 %v4788_v27  ;;  %v1894_v7 = vadd.f32 %v1893_v1, %v432_v57  ;;  %v5766_v26 = vld [vmem:[%s9039_s1 + $0x414] sm:$0xf0]  ;;  %v4671_v27 = vld [vmem:[%s9039_s1 + $0x580] sm:$0xf] }
  0xfc   :  { %2211 = vmatpush.bf16.msrb.mxu3 %v4980_v28  ;;  %v5814_v28 = vld [vmem:[%s9039_s1 + $0x594] sm:$0xf0]  ;;  %v4480_v31 = vor.u32 %v5766_v26, %v4479_v25  ;;  %v4408_v25 = vor.u32 %v5748_v10, %v4407_v9  ;;  %v5904_v10 = vld [vmem:[%s9039_s1 + $0x864] sm:$0xf0] }
  0xfd   :  { %2172 = vmatmul.bf16.vlgmr.msrb.gmra.mxu0 %v6789_v13  ;;  %v1908_v14 = vadd.f32 %v1907_v2, %v1894_v7  ;;  %v4672_v35 = vor.u32 %v5814_v28, %v4671_v27  ;;  %v4192_v2 = vor.u32 %v5694_v55, %v4191_v52  ;;  %v5055_v55 = vld [vmem:[%s9039_s1 + $0x880] sm:$0xf] }
  0xfe   :  { %2220 = vmatpush.bf16.msra.mxu0 %v4144_v29  ;;  %2186 = vmatmul.bf16.vlgmr.msrb.gmra.mxu1 %v6802_v20  ;;  %v4048_v29 = vor.u32 %v5658_v19, %v4047_v18  ;;  %v5103_v19 = vld [vmem:[%s9039_s1 + $0x8e0] sm:$0xf] }
  0xff   :  { %2234 = vmatpush.bf16.msra.mxu1 %v4336_v32  ;;  %2198 = vmatpush.bf16.msrb.mxu2 %v4764_v38  ;;  %v4023_v32 = vld [vmem:[%s9039_s1 + $0x70] sm:$0xf] }
 0x100   :  { %2212 = vmatpush.bf16.msrb.mxu3 %v4956_v42  ;;  %v4455_v38 = vld [vmem:[%s9039_s1 + $0x3d0] sm:$0xf]  ;;  %v5808_v42 = vld [vmem:[%s9039_s1 + $0x564] sm:$0xf0] }
 0x101   :  { %v4456_v48 = vor.u32 %v5760_v39, %v4455_v38  ;;  %v4648_v53 = vor.u32 %v5808_v42, %v4647_v40  ;;  %v5079_v38 = vld [vmem:[%s9039_s1 + $0x8b0] sm:$0xf]  ;;  %v5916_v39 = vld [vmem:[%s9039_s1 + $0x8c4] sm:$0xf0] }
 0x102   :  { %2221 = vmatpush.bf16.msra.mxu0 %v4120_v43  ;;  %v7648_v24 = vpop.f32.mrf.mxu0  ;;  %v7659_v36 = vpop.f32.mrf.mxu1  ;;  %v4024_v43 = vor.u32 %v5652_v33, %v4023_v32  ;;  %v5104_v32 = vor.u32 %v5922_v21, %v5103_v19  ;;  %v4359_v42 = vld [vmem:[%s9039_s1 + $0x310] sm:$0xf]  ;;  %v5080_v52 = vor.u32 %v5916_v39, %v5079_v38 }
 0x103   :  { %2235 = vmatpush.bf16.msra.mxu1 %v4312_v50  ;;  %2199 = vmatpush.bf16.msrb.mxu2 %v4740_v58  ;;  %v5646_v50 = vld [vmem:[%s9039_s1 + $0x54] sm:$0xf0] }
 0x104   :  { %2213 = vmatpush.bf16.msrb.mxu3 %v4932_v61  ;;  %v5754_v58 = vld [vmem:[%s9039_s1 + $0x3b4] sm:$0xf0]  ;;  %v4623_v61 = vld [vmem:[%s9039_s1 + $0x520] sm:$0xf] }
 0x105   :  { %v4432_v3 = vor.u32 %v5754_v58, %v4431_v56  ;;  %v5910_v56 = vld [vmem:[%s9039_s1 + $0x894] sm:$0xf0]  ;;  %v5679_v58 = vld [vmem:[%s9039_s1 + $0x164] sm:$0xf] }
 0x106   :  { %2222 = vmatpush.bf16.msra.mxu0 %v4096_v62  ;;  %2200 = vmatmul.bf16.vlgmr.msrb.gmra.mxu2 %v6856_v51  ;;  %v5802_v62 = vld [vmem:[%s9039_s1 + $0x534] sm:$0xf0] }
 0x107   :  { %2236 = vmatpush.bf16.msra.mxu1 %v4288_v63  ;;  %2248 = vmatpush.bf16.msra.mxu2 %v4528_v0  ;;  %v4000_v63 = vor.u32 %v5646_v50, %v3999_v49  ;;  %v3975_v0 = vld [vmem:[%s9039_s1 + $0x10] sm:$0xf]  ;;  %v4624_v7 = vor.u32 %v5802_v62, %v4623_v61  ;;  %v5784_v50 = vld [vmem:[%s9039_s1 + $0x4a4] sm:$0xf0]  ;;  %v5727_v62 = vld [vmem:[%s9039_s1 + $0x2e4] sm:$0xf] }
 0x108   :  { %2262 = vmatpush.bf16.msra.mxu3 %v4720_v6  ;;  %v1921_v54 = vpop.f32.mrf.mxu2  ;;  %v1935_v60 = vpop.f32.mrf.mxu3  ;;  %v5688_v6 = vld [vmem:[%s9039_s1 + $0x1a4] sm:$0xf0]  ;;  %v3976_v18 = vor.u32 %v5640_v4, %v3975_v0  ;;  %v4551_v49 = vld [vmem:[%s9039_s1 + $0x490] sm:$0xf] }
 0x109   :  { %2214 = vmatmul.bf16.vlgmr.msrb.gmra.mxu3 %v6848_v44  ;;  %v1922_v59 = vadd.f32 %v1921_v54, %v1908_v14  ;;  %v5796_v14 = vld [vmem:[%s9039_s1 + $0x504] sm:$0xf0]  ;;  %v4168_v23 = vor.u32 %v5688_v6, %v4167_v5  ;;  %v5862_v54 = vld [vmem:[%s9039_s1 + $0x714] sm:$0xf0]  ;;  %v4552_v0 = vor.u32 %v5784_v50, %v4551_v49  ;;  %v4839_v6 = vld [vmem:[%s9039_s1 + $0x6d0] sm:$0xf] }
 0x10a   :  { %2223 = vmatpush.bf16.msra.mxu0 %v4072_v15  ;;  %v1949_v8 = vpop.f32.mrf.mxu0  ;;  %v4911_v15 = vld [vmem:[%s9039_s1 + $0x760] sm:$0xf]  ;;  %v4600_v26 = vor.u32 %v5796_v14, %v4599_v11  ;;  %v5673_v11 = vld [vmem:[%s9039_s1 + $0x134] sm:$0xf]  ;;  %v4983_v49 = vld [vmem:[%s9039_s1 + $0x7f0] sm:$0xf] }
 0x10b   :  { %2237 = vmatpush.bf16.msra.mxu1 %v4264_v16  ;;  %2249 = vmatpush.bf16.msra.mxu2 %v4504_v17  ;;  %v1936_v1 = vadd.f32 %v1935_v60, %v1922_v59  ;;  %v5874_v16 = vld [vmem:[%s9039_s1 + $0x774] sm:$0xf0]  ;;  %v1963_v17 = vpop.f32.mrf.mxu1  ;;  %v4145_v59 = vld [vmem:[%s9039_s1 + $0x178] sm:$0xf0] }
 0x10c   :  { %2263 = vmatpush.bf16.msra.mxu3 %v4696_v22  ;;  %v4912_v27 = vor.u32 %v5874_v16, %v4911_v15  ;;  %v4148_v4 = vor.u32 %v5679_v58, %v4145_v59  ;;  %v5721_v15 = vld [vmem:[%s9039_s1 + $0x2b4] sm:$0xf]  ;;  %v4313_v16 = vld [vmem:[%s9039_s1 + $0x2c8] sm:$0xf0] }
 0x10d   :  { %v1950_v12 = vadd.f32 %v1949_v8, %v1936_v1  ;;  %v5031_v8 = vld [vmem:[%s9039_s1 + $0x850] sm:$0xf] }
 0x10e   :  { %2224 = vmatpush.bf16.msra.mxu0 %v4048_v29  ;;  %v4383_v29 = vld [vmem:[%s9039_s1 + $0x340] sm:$0xf]  ;;  %v5032_v19 = vor.u32 %v5904_v10, %v5031_v8  ;;  %v5703_v8 = vld [vmem:[%s9039_s1 + $0x224] sm:$0xf] }
 0x10f   :  { %2238 = vmatpush.bf16.msra.mxu1 %v4240_v30  ;;  %2250 = vmatpush.bf16.msra.mxu2 %v4480_v31  ;;  %v7736_v22 = vadd.f32 %v1963_v17, %v1950_v12  ;;  %v5742_v30 = vld [vmem:[%s9039_s1 + $0x354] sm:$0xf0]  ;;  %v4575_v31 = vld [vmem:[%s9039_s1 + $0x4c0] sm:$0xf]  ;;  %v4121_v12 = vld [vmem:[%s9039_s1 + $0x148] sm:$0xf0] }
 0x110   :  { %2264 = vmatpush.bf16.msra.mxu3 %v4672_v35  ;;  %v7738_v28 = vpop.f32.mrf.mxu2  ;;  %v7749_v33 = vpop.f32.mrf.mxu3  ;;  %v4887_v35 = vld [vmem:[%s9039_s1 + $0x730] sm:$0xf]  ;;  %v4384_v40 = vor.u32 %v5742_v30, %v4383_v29  ;;  %v433_v17 = vperm.slane %v7561_v41, 1  ;;  %v4124_v21 = vor.u32 %v5673_v11, %v4121_v12  ;;  %v5898_v29 = vld [vmem:[%s9039_s1 + $0x834] sm:$0xf0] }
 0x111   :  { %v5667_v30 = vld [vmem:[%s9039_s1 + $0x104] sm:$0xf]  ;;  %v4743_v12 = vld [vmem:[%s9039_s1 + $0x610] sm:$0xf] }
 0x112   :  { %2225 = vmatpush.bf16.msra.mxu0 %v4024_v43  ;;  %v4576_v43 = vor.u32 %v5790_v34, %v4575_v31  ;;  %v7798_v60 = vpop.f32.mrf.mxu0  ;;  %v4097_v31 = vld [vmem:[%s9039_s1 + $0x118] sm:$0xf0] }
 0x113   :  { %2239 = vmatpush.bf16.msra.mxu1 %v4216_v45  ;;  %2251 = vmatpush.bf16.msra.mxu2 %v4456_v48  ;;  %v4888_v45 = vor.u32 %v5868_v37, %v4887_v35  ;;  %v5736_v48 = vld [vmem:[%s9039_s1 + $0x324] sm:$0xf0]  ;;  %v7824_v14 = vpop.f32.mrf.mxu1  ;;  %v4289_v34 = vld [vmem:[%s9039_s1 + $0x298] sm:$0xf0] }
 0x114   :  { %2265 = vmatpush.bf16.msra.mxu3 %v4648_v53  ;;  %v4863_v53 = vld [vmem:[%s9039_s1 + $0x700] sm:$0xf]  ;;  %v4360_v61 = vor.u32 %v5736_v48, %v4359_v42  ;;  %v4100_v42 = vor.u32 %v5667_v30, %v4097_v31  ;;  %v5844_v48 = vld [vmem:[%s9039_s1 + $0x684] sm:$0xf0]  ;;  %v5697_v30 = vld [vmem:[%s9039_s1 + $0x1f4] sm:$0xf] }
 0x115   :  { %v4864_v1 = vor.u32 %v5862_v54, %v4863_v53  ;;  %v5661_v53 = vld [vmem:[%s9039_s1 + $0xd4] sm:$0xf]  ;;  %v4073_v54 = vld [vmem:[%s9039_s1 + $0xe8] sm:$0xf0] }
 0x116   :  { %2226 = vmatpush.bf16.msra.mxu0 %v4000_v63  ;;  %v4337_v63 = vld [vmem:[%s9039_s1 + $0x2f8] sm:$0xf0] }
 0x117   :  { %2240 = vmatpush.bf16.msra.mxu1 %v4192_v2  ;;  %2252 = vmatpush.bf16.msra.mxu2 %v4432_v3  ;;  %v5056_v3 = vor.u32 %v5910_v56, %v5055_v55  ;;  %v4340_v9 = vor.u32 %v5727_v62, %v4337_v63  ;;  %v5709_v55 = vld [vmem:[%s9039_s1 + $0x254] sm:$0xf]  ;;  %v4265_v56 = vld [vmem:[%s9039_s1 + $0x268] sm:$0xf0] }
 0x118   :  { %2266 = vmatpush.bf16.msra.mxu3 %v4624_v7  ;;  %v1977_v2 = vpop.f32.mrf.mxu2  ;;  %v1991_v5 = vpop.f32.mrf.mxu3  ;;  %v5856_v7 = vld [vmem:[%s9039_s1 + $0x6e4] sm:$0xf0] }
 0x119   :  { %v1978_v38 = vadd.f32 %v1977_v2, %v433_v17  ;;  %v5838_v2 = vld [vmem:[%s9039_s1 + $0x654] sm:$0xf0] }
 0x11a   :  { %2227 = vmatpush.bf16.msra.mxu0 %v3976_v18  ;;  %v4840_v18 = vor.u32 %v5856_v7, %v4839_v6  ;;  %v2005_v39 = vpop.f32.mrf.mxu0  ;;  %v5655_v6 = vld [vmem:[%s9039_s1 + $0xa4] sm:$0xf]  ;;  %v4049_v7 = vld [vmem:[%s9039_s1 + $0xb8] sm:$0xf0] }
 0x11b   :  { %2241 = vmatpush.bf16.msra.mxu1 %v4168_v23  ;;  %2253 = vmatpush.bf16.msra.mxu2 %v4408_v25  ;;  %v4815_v23 = vld [vmem:[%s9039_s1 + $0x6a0] sm:$0xf]  ;;  %v5850_v25 = vld [vmem:[%s9039_s1 + $0x6b4] sm:$0xf0]  ;;  %v2019_v62 = vpop.f32.mrf.mxu1 }
 0x11c   :  { %2267 = vmatpush.bf16.msra.mxu3 %v4600_v26  ;;  %v5007_v26 = vld [vmem:[%s9039_s1 + $0x820] sm:$0xf]  ;;  %v4816_v35 = vor.u32 %v5850_v25, %v4815_v23  ;;  %v5880_v23 = vld [vmem:[%s9039_s1 + $0x7a4] sm:$0xf0] }
 0x11d   :  { %2228 = vmatmul.bf16.vlgmr.msra.gmra.mxu0 %v6743_v46 }
 0x11e   :  { %2276 = vmatpush.bf16.msrb.mxu0 %v4912_v27  ;;  %2242 = vmatmul.bf16.vlgmr.msra.gmra.mxu1 %v6745_v47  ;;  %v4316_v27 = vor.u32 %v5721_v15, %v4313_v16 }
 0x11f   :  { %2290 = vmatpush.bf16.msrb.mxu1 %v5104_v32  ;;  %2254 = vmatpush.bf16.msra.mxu2 %v4384_v40  ;;  %v5715_v32 = vld [vmem:[%s9039_s1 + $0x284] sm:$0xf]  ;;  %v5008_v40 = vor.u32 %v5898_v29, %v5007_v26  ;;  %v4025_v29 = vld [vmem:[%s9039_s1 + $0x88] sm:$0xf0] }
 0x120   :  { %2268 = vmatpush.bf16.msra.mxu3 %v4576_v43  ;;  %v1979_v37 = vpop.f32.mrf.mxu2  ;;  %v1993_v43 = vpop.f32.mrf.mxu3  ;;  %v4292_v50 = vor.u32 %v5715_v32, %v4289_v34  ;;  %v4217_v32 = vld [vmem:[%s9039_s1 + $0x208] sm:$0xf0]  ;;  %v5775_v34 = vld [vmem:[%s9039_s1 + $0x464] sm:$0xf] }
 0x121   :  { %v1980_v58 = vadd.f32 %v1979_v37, %v433_v17  ;;  %v4052_v17 = vor.u32 %v5655_v6, %v4049_v7  ;;  %v3977_v7 = vld [vmem:[%s9039_s1 + $0x28] sm:$0xf0] }
 0x122   :  { %2277 = vmatpush.bf16.msrb.mxu0 %v4888_v45  ;;  %v4791_v45 = vld [vmem:[%s9039_s1 + $0x670] sm:$0xf]  ;;  %v2007_v31 = vpop.f32.mrf.mxu0 }
 0x123   :  { %2291 = vmatpush.bf16.msrb.mxu1 %v5080_v52  ;;  %2255 = vmatpush.bf16.msra.mxu2 %v4360_v61  ;;  %v5892_v52 = vld [vmem:[%s9039_s1 + $0x804] sm:$0xf0]  ;;  %v4792_v59 = vor.u32 %v5844_v48, %v4791_v45  ;;  %v1992_v61 = vadd.f32 %v1991_v5, %v1978_v38  ;;  %v5886_v5 = vld [vmem:[%s9039_s1 + $0x7d4] sm:$0xf0]  ;;  %v1994_v10 = vadd.f32 %v1993_v43, %v1980_v58  ;;  %v4193_v58 = vld [vmem:[%s9039_s1 + $0x1d8] sm:$0xf0] }
 0x124   :  { %2269 = vmatpush.bf16.msra.mxu3 %v4552_v0  ;;  %v4984_v63 = vor.u32 %v5892_v52, %v4983_v49  ;;  %v4076_v0 = vor.u32 %v5661_v53, %v4073_v54  ;;  %v4220_v48 = vor.u32 %v5697_v30, %v4217_v32  ;;  %v4001_v52 = vld [vmem:[%s9039_s1 + $0x58] sm:$0xf0]  ;;  %v5691_v53 = vld [vmem:[%s9039_s1 + $0x1c4] sm:$0xf]  ;;  %v2021_v54 = vpop.f32.mrf.mxu1  ;;  %v434_v32 = vperm.slane %v7561_v41, 2 }
 0x125   :  { %v2006_v15 = vadd.f32 %v2005_v39, %v1992_v61  ;;  %v2008_v37 = vadd.f32 %v2007_v31, %v1994_v10  ;;  %v5823_v39 = vld [vmem:[%s9039_s1 + $0x5e4] sm:$0xf]  ;;  %v4505_v61 = vld [vmem:[%s9039_s1 + $0x448] sm:$0xf0] }
 0x126   :  { %2278 = vmatpush.bf16.msrb.mxu0 %v4864_v1  ;;  %2256 = vmatmul.bf16.vlgmr.msra.gmra.mxu2 %v6789_v13  ;;  %v4767_v1 = vld [vmem:[%s9039_s1 + $0x640] sm:$0xf] }
 0x127   :  { %2292 = vmatpush.bf16.msrb.mxu1 %v5056_v3  ;;  %2304 = vmatpush.bf16.msrb.mxu2 %v4148_v4  ;;  %v4959_v3 = vld [vmem:[%s9039_s1 + $0x7c0] sm:$0xf]  ;;  %v4268_v4 = vor.u32 %v5709_v55, %v4265_v56  ;;  %v4768_v11 = vor.u32 %v5838_v2, %v4767_v1 }
 0x128   :  { %2318 = vmatpush.bf16.msrb.mxu3 %v4340_v9  ;;  %v4241_v9 = vld [vmem:[%s9039_s1 + $0x238] sm:$0xf0]  ;;  %v4960_v16 = vor.u32 %v5886_v5, %v4959_v3  ;;  %v5637_v3 = vld [vmem:[%s9039_s1 + $0x14] sm:$0xf] }
 0x129   :  { %2270 = vmatmul.bf16.vlgmr.msra.gmra.mxu3 %v6802_v20  ;;  %v4244_v25 = vor.u32 %v5703_v8, %v4241_v9  ;;  %v5685_v8 = vld [vmem:[%s9039_s1 + $0x194] sm:$0xf]  ;;  %v4169_v9 = vld [vmem:[%s9039_s1 + $0x1a8] sm:$0xf0] }
 0x12a   :  { %2279 = vmatpush.bf16.msrb.mxu0 %v4840_v18  ;;  %v2033_v18 = vpop.f32.mrf.mxu2  ;;  %v4172_v30 = vor.u32 %v5685_v8, %v4169_v9  ;;  %v4409_v9 = vld [vmem:[%s9039_s1 + $0x388] sm:$0xf0] }
 0x12b   :  { %2293 = vmatpush.bf16.msrb.mxu1 %v5032_v19  ;;  %2305 = vmatpush.bf16.msrb.mxu2 %v4124_v21  ;;  %v5832_v19 = vld [vmem:[%s9039_s1 + $0x624] sm:$0xf0]  ;;  %v4935_v21 = vld [vmem:[%s9039_s1 + $0x790] sm:$0xf] }
 0x12c   :  { %2319 = vmatpush.bf16.msrb.mxu3 %v4316_v27  ;;  %v2047_v26 = vpop.f32.mrf.mxu3  ;;  %v5649_v27 = vld [vmem:[%s9039_s1 + $0x74] sm:$0xf]  ;;  %v4744_v38 = vor.u32 %v5832_v19, %v4743_v12  ;;  %v4936_v43 = vor.u32 %v5880_v23, %v4935_v21  ;;  %v4673_v19 = vld [vmem:[%s9039_s1 + $0x598] sm:$0xf0]  ;;  %v5871_v21 = vld [vmem:[%s9039_s1 + $0x764] sm:$0xf] }
 0x12d   :  { %v4028_v45 = vor.u32 %v5649_v27, %v4025_v29  ;;  %v4913_v23 = vld [vmem:[%s9039_s1 + $0x778] sm:$0xf0] }
 0x12e   :  { %2280 = vmatpush.bf16.msrb.mxu0 %v4816_v35  ;;  %v4529_v35 = vld [vmem:[%s9039_s1 + $0x478] sm:$0xf0] }
 0x12f   :  { %2294 = vmatpush.bf16.msrb.mxu1 %v5008_v40  ;;  %2306 = vmatpush.bf16.msrb.mxu2 %v4100_v42  ;;  %v4721_v40 = vld [vmem:[%s9039_s1 + $0x5f8] sm:$0xf0]  ;;  %v2020_v42 = vadd.f32 %v2019_v62, %v2006_v15  ;;  %v4532_v49 = vor.u32 %v5775_v34, %v4529_v35  ;;  %v2022_v62 = vadd.f32 %v2021_v54, %v2008_v37  ;;  %v5763_v15 = vld [vmem:[%s9039_s1 + $0x404] sm:$0xf]  ;;  %v5757_v34 = vld [vmem:[%s9039_s1 + $0x3d4] sm:$0xf] }
 0x130   :  { %2320 = vmatpush.bf16.msrb.mxu3 %v4292_v50  ;;  %v5643_v50 = vld [vmem:[%s9039_s1 + $0x44] sm:$0xf]  ;;  %v4724_v56 = vor.u32 %v5823_v39, %v4721_v40  ;;  %v5105_v27 = vld [vmem:[%s9039_s1 + $0x8f8] sm:$0xf0]  ;;  %v4457_v39 = vld [vmem:[%s9039_s1 + $0x3e8] sm:$0xf0] }
 0x131   :  { %v2034_v55 = vadd.f32 %v2033_v18, %v2020_v42  ;;  %v4004_v1 = vor.u32 %v5643_v50, %v4001_v52  ;;  %v5805_v40 = vld [vmem:[%s9039_s1 + $0x554] sm:$0xf]  ;;  %v5081_v54 = vld [vmem:[%s9039_s1 + $0x8c8] sm:$0xf0] }
 0x132   :  { %2281 = vmatpush.bf16.msrb.mxu0 %v4792_v59  ;;  %v5769_v59 = vld [vmem:[%s9039_s1 + $0x434] sm:$0xf]  ;;  %v2035_v2 = vpop.f32.mrf.mxu2 }
 0x133   :  { %2295 = vmatpush.bf16.msrb.mxu1 %v4984_v63  ;;  %2307 = vmatpush.bf16.msrb.mxu2 %v4076_v0  ;;  %v5817_v63 = vld [vmem:[%s9039_s1 + $0x5b4] sm:$0xf]  ;;  %v4697_v0 = vld [vmem:[%s9039_s1 + $0x5c8] sm:$0xf0]  ;;  %v4508_v5 = vor.u32 %v5769_v59, %v4505_v61  ;;  %v2036_v6 = vadd.f32 %v2035_v2, %v2022_v62  ;;  %v7979_v10 = vadd.f32 %v2047_v26, %v2034_v55  ;;  %v5919_v26 = vld [vmem:[%s9039_s1 + $0x8e4] sm:$0xf] }
 0x134   :  { %2321 = vmatpush.bf16.msrb.mxu3 %v4268_v4  ;;  %v4196_v4 = vor.u32 %v5691_v53, %v4193_v58  ;;  %v2049_v12 = vpop.f32.mrf.mxu3  ;;  %v5108_v42 = vor.u32 %v5919_v26, %v5105_v27  ;;  %v5913_v53 = vld [vmem:[%s9039_s1 + $0x8b4] sm:$0xf]  ;;  %v5751_v61 = vld [vmem:[%s9039_s1 + $0x3a4] sm:$0xf]  ;;  %v4433_v62 = vld [vmem:[%s9039_s1 + $0x3b8] sm:$0xf0] }
 0x135   :  { %v7992_v18 = vadd.f32 %v2049_v12, %v2036_v6  ;;  %v2389_v35 = vmax.f32 %v7979_v10, 0.0  ;;  %v4625_v2 = vld [vmem:[%s9039_s1 + $0x538] sm:$0xf0]  ;;  %v4436_v6 = vor.u32 %v5751_v61, %v4433_v62  ;;  %v4553_v62 = vld [vmem:[%s9039_s1 + $0x4a8] sm:$0xf0] }
 0x136   :  { %2282 = vmatpush.bf16.msrb.mxu0 %v4768_v11  ;;  %v4700_v11 = vor.u32 %v5817_v63, %v4697_v0  ;;  %v5799_v63 = vld [vmem:[%s9039_s1 + $0x524] sm:$0xf] }
 0x137   :  { %2296 = vmatpush.bf16.msrb.mxu1 %v4960_v16  ;;  %2308 = vmatpush.bf16.msrb.mxu2 %v4052_v17  ;;  %v4481_v16 = vld [vmem:[%s9039_s1 + $0x418] sm:$0xf0]  ;;  %v5811_v17 = vld [vmem:[%s9039_s1 + $0x584] sm:$0xf]  ;;  %v2395_v29 = vmax.f32 %v7992_v18, 0.0 }
 0x138   :  { %2322 = vmatpush.bf16.msrb.mxu3 %v4244_v25  ;;  %v3980_v25 = vor.u32 %v5637_v3, %v3977_v7  ;;  %v4484_v31 = vor.u32 %v5763_v15, %v4481_v16  ;;  %v4676_v37 = vor.u32 %v5811_v17, %v4673_v19  ;;  %v5859_v3 = vld [vmem:[%s9039_s1 + $0x704] sm:$0xf]  ;;  %v4628_v7 = vor.u32 %v5799_v63, %v4625_v2  ;;  %v4601_v15 = vld [vmem:[%s9039_s1 + $0x508] sm:$0xf0]  ;;  %v5853_v16 = vld [vmem:[%s9039_s1 + $0x6d4] sm:$0xf] }
 0x139   :  { %v4841_v17 = vld [vmem:[%s9039_s1 + $0x6e8] sm:$0xf0]  ;;  %v5841_v63 = vld [vmem:[%s9039_s1 + $0x674] sm:$0xf] }
 0x13a   :  { %2283 = vmatpush.bf16.msrb.mxu0 %v4744_v38  ;;  %v4916_v38 = vor.u32 %v5871_v21, %v4913_v23  ;;  %v2061_v50 = vpop.f32.mrf.mxu0  ;;  %v5901_v21 = vld [vmem:[%s9039_s1 + $0x854] sm:$0xf]  ;;  %v5033_v23 = vld [vmem:[%s9039_s1 + $0x868] sm:$0xf0] }
 0x13b   :  { %2297 = vmatpush.bf16.msrb.mxu1 %v4936_v43  ;;  %2309 = vmatpush.bf16.msrb.mxu2 %v4028_v45  ;;  %v4649_v43 = vld [vmem:[%s9039_s1 + $0x568] sm:$0xf0]  ;;  %v5865_v45 = vld [vmem:[%s9039_s1 + $0x734] sm:$0xf]  ;;  %v2075_v52 = vpop.f32.mrf.mxu1  ;;  %v2062_v55 = vadd.f32 %v2061_v50, %v434_v32 }
 0x13c   :  { %2323 = vmatpush.bf16.msrb.mxu3 %v4220_v48  ;;  %v4889_v48 = vld [vmem:[%s9039_s1 + $0x748] sm:$0xf0]  ;;  %v4652_v58 = vor.u32 %v5805_v40, %v4649_v43  ;;  %v4577_v40 = vld [vmem:[%s9039_s1 + $0x4d8] sm:$0xf0]  ;;  %v5889_v2 = vld [vmem:[%s9039_s1 + $0x7f4] sm:$0xf] }
 0x13d   :  { %2284 = vmatmul.bf16.vlgmr.msrb.gmra.mxu0 %v6856_v51  ;;  %v4892_v59 = vor.u32 %v5865_v45, %v4889_v48  ;;  %v2076_v0 = vadd.f32 %v2075_v52, %v2062_v55  ;;  %v4817_v43 = vld [vmem:[%s9039_s1 + $0x6b8] sm:$0xf0]  ;;  %v5895_v45 = vld [vmem:[%s9039_s1 + $0x824] sm:$0xf]  ;;  %v4361_v55 = vld [vmem:[%s9039_s1 + $0x328] sm:$0xf0] }
 0x13e   :  { %2332 = vmatpush.bf16.msra.mxu0 %v4532_v49  ;;  %2298 = vmatmul.bf16.vlgmr.msrb.gmra.mxu1 %v6848_v44  ;;  %v6105_v49 = vpack.i.bf16 %v2395_v29, %v2389_v35  ;;  %v5009_v48 = vld [vmem:[%s9039_s1 + $0x838] sm:$0xf0] }
 0x13f   :  { %2346 = vmatpush.bf16.msra.mxu1 %v4724_v56  ;;  %2310 = vmatpush.bf16.msrb.mxu2 %v4004_v1  ;;  %v4460_v56 = vor.u32 %v5757_v34, %v4457_v39  ;;  %v5084_v1 = vor.u32 %v5913_v53, %v5081_v54  ;;  %v5739_v34 = vld [vmem:[%s9039_s1 + $0x344] sm:$0xf]  ;;  %v5036_v39 = vor.u32 %v5901_v21, %v5033_v23  ;;  %v5733_v54 = vld [vmem:[%s9039_s1 + $0x314] sm:$0xf] }
 0x140   :  { %2324 = vmatpush.bf16.msrb.mxu3 %v4196_v4  ;;  %v4865_v4 = vld [vmem:[%s9039_s1 + $0x718] sm:$0xf0]  ;;  %6106 = vrot.lane.b32.xlu2 %v6105_v49, %s6233_s28  ;;  %v5877_v23 = vld [vmem:[%s9039_s1 + $0x794] sm:$0xf] }
 0x141   :  { %v4868_v8 = vor.u32 %v5859_v3, %v4865_v4  ;;  %v4364_v4 = vor.u32 %v5733_v54, %v4361_v55 }
 0x142   :  { %2333 = vmatpush.bf16.msra.mxu0 %v4508_v5  ;;  %v5057_v5 = vld [vmem:[%s9039_s1 + $0x898] sm:$0xf0]  ;;  %v2063_v19 = vpop.f32.mrf.mxu0 }
 0x143   :  { %2347 = vmatpush.bf16.msra.mxu1 %v4700_v11  ;;  %2311 = vmatpush.bf16.msrb.mxu2 %v3980_v25  ;;  %v5793_v11 = vld [vmem:[%s9039_s1 + $0x4f4] sm:$0xf]  ;;  %v2064_v25 = vadd.f32 %v2063_v19, %v434_v32  ;;  %v2077_v27 = vpop.f32.mrf.mxu1  ;;  %v4745_v19 = vld [vmem:[%s9039_s1 + $0x628] sm:$0xf0] }
 0x144   :  { %2325 = vmatpush.bf16.msrb.mxu3 %v4172_v30  ;;  %v4604_v30 = vor.u32 %v5793_v11, %v4601_v15 }
 0x145   :  { %v2078_v32 = vadd.f32 %v2077_v27, %v2064_v25  ;;  %v4937_v25 = vld [vmem:[%s9039_s1 + $0x7a8] sm:$0xf0] }
 0x146   :  { %2334 = vmatpush.bf16.msra.mxu0 %v4484_v31  ;;  %2312 = vmatmul.bf16.vlgmr.msrb.gmra.mxu2 %v6743_v46  ;;  %v5907_v46 = vld [vmem:[%s9039_s1 + $0x884] sm:$0xf]  ;;  %v4844_v31 = vor.u32 %v5853_v16, %v4841_v17  ;;  %v5829_v17 = vld [vmem:[%s9039_s1 + $0x614] sm:$0xf] }
 0x147   :  { %2348 = vmatpush.bf16.msra.mxu1 %v4676_v37  ;;  %2360 = vmatpush.bf16.msra.mxu2 %v4916_v38  ;;  %v5060_v12 = vor.u32 %v5907_v46, %v5057_v5  ;;  %v4385_v37 = vld [vmem:[%s9039_s1 + $0x358] sm:$0xf0]  ;;  %v5787_v38 = vld [vmem:[%s9039_s1 + $0x4c4] sm:$0xf]  ;;  %v4748_v27 = vor.u32 %v5829_v17, %v4745_v19 }
 0x148   :  { %2374 = vmatpush.bf16.msra.mxu3 %v5108_v42  ;;  %v5847_v42 = vld [vmem:[%s9039_s1 + $0x6a4] sm:$0xf]  ;;  %v4388_v49 = vor.u32 %v5739_v34, %v4385_v37  ;;  %v4580_v50 = vor.u32 %v5787_v38, %v4577_v40 }
 0x149   :  { %2326 = vmatmul.bf16.vlgmr.msrb.gmra.mxu3 %v6745_v47  ;;  %v5745_v47 = vld [vmem:[%s9039_s1 + $0x374] sm:$0xf]  ;;  %v4820_v52 = vor.u32 %v5847_v42, %v4817_v43  ;;  %v2089_v53 = vpop.f32.mrf.mxu2  ;;  %v435_v43 = vperm.slane %v7561_v41, 3 }
 0x14a   :  { %2335 = vmatpush.bf16.msra.mxu0 %v4460_v56  ;;  %v4412_v26 = vor.u32 %v5745_v47, %v4409_v9  ;;  %v5781_v56 = vld [vmem:[%s9039_s1 + $0x494] sm:$0xf]  ;;  %v5883_v47 = vld [vmem:[%s9039_s1 + $0x7c4] sm:$0xf]  ;;  %v4961_v9 = vld [vmem:[%s9039_s1 + $0x7d8] sm:$0xf0] }
 0x14b   :  { %2349 = vmatpush.bf16.msra.mxu1 %v4652_v58  ;;  %2361 = vmatpush.bf16.msra.mxu2 %v4892_v59  ;;  %v5012_v58 = vor.u32 %v5895_v45, %v5009_v48  ;;  %v2090_v59 = vadd.f32 %v2089_v53, %v2076_v0  ;;  %v4985_v0 = vld [vmem:[%s9039_s1 + $0x808] sm:$0xf0]  ;;  %v4556_v46 = vor.u32 %v5781_v56, %v4553_v62 }
 0x14c   :  { %2375 = vmatpush.bf16.msra.mxu3 %v5084_v1  ;;  %v2103_v61 = vpop.f32.mrf.mxu3  ;;  %v4793_v1 = vld [vmem:[%s9039_s1 + $0x688] sm:$0xf0]  ;;  %v4964_v15 = vor.u32 %v5883_v47, %v4961_v9 }
 0x14d   :  { %v2104_v3 = vadd.f32 %v2103_v61, %v2090_v59  ;;  %v4796_v5 = vor.u32 %v5841_v63, %v4793_v1 }
 0x14e   :  { %2336 = vmatpush.bf16.msra.mxu0 %v4436_v6  ;;  %v4988_v6 = vor.u32 %v5889_v2, %v4985_v0 }
 0x14f   :  { %2350 = vmatpush.bf16.msra.mxu1 %v4628_v7  ;;  %2362 = vmatpush.bf16.msra.mxu2 %v4868_v8  ;;  %v5835_v7 = vld [vmem:[%s9039_s1 + $0x644] sm:$0xf]  ;;  %v4769_v8 = vld [vmem:[%s9039_s1 + $0x658] sm:$0xf0] }
 0x150   :  { %2376 = vmatpush.bf16.msra.mxu3 %v5060_v12  ;;  %v4772_v11 = vor.u32 %v5835_v7, %v4769_v8 }
 0x151   :  { %v2091_v12 = vpop.f32.mrf.mxu2 }
 0x152   :  { %2337 = vmatpush.bf16.msra.mxu0 %v4412_v26  ;;  %v2092_v16 = vadd.f32 %v2091_v12, %v2078_v32 }
 0x153   :  { %2351 = vmatpush.bf16.msra.mxu1 %v4604_v30  ;;  %2363 = vmatpush.bf16.msra.mxu2 %v4844_v31  ;;  %v4940_v30 = vor.u32 %v5877_v23, %v4937_v25  ;;  %v6203_v23 = vld [vmem:[%s9040_s2] sm:$0x3f]  ;;  %s6234_s2 = smov 88  }
 0x154   :  { %2377 = vmatpush.bf16.msra.mxu3 %v5036_v39  ;;  %v2105_v21 = vpop.f32.mrf.mxu3  ;;  %v436_v25 = vperm.slane %v6203_v23, 4 }
 0x155   :  { %v2106_v26 = vadd.f32 %v2105_v21, %v2092_v16 }
 0x156   :  { %2338 = vmatpush.bf16.msra.mxu0 %v4388_v49 }
 0x157   :  { %2352 = vmatpush.bf16.msra.mxu1 %v4580_v50  ;;  %2364 = vmatpush.bf16.msra.mxu2 %v4820_v52 }
 0x158   :  { %2378 = vmatpush.bf16.msra.mxu3 %v5012_v58 }
 0x15a   :  { %2339 = vmatpush.bf16.msra.mxu0 %v4364_v4  ;;  %v2117_v31 = vpop.f32.mrf.mxu0 }
 0x15b   :  { %2353 = vmatpush.bf16.msra.mxu1 %v4556_v46  ;;  %2365 = vmatpush.bf16.msra.mxu2 %v4796_v5  ;;  %v2118_v34 = vadd.f32 %v2117_v31, %v2104_v3 }
 0x15c   :  { %2379 = vmatpush.bf16.msra.mxu3 %v4988_v6 }
 0x15d   :  { %2340 = vmatmul.bf16.vlgmr.msra.gmra.mxu0 %v6789_v13  ;;  %v2131_v13 = vpop.f32.mrf.mxu1 }
 0x15e   :  { %2354 = vmatmul.bf16.vlgmr.msra.gmra.mxu1 %v6802_v20  ;;  %v8165_v37 = vadd.f32 %v2131_v13, %v2118_v34  ;;  %v437_v34 = vperm.slane %v6203_v23, 5 }
 0x15f   :  { %2366 = vmatpush.bf16.msra.mxu2 %v4772_v11 }
 0x160   :  { %2380 = vmatpush.bf16.msra.mxu3 %v4964_v15 }
 0x162   :  { %v2119_v38 = vpop.f32.mrf.mxu0 }
 0x163   :  { %2367 = vmatpush.bf16.msra.mxu2 %v4748_v27  ;;  %v2120_v32 = vadd.f32 %v2119_v38, %v2106_v26 }
 0x164   :  { %2381 = vmatpush.bf16.msra.mxu3 %v4940_v30 }
 0x165   :  { %v2133_v39 = vpop.f32.mrf.mxu1 }
 0x166   :  { %2368 = vmatmul.bf16.vlgmr.msra.gmra.mxu2 %v6856_v51  ;;  %v8169_v20 = vadd.f32 %v2133_v39, %v2120_v32 }
 0x167   :  { %2382 = vmatmul.bf16.vlgmr.msra.gmra.mxu3 %v6848_v44 }
 0x169   :  { %v2145_v40 = vpop.f32.mrf.mxu2 }
 0x16a   :  { %v2146_v49 = vadd.f32 %v2145_v40, %v435_v43 }
 0x16c   :  { %v2159_v42 = vpop.f32.mrf.mxu3 }
 0x16d   :  { %v2160_v53 = vadd.f32 %v2159_v42, %v2146_v49 }
 0x171   :  { %v2147_v48 = vpop.f32.mrf.mxu2 }
 0x172   :  { %v2148_v54 = vadd.f32 %v2147_v48, %v435_v43 }
 0x174   :  { %v2161_v50 = vpop.f32.mrf.mxu3 }
 0x175   :  { %v2162_v44 = vadd.f32 %v2161_v50, %v2148_v54 }
 0x17a   :  { %v2173_v45 = vpop.f32.mrf.mxu0 }
 0x17b   :  { %v2187_v52 = vpop.f32.mrf.mxu1  ;;  %v2174_v55 = vadd.f32 %v2173_v45, %v2160_v53  ;;  %v1896_v53 = vadd.f32 %v7648_v24, %v432_v57 }
 0x17d   :  { %v2188_v59 = vadd.f32 %v2187_v52, %v2174_v55 }
 0x182   :  { %v2175_v51 = vpop.f32.mrf.mxu0 }
 0x183   :  { %v2176_v61 = vadd.f32 %v2175_v51, %v2162_v44  ;;  %v2189_v63 = vpop.f32.mrf.mxu1 }
 0x185   :  { %v2190_v1 = vadd.f32 %v2189_v63, %v2176_v61  ;;  %v1910_v61 = vadd.f32 %v7659_v36, %v1896_v53 }
 0x189   :  { %v2201_v56 = vpop.f32.mrf.mxu2 }
 0x18a   :  { %v2202_v62 = vadd.f32 %v2201_v56, %v2188_v59 }
 0x18c   :  { %v2215_v58 = vpop.f32.mrf.mxu3 }
 0x18d   :  { %v2216_v0 = vadd.f32 %v2215_v58, %v2202_v62 }
 0x18f   :  { %v8172_v5 = vmax.f32 %v2216_v0, 0.0  ;;  %v1924_v0 = vadd.f32 %v7738_v28, %v1910_v61  ;;  %v2396_v28 = vmax.f32 %v8169_v20, 0.0 }
 0x191   :  { %v2203_v2 = vpop.f32.mrf.mxu2 }
 0x192   :  { %v2204_v3 = vadd.f32 %v2203_v2, %v2190_v1 }
 0x194   :  { %v2217_v4 = vpop.f32.mrf.mxu3 }
 0x195   :  { %v2218_v46 = vadd.f32 %v2217_v4, %v2204_v3 }
 0x197   :  { %v8174_v6 = vmax.f32 %v2218_v46, 0.0 }
 0x199   :  { %v6120_v7 = vpack.i.bf16 %v8174_v6, %v8172_v5 }
 0x19a   :  { %v2229_v8 = vpop.f32.mrf.mxu0 }
 0x19b   :  { %6121 = vrot.lane.b32.xlu2 %v6120_v7, %s6233_s28  ;;  %v2243_v47 = vpop.f32.mrf.mxu1  ;;  %v2230_v31 = vadd.f32 %v2229_v8, %v436_v25  ;;  %v1938_v8 = vadd.f32 %v7749_v33, %v1924_v0 }
 0x19d   :  { %v2244_v38 = vadd.f32 %v2243_v47, %v2230_v31 }
 0x1a2   :  { %v2231_v9 = vpop.f32.mrf.mxu0 }
 0x1a3   :  { %v2245_v15 = vpop.f32.mrf.mxu1  ;;  %v2232_v43 = vadd.f32 %v2231_v9, %v436_v25 }
 0x1a5   :  { %v2246_v54 = vadd.f32 %v2245_v15, %v2232_v43 }
 0x1a9   :  { %v2257_v11 = vpop.f32.mrf.mxu2 }
 0x1aa   :  { %v2258_v40 = vadd.f32 %v2257_v11, %v2244_v38 }
 0x1ac   :  { %v2271_v12 = vpop.f32.mrf.mxu3 }
 0x1ad   :  { %v2272_v49 = vadd.f32 %v2271_v12, %v2258_v40 }
 0x1b1   :  { %v2259_v17 = vpop.f32.mrf.mxu2 }
 0x1b2   :  { %v2260_v56 = vadd.f32 %v2259_v17, %v2246_v54 }
 0x1b4   :  { %v2273_v19 = vpop.f32.mrf.mxu3 }
 0x1b5   :  { %v2274_v3 = vadd.f32 %v2273_v19, %v2260_v56  ;;  %v2390_v19 = vmax.f32 %v8165_v37, 0.0 }
 0x1b7   :  { %v6110_v33 = vpack.i.bf16 %v2396_v28, %v2390_v19 }
 0x1ba   :  { %v2285_v16 = vpop.f32.mrf.mxu0 }
 0x1bb   :  { %v2299_v21 = vpop.f32.mrf.mxu1  ;;  %v2286_v55 = vadd.f32 %v2285_v16, %v2272_v49  ;;  %v1952_v16 = vadd.f32 %v7798_v60, %v1938_v8 }
 0x1bd   :  { %v2300_v62 = vadd.f32 %v2299_v21, %v2286_v55  ;;  %v1966_v25 = vadd.f32 %v7824_v14, %v1952_v16 }
 0x1bf   :  { %v2392_v46 = vmax.f32 %v2300_v62, 0.0  ;;  %v2394_v60 = vmax.f32 %v1966_v25, 0.0  ;;  %v5993_v25 = vld [vmem:[%s9041_s3 + $0x230] sm:$0xf0] }
 0x1c2   :  { %v2287_v26 = vpop.f32.mrf.mxu0 }
 0x1c3   :  { %v2301_v13 = vpop.f32.mrf.mxu1  ;;  %v2288_v57 = vadd.f32 %v2287_v26, %v2274_v3 }
 0x1c5   :  { %v2302_v12 = vadd.f32 %v2301_v13, %v2288_v57 }
 0x1c7   :  { %v2398_v21 = vmax.f32 %v2302_v12, 0.0 }
 0x1c9   :  { %v2313_v27 = vpop.f32.mrf.mxu2 }
 0x1ca   :  { %v2314_v32 = vadd.f32 %v2313_v27, %v437_v34  ;;  %v2388_v27 = vmax.f32 %v7736_v22, 0.0 }
 0x1cc   :  { %v2327_v30 = vpop.f32.mrf.mxu3 }
 0x1cd   :  { %v2328_v45 = vadd.f32 %v2327_v30, %v2314_v32  ;;  %v6115_v30 = vpack.i.bf16 %v2394_v60, %v2388_v27 }
 0x1d1   :  { %v2315_v42 = vpop.f32.mrf.mxu2 }
 0x1d2   :  { %v2316_v51 = vadd.f32 %v2315_v42, %v437_v34 }
 0x1d4   :  { %v2329_v48 = vpop.f32.mrf.mxu3 }
 0x1d5   :  { %v2330_v63 = vadd.f32 %v2329_v48, %v2316_v51 }
 0x1da   :  { %v2341_v39 = vpop.f32.mrf.mxu0 }
 0x1db   :  { %v2342_v50 = vadd.f32 %v2341_v39, %v2328_v45  ;;  %v2355_v52 = vpop.f32.mrf.mxu1  ;;  %v6107_v39 = vpop.permute.xlu2 %6106 }
 0x1dc   :  { %v6109_v42 = vunpack.i.h.bf16 %v6107_v39  ;;  %v6108_v43 = vunpack.i.l.bf16 %v6107_v39 }
 0x1dd   :  { %v2356_v44 = vadd.f32 %v2355_v52, %v2342_v50 }
 0x1e2   :  { %v2343_v58 = vpop.f32.mrf.mxu0 }
 0x1e3   :  { %v2344_v4 = vadd.f32 %v2343_v58, %v2330_v63  ;;  %v2357_v7 = vpop.f32.mrf.mxu1 }
 0x1e5   :  { %v2358_v47 = vadd.f32 %v2357_v7, %v2344_v4 }
 0x1e9   :  { %v2369_v59 = vpop.f32.mrf.mxu2 }
 0x1ea   :  { %v2370_v1 = vadd.f32 %v2369_v59, %v2356_v44  ;;  %v2383_v2 = vpop.f32.mrf.mxu3 }
 0x1ec   :  { %v2384_v41 = vadd.f32 %v2383_v2, %v2370_v1 }
 0x1ee   :  { %v2393_v24 = vmax.f32 %v2384_v41, 0.0 }
 0x1f0   :  { %v6095_v9 = vpack.i.bf16 %v2393_v24, %v2392_v46 }
 0x1f1   :  { %v2371_v11 = vpop.f32.mrf.mxu2 }
 0x1f2   :  { %v2372_v36 = vadd.f32 %v2371_v11, %v2358_v47  ;;  %6096 = vrot.lane.b32.xlu0 %v6095_v9, %s6233_s28  ;;  %v2385_v15 = vpop.f32.mrf.mxu3 }
 0x1f4   :  { %v2386_v17 = vadd.f32 %v2385_v15, %v2372_v36 }
 0x1f5   :  { %v6122_v63 = vpop.permute.xlu2 %6121 }
 0x1f6   :  { %v2399_v23 = vmax.f32 %v2386_v17, 0.0  ;;  %v6123_v9 = vunpack.i.l.bf16 %v6122_v63 }
 0x1f8   :  { %v6100_v26 = vpack.i.bf16 %v2399_v23, %v2398_v21  ;;  %v2450_v12 = vmax.f32 %v8172_v5, %v6123_v9  ;;  %v2449_v16 = vmax.f32 %v2390_v19, %v6123_v9  ;;  %v5387_v23 = vld [vmem:[%s9041_s3 + $0x228] sm:$0xf]  ;;  %v6014_v9 = vld [vmem:[%s9041_s3 + $0x2d8] sm:$0xf0] }
 0x1fa   :  { %6101 = vrot.lane.b32.xlu1 %v6100_v26, %s6233_s28  ;;  %6111 = vrot.lane.b32.xlu0 %v6110_v33, %s6233_s28  ;;  %v5388_v26 = vor.u32 %v5993_v25, %v5387_v23  ;;  %v6011_v25 = vld [vmem:[%s9041_s3 + $0x2c0] sm:$0xf0] }
 0x1fc   :  { %3299 = vmatpush.bf16.msrb.mxu2 %v5388_v26  ;;  %v5969_v26 = vld [vmem:[%s9041_s3 + $0x170] sm:$0xf0] }
 0x202   :  { %6116 = vrot.lane.b32.xlu1 %v6115_v30, %s6233_s28 }
 0x264   :  { %v6097_v31 = vpop.permute.xlu0 %6096 }
 0x265   :  { %v6099_v34 = vunpack.i.h.bf16 %v6097_v31  ;;  %v6098_v14 = vunpack.i.l.bf16 %v6097_v31 }
 0x267   :  { %v2465_v13 = vsel %vm2412_vm4, %v6098_v14, %v6099_v34  ;;  %v2471_v38 = vmax.f32 %v8172_v5, %v6098_v14 }
 0x268   :  { %v2472_v32 = vmax.f32 %v2392_v46, %v2465_v13 }
 0x26a   :  { %v6125_v40 = vpack.i.bf16 %v2472_v32, %v2471_v38 }
 0x26c   :  { %v6102_v45 = vpop.permute.xlu1 %6101  ;;  %6126 = vrot.lane.b32.xlu0 %v6125_v40, %s6234_s2  ;;  %v6112_v22 = vpop.permute.xlu0 %6111 }
 0x26d   :  { %v6104_v48 = vunpack.i.h.bf16 %v6102_v45  ;;  %v6103_v49 = vunpack.i.l.bf16 %v6102_v45  ;;  %v6114_v50 = vunpack.i.h.bf16 %v6112_v22  ;;  %v6113_v52 = vunpack.i.l.bf16 %v6112_v22 }
 0x26f   :  { %v2466_v53 = vsel %vm2412_vm4, %v6103_v49, %v6104_v48  ;;  %v2473_v54 = vmax.f32 %v8174_v6, %v6103_v49  ;;  %v2425_v55 = vsel %vm2412_vm4, %v6108_v43, %v6113_v52  ;;  %v2426_v51 = vsel %vm2412_vm4, %v6109_v42, %v6114_v50 }
 0x270   :  { %v2429_v56 = vmax.f32 %v2389_v35, %v2425_v55  ;;  %v2430_v44 = vmax.f32 %v2395_v29, %v2426_v51  ;;  %v2474_v58 = vmax.f32 %v2398_v21, %v2466_v53 }
 0x272   :  { %v6135_v59 = vpack.i.bf16 %v2430_v44, %v2429_v56  ;;  %v6130_v61 = vpack.i.bf16 %v2474_v58, %v2473_v54 }
 0x274   :  { %6136 = vrot.lane.b32.xlu2 %v6135_v59, %s6234_s2  ;;  %6131 = vrot.lane.b32.xlu1 %v6130_v61, %s6234_s2  ;;  %v6117_v62 = vpop.permute.xlu1 %6116  ;;  %s6240_s2 = smov 112  }
 0x275   :  { %v6119_v1 = vunpack.i.h.bf16 %v6117_v62  ;;  %v6118_v2 = vunpack.i.l.bf16 %v6117_v62 }
 0x277   :  { %v2414_v0 = vsel %vm2412_vm4, %v6119_v1, %v6109_v42  ;;  %v2413_v3 = vsel %vm2412_vm4, %v6118_v2, %v6108_v43  ;;  %v5375_v1 = vld [vmem:[%s9041_s3 + $0x210] sm:$0xf]  ;;  %v5990_v2 = vld [vmem:[%s9041_s3 + $0x218] sm:$0xf0] }
 0x278   :  { %v2417_v35 = vmax.f32 %v2388_v27, %v2413_v3  ;;  %v2418_v46 = vmax.f32 %v2394_v60, %v2414_v0  ;;  %v6124_v60 = vunpack.i.h.bf16 %v6122_v63  ;;  %v5363_v0 = vld [vmem:[%s9041_s3 + $0x1f8] sm:$0xf]  ;;  %v5376_v3 = vor.u32 %v5990_v2, %v5375_v1  ;;  %v5992_v1 = vld [vmem:[%s9041_s3 + $0x22c] sm:$0xf] }
 0x279   :  { %v5389_v2 = vld [vmem:[%s9041_s3 + $0x234] sm:$0xf0] }
 0x27a   :  { %v2452_v37 = vmax.f32 %v8174_v6, %v6124_v60  ;;  %v2451_v31 = vmax.f32 %v2396_v28, %v6124_v60  ;;  %3300 = vmatpush.bf16.msrb.mxu2 %v5376_v3 }
 0x2ce   :  { %v6137_v4 = vpop.permute.xlu2 %6136 }
 0x2cf   :  { %v6139_v41 = vunpack.i.h.bf16 %v6137_v4  ;;  %v6138_v10 = vunpack.i.l.bf16 %v6137_v4  ;;  %v5987_v4 = vld [vmem:[%s9041_s3 + $0x200] sm:$0xf0] }
 0x2d1   :  { %v8213_v18 = vmax.f32 %v2417_v35, %v6138_v10  ;;  %v8215_v29 = vmax.f32 %v2418_v46, %v6139_v41  ;;  %v8267_v41 = vld [vmem:[%s9041_s3 + $0x2e8] sm:$0xff]  ;;  %v5364_v35 = vor.u32 %v5987_v4, %v5363_v0  ;;  %v5351_v46 = vld [vmem:[%s9041_s3 + $0x1e0] sm:$0xf] }
 0x2d2   :  { %v3065_v10 = vunpack.c.l.b16 %v8267_v41  ;;  %v5147_v4 = vld [vmem:[%s9041_s3 + $0x48] sm:$0xf] }
 0x2d3   :  { %v2523_v57 = vrot.slane %v8213_v18, 2  ;;  %v2524_v24 = vrot.slane %v8215_v29, 2  ;;  %v2500_v44 = vrot.slane %v8213_v18, 1  ;;  %v2501_v58 = vrot.slane %v8215_v29, 1  ;;  %3301 = vmatpush.bf16.msrb.mxu2 %v5364_v35  ;;  %v5411_v35 = vld [vmem:[%s9041_s3 + $0x258] sm:$0xf] }
 0x2d5   :  { %v2525_v7 = vsel %vm2522_vm5, %v2523_v57, %v2524_v24  ;;  %v2528_v8 = vsel %vm2522_vm5, %v2524_v24, %v2523_v57  ;;  %v2502_v59 = vsel %vm50_vm0, %v2500_v44, %v2501_v58  ;;  %v2505_v61 = vsel %vm50_vm0, %v2501_v58, %v2500_v44  ;;  %v5195_v57 = vld [vmem:[%s9041_s3 + $0xa8] sm:$0xf]  ;;  %v5945_v24 = vld [vmem:[%s9041_s3 + $0xb0] sm:$0xf0]  ;;  %v5423_v58 = vld [vmem:[%s9041_s3 + $0x270] sm:$0xf] }
 0x2d6   :  { %v6140_v47 = vpack.i.bf16 %v2528_v8, %v2525_v7  ;;  %v6175_v63 = vpack.i.bf16 %v2505_v61, %v2502_v59  ;;  %v3161_v7 = vpack.c.b16 %v3065_v10, %v3065_v10  ;;  %v5984_v8 = vld [vmem:[%s9041_s3 + $0x1e8] sm:$0xf0]  ;;  %v6002_v59 = vld [vmem:[%s9041_s3 + $0x278] sm:$0xf0]  ;;  %v5255_v61 = vld [vmem:[%s9041_s3 + $0x120] sm:$0xf] }
 0x2d7   :  { %v5424_v0 = vor.u32 %v6002_v59, %v5423_v58  ;;  %v5933_v10 = vld [vmem:[%s9041_s3 + $0x50] sm:$0xf0]  ;;  %v5293_v58 = vld [vmem:[%s9041_s3 + $0x174] sm:$0xf0] }
 0x2d8   :  { %6141 = vrot.lane.b32.xlu2 %v6140_v47, %s6235_s16  ;;  %v5471_v47 = vld [vmem:[%s9041_s3 + $0x2d0] sm:$0xf] }
 0x2de   :  { %v6127_v11 = vpop.permute.xlu0 %6126 }
 0x2df   :  { %v6129_v36 = vunpack.i.h.bf16 %v6127_v11  ;;  %v6128_v15 = vunpack.i.l.bf16 %v6127_v11  ;;  %v5196_v11 = vor.u32 %v5945_v24, %v5195_v57  ;;  %v5392_v57 = vor.u32 %v5992_v1, %v5389_v2  ;;  %v5999_v24 = vld [vmem:[%s9041_s3 + $0x260] sm:$0xf0]  ;;  %v5977_v2 = vld [vmem:[%s9041_s3 + $0x1b4] sm:$0xf] }
 0x2e1   :  { %v2488_v17 = vsel %vm2487_vm6, %v6128_v15, %v6129_v36  ;;  %v2495_v21 = vmax.f32 %v2450_v12, %v6129_v36  ;;  %v3263_v12 = vsel %vm3261_vm7, %v3161_v7, 0  ;;  %3271 = vmatpush.bf16.msrb.mxu0 %v5196_v11  ;;  %v5352_v36 = vor.u32 %v5984_v8, %v5351_v46  ;;  %v5243_v7 = vld [vmem:[%s9041_s3 + $0x108] sm:$0xf]  ;;  %v5957_v8 = vld [vmem:[%s9041_s3 + $0x110] sm:$0xf0] }
 0x2e2   :  { %v2494_v33 = vmax.f32 %v2449_v16, %v2488_v17  ;;  %3313 = vmatpush.bf16.msrb.mxu3 %v3263_v12  ;;  %v5472_v15 = vor.u32 %v6014_v9, %v5471_v47  ;;  %v5339_v16 = vld [vmem:[%s9041_s3 + $0x1c8] sm:$0xf]  ;;  %v5981_v17 = vld [vmem:[%s9041_s3 + $0x1d0] sm:$0xf0]  ;;  %v3066_v46 = vunpack.c.h.b16 %v8267_v41  ;;  %v5148_v47 = vor.u32 %v5933_v10, %v5147_v4  ;;  %v5377_v41 = vld [vmem:[%s9041_s3 + $0x21c] sm:$0xf0] }
 0x2e3   :  { %v2513_v38 = vrot.slane %v2495_v21, 1  ;;  %v2532_v49 = vrot.slane %v2495_v21, 2  ;;  %3302 = vmatpush.bf16.msrb.mxu2 %v5352_v36  ;;  %v5340_v23 = vor.u32 %v5981_v17, %v5339_v16  ;;  %v5989_v9 = vld [vmem:[%s9041_s3 + $0x214] sm:$0xf]  ;;  %v5135_v11 = vld [vmem:[%s9041_s3 + $0x30] sm:$0xf]  ;;  %v5412_v36 = vor.u32 %v5999_v24, %v5411_v35 }
 0x2e4   :  { %v6145_v5 = vpack.i.bf16 %v2495_v21, %v2494_v33  ;;  %v2510_v39 = vrot.slane %v2494_v33, 1  ;;  %v2529_v50 = vrot.slane %v2494_v33, 2  ;;  %v5459_v21 = vld [vmem:[%s9041_s3 + $0x2b8] sm:$0xf]  ;;  %v5291_v33 = vld [vmem:[%s9041_s3 + $0x168] sm:$0xf]  ;;  %v3162_v17 = vpack.c.b16 %v3066_v46, %v3066_v46 }
 0x2e5   :  { %v5460_v60 = vor.u32 %v6011_v25, %v5459_v21  ;;  %v5930_v12 = vld [vmem:[%s9041_s3 + $0x38] sm:$0xf0]  ;;  %v5399_v16 = vld [vmem:[%s9041_s3 + $0x240] sm:$0xf]  ;;  %v5380_v21 = vor.u32 %v5989_v9, %v5377_v41  ;;  %v5231_v25 = vld [vmem:[%s9041_s3 + $0xf0] sm:$0xf] }
 0x2e6   :  { %v6132_v27 = vpop.permute.xlu1 %6131  ;;  %6146 = vrot.lane.b32.xlu2 %v6145_v5, %s6236_s23  ;;  %3314 = vmatpush.bf16.msrb.mxu3 %v5472_v15  ;;  %v5292_v5 = vor.u32 %v5969_v26, %v5291_v33  ;;  %v5244_v15 = vor.u32 %v5957_v8, %v5243_v7  ;;  %v5954_v33 = vld [vmem:[%s9041_s3 + $0xf8] sm:$0xf0]  ;;  %v5136_v26 = vor.u32 %v5930_v12, %v5135_v11  ;;  %v6007_v4 = vld [vmem:[%s9041_s3 + $0x2a4] sm:$0xf]  ;;  %v5449_v10 = vld [vmem:[%s9041_s3 + $0x2ac] sm:$0xf0] }
 0x2e7   :  { %v6134_v19 = vunpack.i.h.bf16 %v6132_v27  ;;  %v6133_v30 = vunpack.i.l.bf16 %v6132_v27  ;;  %3303 = vmatpush.bf16.msrb.mxu2 %v5340_v23  ;;  %v5183_v27 = vld [vmem:[%s9041_s3 + $0x90] sm:$0xf]  ;;  %v5996_v23 = vld [vmem:[%s9041_s3 + $0x248] sm:$0xf0]  ;;  %v5965_v46 = vld [vmem:[%s9041_s3 + $0x154] sm:$0xf]  ;;  %v5452_v7 = vor.u32 %v6007_v4, %v5449_v10 }
 0x2e8   :  { %3285 = vmatpush.bf16.msrb.mxu1 %v5292_v5  ;;  %v5365_v5 = vld [vmem:[%s9041_s3 + $0x204] sm:$0xf0]  ;;  %v5974_v11 = vld [vmem:[%s9041_s3 + $0x19c] sm:$0xf] }
 0x2e9   :  { %v2497_v34 = vmax.f32 %v2452_v37, %v6134_v19  ;;  %v2489_v14 = vsel %vm2487_vm6, %v6133_v30, %v6134_v19  ;;  %v5942_v37 = vld [vmem:[%s9041_s3 + $0x98] sm:$0xf0]  ;;  %v5327_v30 = vld [vmem:[%s9041_s3 + $0x1b0] sm:$0xf]  ;;  %v5173_v9 = vld [vmem:[%s9041_s3 + $0x84] sm:$0xf0] }
 0x2ea   :  { %v2496_v13 = vmax.f32 %v2451_v31, %v2489_v14  ;;  %3315 = vmatpush.bf16.msrb.mxu3 %v5460_v60  ;;  %v5184_v19 = vor.u32 %v5942_v37, %v5183_v27  ;;  %v5978_v31 = vld [vmem:[%s9041_s3 + $0x1b8] sm:$0xf0]  ;;  %v5123_v27 = vld [vmem:[%s9041_s3 + $0x18] sm:$0xf]  ;;  %v5927_v37 = vld [vmem:[%s9041_s3 + $0x20] sm:$0xf0] }
 0x2eb   :  { %v2514_v32 = vrot.slane %v2497_v34, 1  ;;  %v2533_v20 = vrot.slane %v2497_v34, 2  ;;  %v5328_v14 = vor.u32 %v5978_v31, %v5327_v30  ;;  %v5986_v60 = vld [vmem:[%s9041_s3 + $0x1fc] sm:$0xf]  ;;  %v5232_v30 = vor.u32 %v5954_v33, %v5231_v25  ;;  %v5317_v12 = vld [vmem:[%s9041_s3 + $0x1a4] sm:$0xf0] }
 0x2ec   :  { %v2511_v40 = vrot.slane %v2496_v13, 1  ;;  %v2530_v28 = vrot.slane %v2496_v13, 2  ;;  %v6165_v62 = vpack.i.bf16 %v2497_v34, %v2496_v13  ;;  %v5447_v34 = vld [vmem:[%s9041_s3 + $0x2a0] sm:$0xf]  ;;  %v6008_v13 = vld [vmem:[%s9041_s3 + $0x2a8] sm:$0xf0]  ;;  %3272 = vmatpush.bf16.msrb.mxu0 %v5184_v19  ;;  %v5400_v19 = vor.u32 %v5996_v23, %v5399_v16 }
 0x2ed   :  { %v2521_v42 = vsel %vm50_vm0, %v2514_v32, %v2513_v38  ;;  %v2515_v43 = vsel %vm50_vm0, %v2513_v38, %v2514_v32  ;;  %v2540_v53 = vsel %vm2522_vm5, %v2533_v20, %v2532_v49  ;;  %v2534_v55 = vsel %vm2522_vm5, %v2532_v49, %v2533_v20  ;;  %v5279_v38 = vld [vmem:[%s9041_s3 + $0x150] sm:$0xf]  ;;  %v5966_v32 = vld [vmem:[%s9041_s3 + $0x158] sm:$0xf0]  ;;  %3304 = vmatpush.bf16.msrb.mxu2 %v5328_v14  ;;  %v6005_v20 = vld [vmem:[%s9041_s3 + $0x290] sm:$0xf0] }
 0x2ee   :  { %v2520_v45 = vsel %vm50_vm0, %v2511_v40, %v2510_v39  ;;  %v2512_v6 = vsel %vm50_vm0, %v2510_v39, %v2511_v40  ;;  %v2539_v52 = vsel %vm2522_vm5, %v2530_v28, %v2529_v50  ;;  %v2531_v54 = vsel %vm2522_vm5, %v2529_v50, %v2530_v28  ;;  %v5267_v50 = vld [vmem:[%s9041_s3 + $0x138] sm:$0xf]  ;;  %v5935_v33 = vld [vmem:[%s9041_s3 + $0x64] sm:$0xf] }
 0x2ef   :  { %v6155_v22 = vpack.i.bf16 %v2521_v42, %v2520_v45  ;;  %v6150_v48 = vpack.i.bf16 %v2515_v43, %v2512_v6  ;;  %v6170_v51 = vpack.i.bf16 %v2540_v53, %v2539_v52  ;;  %v6160_v56 = vpack.i.bf16 %v2534_v55, %v2531_v54  ;;  %v5171_v42 = vld [vmem:[%s9041_s3 + $0x78] sm:$0xf]  ;;  %v5939_v43 = vld [vmem:[%s9041_s3 + $0x80] sm:$0xf0]  ;;  %v5159_v53 = vld [vmem:[%s9041_s3 + $0x60] sm:$0xf] }
 0x2f0   :  { %v5448_v39 = vor.u32 %v6008_v13, %v5447_v34  ;;  %v5280_v40 = vor.u32 %v5966_v32, %v5279_v38  ;;  %v5315_v45 = vld [vmem:[%s9041_s3 + $0x198] sm:$0xf]  ;;  %v5172_v6 = vor.u32 %v5939_v43, %v5171_v42  ;;  %v5963_v52 = vld [vmem:[%s9041_s3 + $0x140] sm:$0xf0]  ;;  %v5936_v55 = vld [vmem:[%s9041_s3 + $0x68] sm:$0xf0]  ;;  %v5368_v34 = vor.u32 %v5986_v60, %v5365_v5 }
 0x2f1   :  { %6156 = vrot.lane.b32.xlu1 %v6155_v22, %s6233_s28  ;;  %6151 = vrot.lane.b32.xlu0 %v6150_v48, %s6233_s28  ;;  %s6238_s28 = smov 40   ;;  %v5975_v22 = vld [vmem:[%s9041_s3 + $0x1a0] sm:$0xf0]  ;;  %v5435_v48 = vld [vmem:[%s9041_s3 + $0x288] sm:$0xf]  ;;  %v5268_v54 = vor.u32 %v5963_v52, %v5267_v50  ;;  %v5160_v44 = vor.u32 %v5936_v55, %v5159_v53  ;;  %v3266_v31 = vsel %vm3261_vm7, %v3162_v17, 0  ;;  %v5124_v32 = vor.u32 %v5927_v37, %v5123_v27 }
 0x2f2   :  { %3316 = vmatpush.bf16.msrb.mxu3 %v5448_v39  ;;  %3286 = vmatpush.bf16.msrb.mxu1 %v5280_v40  ;;  %v5316_v28 = vor.u32 %v5975_v22, %v5315_v45  ;;  %v5436_v49 = vor.u32 %v6005_v20, %v5435_v48  ;;  %v5219_v14 = vld [vmem:[%s9041_s3 + $0xd8] sm:$0xf]  ;;  %v5951_v13 = vld [vmem:[%s9041_s3 + $0xe0] sm:$0xf0]  ;;  %v5353_v39 = vld [vmem:[%s9041_s3 + $0x1ec] sm:$0xf0] }
 0x2f3   :  { %3273 = vmatpush.bf16.msrb.mxu0 %v5172_v6  ;;  %v5983_v38 = vld [vmem:[%s9041_s3 + $0x1e4] sm:$0xf]  ;;  %v6013_v40 = vld [vmem:[%s9041_s3 + $0x2d4] sm:$0xf]  ;;  %v5473_v42 = vld [vmem:[%s9041_s3 + $0x2dc] sm:$0xf0]  ;;  %v5220_v6 = vor.u32 %v5951_v13, %v5219_v14 }
 0x2f4   :  { %3305 = vmatpush.bf16.msrb.mxu2 %v5316_v28  ;;  %v5111_v43 = vld [vmem:[%s9041_s3] sm:$0xf]  ;;  %v5924_v45 = vld [vmem:[%s9041_s3 + $0x8] sm:$0xf0]  ;;  %v5197_v48 = vld [vmem:[%s9041_s3 + $0xb4] sm:$0xf0]  ;;  %v5356_v20 = vor.u32 %v5983_v38, %v5353_v39  ;;  %v5476_v28 = vor.u32 %v6013_v40, %v5473_v42 }
 0x2f5   :  { %v5944_v22 = vld [vmem:[%s9041_s3 + $0xac] sm:$0xf]  ;;  %v5112_v53 = vor.u32 %v5924_v45, %v5111_v43  ;;  %v6010_v55 = vld [vmem:[%s9041_s3 + $0x2bc] sm:$0xf]  ;;  %v5437_v16 = vld [vmem:[%s9041_s3 + $0x294] sm:$0xf0] }
 0x2f6   :  { %3317 = vmatpush.bf16.msrb.mxu3 %v5436_v49  ;;  %3287 = vmatpush.bf16.msrb.mxu1 %v5268_v54  ;;  %v5207_v49 = vld [vmem:[%s9041_s3 + $0xc0] sm:$0xf]  ;;  %v5948_v50 = vld [vmem:[%s9041_s3 + $0xc8] sm:$0xf0]  ;;  %v5341_v54 = vld [vmem:[%s9041_s3 + $0x1d4] sm:$0xf0] }
 0x2f7   :  { %3274 = vmatpush.bf16.msrb.mxu0 %v5160_v44  ;;  %v5980_v52 = vld [vmem:[%s9041_s3 + $0x1cc] sm:$0xf]  ;;  %v5208_v59 = vor.u32 %v5948_v50, %v5207_v49  ;;  %v5962_v17 = vld [vmem:[%s9041_s3 + $0x13c] sm:$0xf]  ;;  %v5971_v5 = vld [vmem:[%s9041_s3 + $0x184] sm:$0xf] }
 0x2f8   :  { %v5968_v44 = vld [vmem:[%s9041_s3 + $0x16c] sm:$0xf]  ;;  %v5305_v27 = vld [vmem:[%s9041_s3 + $0x18c] sm:$0xf0]  ;;  %v6001_v37 = vld [vmem:[%s9041_s3 + $0x274] sm:$0xf] }
 0x2f9   :  { %6171 = vrot.lane.b32.xlu1 %v6170_v51, %s6237_s24  ;;  %6161 = vrot.lane.b32.xlu0 %v6160_v56, %s6237_s24  ;;  %v5303_v51 = vld [vmem:[%s9041_s3 + $0x180] sm:$0xf]  ;;  %v5972_v56 = vld [vmem:[%s9041_s3 + $0x188] sm:$0xf0]  ;;  %vm3489_vm0 = vcmask 1041409  }
 0x2fa   :  { %3318 = vmatpush.bf16.msrb.mxu3 %v5424_v0  ;;  %v5296_v0 = vor.u32 %v5968_v44, %v5293_v58  ;;  %v5932_v38 = vld [vmem:[%s9041_s3 + $0x4c] sm:$0xf]  ;;  %v5998_v40 = vld [vmem:[%s9041_s3 + $0x25c] sm:$0xf]  ;;  %v5413_v42 = vld [vmem:[%s9041_s3 + $0x264] sm:$0xf0] }
 0x2fb   :  { %3275 = vmatpush.bf16.msrb.mxu0 %v5148_v47  ;;  %v5938_v47 = vld [vmem:[%s9041_s3 + $0x7c] sm:$0xf]  ;;  %v5416_v43 = vor.u32 %v5998_v40, %v5413_v42  ;;  %v5956_v45 = vld [vmem:[%s9041_s3 + $0x10c] sm:$0xf]  ;;  %v5995_v49 = vld [vmem:[%s9041_s3 + $0x244] sm:$0xf] }
 0x2fc   :  { %v5176_v41 = vor.u32 %v5938_v47, %v5173_v9  ;;  %v5401_v50 = vld [vmem:[%s9041_s3 + $0x24c] sm:$0xf0]  ;;  %v5950_v58 = vld [vmem:[%s9041_s3 + $0xdc] sm:$0xf] }
 0x2fd   :  { %v5994_v47 = vld [vmem:[%s9041_s3 + $0x238] sm:$0xf0]  ;;  %v2744_v9 = vld [vmem:[%s9041_s3 + $0x2f0] sm:$0xf] }
 0x2fe   :  { %3319 = vmatpush.bf16.msrb.mxu3 %v5412_v36  ;;  %v6004_v36 = vld [vmem:[%s9041_s3 + $0x28c] sm:$0xf] }
 0x2ff   :  { %3276 = vmatpush.bf16.msrb.mxu0 %v5136_v26  ;;  %v5440_v23 = vor.u32 %v6004_v36, %v5437_v16  ;;  %v5161_v26 = vld [vmem:[%s9041_s3 + $0x6c] sm:$0xf0] }
 0x300   :  { %v5164_v60 = vor.u32 %v5935_v33, %v5161_v26  ;;  %v5991_v33 = vld [vmem:[%s9041_s3 + $0x220] sm:$0xf0] }
 0x301   :  { %6166 = vrot.lane.b32.xlu0 %v6165_v62, %s6236_s23  ;;  %6176 = vrot.lane.b32.xlu1 %v6175_v63, %s6238_s28  ;;  %v5304_v62 = vor.u32 %v5972_v56, %v5303_v51  ;;  %v5960_v63 = vld [vmem:[%s9041_s3 + $0x128] sm:$0xf0]  ;;  %v5461_v51 = vld [vmem:[%s9041_s3 + $0x2c4] sm:$0xf0]  ;;  %v5200_v56 = vor.u32 %v5944_v22, %v5197_v48 }
 0x302   :  { %v5256_v3 = vor.u32 %v5960_v63, %v5255_v61  ;;  %3320 = vmatpush.bf16.msrb.mxu3 %v5400_v19  ;;  %v5941_v61 = vld [vmem:[%s9041_s3 + $0x94] sm:$0xf]  ;;  %v5344_v63 = vor.u32 %v5980_v52, %v5341_v54  ;;  %v5464_v1 = vor.u32 %v6010_v55, %v5461_v51  ;;  %v5308_v19 = vor.u32 %v5971_v5, %v5305_v27  ;;  %v5233_v54 = vld [vmem:[%s9041_s3 + $0xfc] sm:$0xf0]  ;;  %v5926_v51 = vld [vmem:[%s9041_s3 + $0x1c] sm:$0xf] }
 0x303   :  { %3306 = vmatpush.bf16.msrb.mxu2 %v5304_v62  ;;  %3277 = vmatpush.bf16.msrb.mxu0 %v5124_v32  ;;  %v5185_v62 = vld [vmem:[%s9041_s3 + $0x9c] sm:$0xf0]  ;;  %v5149_v32 = vld [vmem:[%s9041_s3 + $0x54] sm:$0xf0]  ;;  %v5929_v48 = vld [vmem:[%s9041_s3 + $0x34] sm:$0xf]  ;;  %v5404_v52 = vor.u32 %v5995_v49, %v5401_v50 }
 0x304   :  { %3288 = vmatpush.bf16.msrb.mxu1 %v5256_v3  ;;  %v5329_v3 = vld [vmem:[%s9041_s3 + $0x1bc] sm:$0xf0]  ;;  %v5188_v35 = vor.u32 %v5941_v61, %v5185_v62  ;;  %v5152_v39 = vor.u32 %v5932_v38, %v5149_v32  ;;  %v5923_v62 = vld [vmem:[%s9041_s3 + $0x4] sm:$0xf]  ;;  %v5203_v50 = vld [vmem:[%s9041_s3 + $0xb0] sm:$0xf] }
 0x305   :  { %v5332_v24 = vor.u32 %v5977_v2, %v5329_v3  ;;  %v5947_v2 = vld [vmem:[%s9041_s3 + $0xc4] sm:$0xf] }
 0x306   :  { %3369 = vmatpush.bf16.msra.mxu3 %v3266_v31  ;;  %v5959_v31 = vld [vmem:[%s9041_s3 + $0x124] sm:$0xf] }
 0x307   :  { %3355 = vmatpush.bf16.msra.mxu2 %v5392_v57  ;;  %3278 = vmatpush.bf16.msrb.mxu0 %v5112_v53  ;;  %v5281_v57 = vld [vmem:[%s9041_s3 + $0x15c] sm:$0xf0]  ;;  %v5953_v53 = vld [vmem:[%s9041_s3 + $0xf4] sm:$0xf] }
 0x308   :  { %3289 = vmatpush.bf16.msrb.mxu1 %v5244_v15  ;;  %v5284_v8 = vor.u32 %v5965_v46, %v5281_v57  ;;  %v5320_v15 = vor.u32 %v5974_v11, %v5317_v12  ;;  %v5236_v55 = vor.u32 %v5953_v53, %v5233_v54 }
 0x30a   :  { %3370 = vmatpush.bf16.msra.mxu3 %v5476_v28 }
 0x30b   :  { %3356 = vmatpush.bf16.msra.mxu2 %v5380_v21  ;;  %3327 = vmatpush.bf16.msra.mxu0 %v5200_v56  ;;  %v5269_v21 = vld [vmem:[%s9041_s3 + $0x144] sm:$0xf0] }
 0x30c   :  { %3290 = vmatpush.bf16.msrb.mxu1 %v5232_v30  ;;  %v5272_v25 = vor.u32 %v5962_v17, %v5269_v21  ;;  %v5425_v30 = vld [vmem:[%s9041_s3 + $0x27c] sm:$0xf0]  ;;  %v5125_v56 = vld [vmem:[%s9041_s3 + $0x24] sm:$0xf0]  ;;  %v3067_v21 = vunpack.c.l.b16 %v2744_v9 }
 0x30d   :  { %v5428_v14 = vor.u32 %v6001_v37, %v5425_v30  ;;  %v5128_v44 = vor.u32 %v5926_v51, %v5125_v56  ;;  %v5347_v56 = vld [vmem:[%s9041_s3 + $0x1d0] sm:$0xf] }
 0x30e   :  { %3371 = vmatpush.bf16.msra.mxu3 %v5464_v1  ;;  %v3163_v27 = vpack.c.b16 %v3067_v21, %v3067_v21 }
 0x30f   :  { %3357 = vmatpush.bf16.msra.mxu2 %v5368_v34  ;;  %3328 = vmatpush.bf16.msra.mxu0 %v5188_v35  ;;  %v5257_v34 = vld [vmem:[%s9041_s3 + $0x12c] sm:$0xf0] }
 0x310   :  { %3291 = vmatpush.bf16.msrb.mxu1 %v5220_v6  ;;  %v5260_v13 = vor.u32 %v5959_v31, %v5257_v34  ;;  %v5245_v6 = vld [vmem:[%s9041_s3 + $0x114] sm:$0xf0]  ;;  %v5371_v34 = vld [vmem:[%s9041_s3 + $0x200] sm:$0xf] }
 0x311   :  { %v5248_v22 = vor.u32 %v5956_v45, %v5245_v6  ;;  %v5359_v45 = vld [vmem:[%s9041_s3 + $0x1e8] sm:$0xf] }
 0x312   :  { %3372 = vmatpush.bf16.msra.mxu3 %v5452_v7 }
 0x313   :  { %3358 = vmatpush.bf16.msra.mxu2 %v5356_v20  ;;  %3329 = vmatpush.bf16.msra.mxu0 %v5176_v41  ;;  %v5137_v20 = vld [vmem:[%s9041_s3 + $0x3c] sm:$0xf0] }
 0x314   :  { %3292 = vmatpush.bf16.msrb.mxu1 %v5208_v59  ;;  %v5140_v28 = vor.u32 %v5929_v48, %v5137_v20  ;;  %v5221_v59 = vld [vmem:[%s9041_s3 + $0xe4] sm:$0xf0]  ;;  %v5479_v48 = vld [vmem:[%s9041_s3 + $0x2d8] sm:$0xf]  ;;  %v6015_v20 = vld [vmem:[%s9041_s3 + $0x2e0] sm:$0xf0] }
 0x315   :  { %v5224_v61 = vor.u32 %v5950_v58, %v5221_v59  ;;  %v5480_v51 = vor.u32 %v6015_v20, %v5479_v48  ;;  %v5431_v48 = vld [vmem:[%s9041_s3 + $0x278] sm:$0xf]  ;;  %v6003_v20 = vld [vmem:[%s9041_s3 + $0x280] sm:$0xf0] }
 0x316   :  { %3373 = vmatpush.bf16.msra.mxu3 %v5440_v23 }
 0x317   :  { %3359 = vmatpush.bf16.msra.mxu2 %v5344_v63  ;;  %3330 = vmatpush.bf16.msra.mxu0 %v5164_v60  ;;  %v5113_v63 = vld [vmem:[%s9041_s3 + $0xc] sm:$0xf0] }
 0x318   :  { %3341 = vmatpush.bf16.msra.mxu1 %v5296_v0  ;;  %v5116_v1 = vor.u32 %v5923_v62, %v5113_v63  ;;  %v5209_v0 = vld [vmem:[%s9041_s3 + $0xcc] sm:$0xf0]  ;;  %v5467_v63 = vld [vmem:[%s9041_s3 + $0x2c0] sm:$0xf] }
 0x319   :  { %v5212_v3 = vor.u32 %v5947_v2, %v5209_v0 }
 0x31a   :  { %3374 = vmatpush.bf16.msra.mxu3 %v5428_v14  ;;  %v5988_v14 = vld [vmem:[%s9041_s3 + $0x208] sm:$0xf0] }
 0x31b   :  { %3360 = vmatpush.bf16.msra.mxu2 %v5332_v24  ;;  %3331 = vmatpush.bf16.msra.mxu0 %v5152_v39  ;;  %v5372_v42 = vor.u32 %v5988_v14, %v5371_v34  ;;  %v6006_v34 = vld [vmem:[%s9041_s3 + $0x298] sm:$0xf0]  ;;  %v5275_v14 = vld [vmem:[%s9041_s3 + $0x140] sm:$0xf] }
 0x31c   :  { %3342 = vmatpush.bf16.msra.mxu1 %v5284_v8  ;;  %v5395_v8 = vld [vmem:[%s9041_s3 + $0x230] sm:$0xf] }
 0x31d   :  { %v5396_v17 = vor.u32 %v5994_v47, %v5395_v8 }
 0x31e   :  { %3375 = vmatpush.bf16.msra.mxu3 %v5416_v43  ;;  %v3269_v43 = vsel %vm3261_vm7, %v3163_v27, 0 }
 0x31f   :  { %3361 = vmatpush.bf16.msra.mxu2 %v5320_v15  ;;  %3332 = vmatpush.bf16.msra.mxu0 %v5140_v28 }
 0x320   :  { %3343 = vmatpush.bf16.msra.mxu1 %v5272_v25  ;;  %v5383_v25 = vld [vmem:[%s9041_s3 + $0x218] sm:$0xf] }
 0x321   :  { %v5384_v5 = vor.u32 %v5991_v33, %v5383_v25  ;;  %v5967_v25 = vld [vmem:[%s9041_s3 + $0x160] sm:$0xf0] }
 0x322   :  { %3376 = vmatpush.bf16.msra.mxu3 %v5404_v52  ;;  %v5946_v52 = vld [vmem:[%s9041_s3 + $0xb8] sm:$0xf0] }
 0x323   :  { %3362 = vmatpush.bf16.msra.mxu2 %v5308_v19  ;;  %3333 = vmatpush.bf16.msra.mxu0 %v5128_v44  ;;  %v5982_v44 = vld [vmem:[%s9041_s3 + $0x1d8] sm:$0xf0]  ;;  %v5204_v0 = vor.u32 %v5946_v52, %v5203_v50 }
 0x324   :  { %3344 = vmatpush.bf16.msra.mxu1 %v5260_v13  ;;  %v5348_v47 = vor.u32 %v5982_v44, %v5347_v56  ;;  %v5419_v56 = vld [vmem:[%s9041_s3 + $0x260] sm:$0xf]  ;;  %v6000_v44 = vld [vmem:[%s9041_s3 + $0x268] sm:$0xf0] }
 0x327   :  { %3334 = vmatpush.bf16.msra.mxu0 %v5116_v1 }
 0x328   :  { %3345 = vmatpush.bf16.msra.mxu1 %v5248_v22  ;;  %v5985_v22 = vld [vmem:[%s9041_s3 + $0x1f0] sm:$0xf0] }
 0x32c   :  { %3346 = vmatpush.bf16.msra.mxu1 %v5236_v55  ;;  %v5360_v55 = vor.u32 %v5985_v22, %v5359_v45  ;;  %v5311_v45 = vld [vmem:[%s9041_s3 + $0x188] sm:$0xf]  ;;  %v5973_v22 = vld [vmem:[%s9041_s3 + $0x190] sm:$0xf0] }
 0x32d   :  { %v5312_v52 = vor.u32 %v5973_v22, %v5311_v45 }
 0x330   :  { %3347 = vmatpush.bf16.msra.mxu1 %v5224_v61 }
 0x332   :  { %v6142_v4 = vpop.permute.xlu2 %6141 }
 0x333   :  { %v6144_v41 = vunpack.i.h.bf16 %v6142_v4  ;;  %v6143_v11 = vunpack.i.l.bf16 %v6142_v4  ;;  %v5299_v4 = vld [vmem:[%s9041_s3 + $0x170] sm:$0xf] }
 0x334   :  { %3348 = vmatpush.bf16.msra.mxu1 %v5212_v3  ;;  %v6012_v3 = vld [vmem:[%s9041_s3 + $0x2c8] sm:$0xf0] }
 0x340   :  { %v6147_v13 = vpop.permute.xlu2 %6146 }
 0x341   :  { %v6149_v28 = vunpack.i.h.bf16 %v6147_v13  ;;  %v6148_v49 = vunpack.i.l.bf16 %v6147_v13  ;;  %v5964_v13 = vld [vmem:[%s9041_s3 + $0x148] sm:$0xf0] }
 0x343   :  { %v2550_v1 = vsel %vm2549_vm12, %v6148_v49, %v6149_v28  ;;  %v2601_v2 = vsel %vm2596_vm10, %v8213_v18, %v6148_v49  ;;  %v5263_v28 = vld [vmem:[%s9041_s3 + $0x128] sm:$0xf]  ;;  %v5961_v49 = vld [vmem:[%s9041_s3 + $0x130] sm:$0xf0] }
 0x363   :  { %v8627_v10 = vpop.permute.xlu1 %6156  ;;  %v8629_v35 = vpop.permute.xlu0 %6151 }
 0x364   :  { %v6159_v46 = vunpack.i.h.bf16 %v8627_v10  ;;  %v6158_v57 = vunpack.i.l.bf16 %v8627_v10  ;;  %v6154_v24 = vunpack.i.h.bf16 %v8629_v35  ;;  %v6153_v7 = vunpack.i.l.bf16 %v8629_v35  ;;  %v5335_v35 = vld [vmem:[%s9041_s3 + $0x1b8] sm:$0xf]  ;;  %v6009_v10 = vld [vmem:[%s9041_s3 + $0x2b0] sm:$0xf0] }
 0x366   :  { %v2574_v12 = vsel %vm2412_vm4, %v6158_v57, %v6159_v46  ;;  %v2573_v36 = vsel %vm2412_vm4, %v6153_v7, %v6154_v24  ;;  %v5970_v46 = vld [vmem:[%s9041_s3 + $0x178] sm:$0xf0]  ;;  %vm3517_vm4 = vcmask 916480  }
 0x367   :  { %v2610_v15 = vsel %vm2609_vm8, %v2573_v36, %v6143_v11  ;;  %v2611_v16 = vsel %vm2609_vm8, %v2574_v12, %v6144_v41  ;;  %v5191_v12 = vld [vmem:[%s9041_s3 + $0x98] sm:$0xf] }
 0x368   :  { %v8652_v23 = vpack.c.bf16 %v2611_v16, %v2610_v15  ;;  %v5468_v15 = vor.u32 %v6012_v3, %v5467_v63  ;;  %v5300_v16 = vor.u32 %v5970_v46, %v5299_v4  ;;  %v5931_v63 = vld [vmem:[%s9041_s3 + $0x40] sm:$0xf0]  ;;  %v5997_v3 = vld [vmem:[%s9041_s3 + $0x250] sm:$0xf0]  ;;  %v5239_v4 = vld [vmem:[%s9041_s3 + $0xf8] sm:$0xf] }
 0x369   :  { %v5955_v46 = vld [vmem:[%s9041_s3 + $0x100] sm:$0xf0] }
 0x36a   :  { %3307 = vmatmul.bf16.vlgmr.msrb.gmra.mxu2 %v8652_v23 }
 0x36b   :  { %v6172_v26 = vpop.permute.xlu1 %6171  ;;  %v6162_v60 = vpop.permute.xlu0 %6161  ;;  %3411 = vmatpush.bf16.msrb.mxu2 %v5396_v17  ;;  %v5455_v17 = vld [vmem:[%s9041_s3 + $0x2a8] sm:$0xf] }
 0x36c   :  { %v6174_v37 = vunpack.i.h.bf16 %v6172_v26  ;;  %v6173_v19 = vunpack.i.l.bf16 %v6172_v26  ;;  %v6164_v30 = vunpack.i.h.bf16 %v6162_v60  ;;  %v6163_v31 = vunpack.i.l.bf16 %v6162_v60  ;;  %v5179_v60 = vld [vmem:[%s9041_s3 + $0x80] sm:$0xf] }
 0x36d   :  { %v5456_v27 = vor.u32 %v6009_v10, %v5455_v17 }
 0x36e   :  { %v2598_v38 = vsel %vm2596_vm10, %v6173_v19, %v6174_v37  ;;  %v2597_v32 = vsel %vm2596_vm10, %v6163_v31, %v6164_v30  ;;  %v5323_v19 = vld [vmem:[%s9041_s3 + $0x1a0] sm:$0xf]  ;;  %v5976_v30 = vld [vmem:[%s9041_s3 + $0x1a8] sm:$0xf0]  ;;  %v5443_v31 = vld [vmem:[%s9041_s3 + $0x290] sm:$0xf] }
 0x36f   :  { %v2614_v39 = vsel %vm2612_vm9, %v6144_v41, %v2598_v38  ;;  %v2613_v40 = vsel %vm2612_vm9, %v6143_v11, %v2597_v32  ;;  %3412 = vmatpush.bf16.msrb.mxu2 %v5384_v5  ;;  %v5940_v5 = vld [vmem:[%s9041_s3 + $0x88] sm:$0xf0]  ;;  %v5324_v32 = vor.u32 %v5976_v30, %v5323_v19 }
 0x370   :  { %v8675_v6 = vpack.c.bf16 %v2614_v39, %v2613_v40  ;;  %v5180_v38 = vor.u32 %v5940_v5, %v5179_v60  ;;  %v5167_v39 = vld [vmem:[%s9041_s3 + $0x68] sm:$0xf]  ;;  %v5937_v40 = vld [vmem:[%s9041_s3 + $0x70] sm:$0xf0] }
 0x371   :  { %v5168_v50 = vor.u32 %v5937_v40, %v5167_v39 }
 0x372   :  { %5481 = vmatmul.msk.bf16.vlgmr.msrb.gmra.mxu3 %vm3257_vm11, %v8675_v6 }
 0x373   :  { %v6167_v53 = vpop.permute.xlu0 %6166  ;;  %3413 = vmatpush.bf16.msrb.mxu2 %v5372_v42  ;;  %3425 = vmatpush.bf16.msrb.mxu3 %v3269_v43  ;;  %v6177_v54 = vpop.permute.xlu1 %6176  ;;  %v5444_v42 = vor.u32 %v6006_v34, %v5443_v31  ;;  %v5276_v43 = vor.u32 %v5964_v13, %v5275_v14 }
 0x374   :  { %v6169_v58 = vunpack.i.h.bf16 %v6167_v53  ;;  %v6168_v59 = vunpack.i.l.bf16 %v6167_v53  ;;  %v6179_v61 = vunpack.i.h.bf16 %v6177_v54  ;;  %v6178_v62 = vunpack.i.l.bf16 %v6177_v54  ;;  %v5155_v53 = vld [vmem:[%s9041_s3 + $0x50] sm:$0xf]  ;;  %v5934_v54 = vld [vmem:[%s9041_s3 + $0x58] sm:$0xf0] }
 0x376   :  { %v2551_v24 = vsel %vm2549_vm12, %v6168_v59, %v6169_v58  ;;  %v2602_v8 = vsel %vm2596_vm10, %v8215_v29, %v6168_v59  ;;  %v2604_v18 = vsel %vm2603_vm13, %v2550_v1, %v6178_v62  ;;  %v5943_v29 = vld [vmem:[%s9041_s3 + $0xa0] sm:$0xf0]  ;;  %v5251_v58 = vld [vmem:[%s9041_s3 + $0x110] sm:$0xf]  ;;  %v5958_v59 = vld [vmem:[%s9041_s3 + $0x118] sm:$0xf0]  ;;  %v5420_v1 = vor.u32 %v6000_v44, %v5419_v56 }
 0x377   :  { %v8719_v9 = vpack.c.bf16 %v2602_v8, %v2601_v2  ;;  %v2605_v41 = vsel %vm2603_vm13, %v2551_v24, %v6179_v61  ;;  %3414 = vmatpush.bf16.msrb.mxu2 %v5360_v55  ;;  %3426 = vmatpush.bf16.msrb.mxu3 %v5480_v51  ;;  %v2607_v11 = vsel %vm2606_vm14, %v2604_v18, %v6153_v7  ;;  %v5979_v7 = vld [vmem:[%s9041_s3 + $0x1c0] sm:$0xf0]  ;;  %v5143_v62 = vld [vmem:[%s9041_s3 + $0x38] sm:$0xf]  ;;  %v5131_v8 = vld [vmem:[%s9041_s3 + $0x20] sm:$0xf] }
 0x378   :  { %v2608_v36 = vsel %vm2606_vm14, %v2605_v41, %v6158_v57  ;;  %v5287_v57 = vld [vmem:[%s9041_s3 + $0x158] sm:$0xf]  ;;  %v5192_v33 = vor.u32 %v5943_v29, %v5191_v12  ;;  %v5336_v26 = vor.u32 %v5979_v7, %v5335_v35  ;;  %v5432_v55 = vor.u32 %v6003_v20, %v5431_v48  ;;  %v5928_v18 = vld [vmem:[%s9041_s3 + $0x28] sm:$0xf0]  ;;  %v5119_v29 = vld [vmem:[%s9041_s3 + $0x8] sm:$0xf] }
 0x379   :  { %3279 = vmatmul.bf16.vlgmr.msrb.gmra.mxu0 %v8719_v9  ;;  %v8744_v21 = vpack.c.bf16 %v2608_v36, %v2607_v11  ;;  %v5288_v37 = vor.u32 %v5967_v25, %v5287_v57  ;;  %v5264_v51 = vor.u32 %v5961_v49, %v5263_v28  ;;  %v5156_v61 = vor.u32 %v5934_v54, %v5155_v53  ;;  %v5227_v11 = vld [vmem:[%s9041_s3 + $0xe0] sm:$0xf]  ;;  %v5925_v36 = vld [vmem:[%s9041_s3 + $0x10] sm:$0xf0] }
 0x37a   :  { %3363 = vmatmul.bf16.vlgmr.msra.gmra.mxu2 %v8652_v23  ;;  %3383 = vmatpush.bf16.msrb.mxu0 %v5204_v0  ;;  %v5252_v2 = vor.u32 %v5958_v59, %v5251_v58  ;;  %v5407_v0 = vld [vmem:[%s9041_s3 + $0x248] sm:$0xf]  ;;  %v5144_v24 = vor.u32 %v5931_v63, %v5143_v62  ;;  %v5240_v41 = vor.u32 %v5955_v46, %v5239_v4  ;;  %v5949_v35 = vld [vmem:[%s9041_s3 + $0xd0] sm:$0xf0]  ;;  %v2745_v57 = vld [vmem:[%s9042_s4] sm:$0x7] }
 0x37b   :  { %3293 = vmatmul.bf16.vlgmr.msrb.gmra.mxu1 %v8744_v21  ;;  %3415 = vmatpush.bf16.msrb.mxu2 %v5348_v47  ;;  %v5408_v47 = vor.u32 %v5997_v3, %v5407_v0  ;;  %v5132_v12 = vor.u32 %v5928_v18, %v5131_v8  ;;  %v5120_v7 = vor.u32 %v5925_v36, %v5119_v29  ;;  %v2747_v25 = vperm.slane %v2745_v57, 0 }
 0x37c   :  { %3427 = vmatpush.bf16.msrb.mxu3 %v5468_v15  ;;  %3397 = vmatpush.bf16.msrb.mxu1 %v5300_v16  ;;  %v5215_v16 = vld [vmem:[%s9041_s3 + $0xc8] sm:$0xf]  ;;  %v2748_v13 = vperm.slane %v2745_v57, 1  ;;  %v2749_v44 = vperm.slane %v2745_v57, 2 }
 0x37d   :  { %v5216_v17 = vor.u32 %v5949_v35, %v5215_v16 }
 0x37e   :  { %3384 = vmatpush.bf16.msrb.mxu0 %v5192_v33 }
 0x37f   :  { %3416 = vmatpush.bf16.msrb.mxu2 %v5336_v26 }
 0x380   :  { %3428 = vmatpush.bf16.msrb.mxu3 %v5456_v27  ;;  %3398 = vmatpush.bf16.msrb.mxu1 %v5288_v37 }
 0x382   :  { %5482 = vmatmul.msk.bf16.vlgmr.msra.gmra.mxu3 %vm3257_vm11, %v8675_v6  ;;  %3385 = vmatpush.bf16.msrb.mxu0 %v5180_v38 }
 0x383   :  { %3417 = vmatpush.bf16.msrb.mxu2 %v5324_v32 }
 0x384   :  { %3429 = vmatpush.bf16.msrb.mxu3 %v5444_v42  ;;  %3399 = vmatpush.bf16.msrb.mxu1 %v5276_v43 }
 0x386   :  { %3386 = vmatpush.bf16.msrb.mxu0 %v5168_v50 }
 0x387   :  { %3418 = vmatpush.bf16.msrb.mxu2 %v5312_v52 }
 0x388   :  { %3430 = vmatpush.bf16.msrb.mxu3 %v5432_v55  ;;  %3400 = vmatpush.bf16.msrb.mxu1 %v5264_v51 }
 0x389   :  { %3335 = vmatmul.bf16.vlgmr.msra.gmra.mxu0 %v8719_v9 }
 0x38a   :  { %3387 = vmatpush.bf16.msrb.mxu0 %v5156_v61  ;;  %3419 = vmatmul.bf16.vlgmr.msrb.gmra.mxu2 %v8652_v23  ;;  %v5952_v23 = vld [vmem:[%s9041_s3 + $0xe8] sm:$0xf0]  ;;  %s6239_s3 = smov 48  }
 0x38b   :  { %3349 = vmatmul.bf16.vlgmr.msra.gmra.mxu1 %v8744_v21  ;;  %v5228_v15 = vor.u32 %v5952_v23, %v5227_v11 }
 0x38c   :  { %3431 = vmatpush.bf16.msrb.mxu3 %v5420_v1  ;;  %3401 = vmatpush.bf16.msrb.mxu1 %v5252_v2 }
 0x38e   :  { %3388 = vmatpush.bf16.msrb.mxu0 %v5144_v24 }
 0x390   :  { %3432 = vmatpush.bf16.msrb.mxu3 %v5408_v47  ;;  %3402 = vmatpush.bf16.msrb.mxu1 %v5240_v41 }
 0x392   :  { %3389 = vmatpush.bf16.msrb.mxu0 %v5132_v12 }
 0x393   :  { %5483 = vmatmul.msk.bf16.vlgmr.msrb.gmra.mxu3 %vm3257_vm11, %v8675_v6 }
 0x394   :  { %3403 = vmatpush.bf16.msrb.mxu1 %v5228_v15 }
 0x396   :  { %3390 = vmatpush.bf16.msrb.mxu0 %v5120_v7 }
 0x398   :  { %3404 = vmatpush.bf16.msrb.mxu1 %v5216_v17 }
 0x399   :  { %3391 = vmatmul.bf16.vlgmr.msrb.gmra.mxu0 %v8719_v9 }
 0x39b   :  { %3405 = vmatmul.bf16.vlgmr.msrb.gmra.mxu1 %v8744_v21 }
 0x3ed   :  { %v3308_v10 = vpop.f32.mrf.mxu2 }
 0x3f5   :  { %v3322_v33 = vpop.f32.mrf.mxu3  ;;  %v3310_v27 = vpop.f32.mrf.mxu2 }
 0x3f6   :  { %v3280_v26 = vpop.f32.mrf.mxu0 }
 0x3f7   :  { %v3281_v60 = vadd.f32 %v3280_v26, %v2747_v25 }
 0x3f8   :  { %v3294_v5 = vpop.f32.mrf.mxu1 }
 0x3f9   :  { %v3295_v6 = vadd.f32 %v3294_v5, %v3281_v60 }
 0x3fb   :  { %v3309_v30 = vadd.f32 %v3308_v10, %v3295_v6 }
 0x3fd   :  { %v3324_v37 = vpop.f32.mrf.mxu3  ;;  %v8877_v14 = vadd.f32 %v3322_v33, %v3309_v30  ;;  %v3364_v38 = vpop.f32.mrf.mxu2 }
 0x3fe   :  { %v3282_v19 = vpop.f32.mrf.mxu0 }
 0x3ff   :  { %v3283_v31 = vadd.f32 %v3282_v19, %v2747_v25  ;;  %v3439_v42 = vmax.f32 %v8877_v14, 0.0  ;;  %v6017_v14 = vld [vmem:[%s9043_s5 + $0x8] sm:$0xff] }
 0x400   :  { %v3296_v34 = vpop.f32.mrf.mxu1 }
 0x401   :  { %v3297_v9 = vadd.f32 %v3296_v34, %v3283_v31  ;;  %v6023_v34 = vld [vmem:[%s9043_s5 + $0x38] sm:$0xff] }
 0x402   :  { %3732 = vmatpush.bf16.msra.mxu0 %v6023_v34  ;;  %v6044_v34 = vld [vmem:[%s9045_s7 + $0x18] sm:$0xff] }
 0x403   :  { %v3311_v21 = vadd.f32 %v3310_v27, %v3297_v9  ;;  %v6022_v9 = vld [vmem:[%s9043_s5 + $0x30] sm:$0xff] }
 0x405   :  { %v8879_v32 = vadd.f32 %v3324_v37, %v3311_v21  ;;  %v3378_v39 = vpop.f32.mrf.mxu3  ;;  %v3366_v28 = vpop.f32.mrf.mxu2  ;;  %v6039_v21 = vld [vmem:[%s9043_s5 + $0xb8] sm:$0xff] }
 0x406   :  { %v3336_v40 = vpop.f32.mrf.mxu0  ;;  %3758 = vmatpush.bf16.msra.mxu2 %v6039_v21  ;;  %3733 = vmatpush.bf16.msra.mxu0 %v6022_v9  ;;  %v6043_v9 = vld [vmem:[%s9045_s7 + $0x10] sm:$0xff] }
 0x407   :  { %v3442_v43 = vmax.f32 %v8879_v32, 0.0  ;;  %v3337_v45 = vadd.f32 %v3336_v40, %v2748_v13 }
 0x408   :  { %v3350_v22 = vpop.f32.mrf.mxu1 }
 0x409   :  { %v6190_v48 = vpack.i.bf16 %v3442_v43, %v3439_v42  ;;  %v3351_v20 = vadd.f32 %v3350_v22, %v3337_v45 }
 0x40b   :  { %6191 = vrot.lane.b32.xlu1 %v6190_v48, %s6239_s3  ;;  %v3365_v50 = vadd.f32 %v3364_v38, %v3351_v20  ;;  %v6020_v38 = vld [vmem:[%s9043_s5 + $0x20] sm:$0xff] }
 0x40d   :  { %v3380_v53 = vpop.f32.mrf.mxu3  ;;  %v3379_v51 = vadd.f32 %v3378_v39, %v3365_v50  ;;  %v3420_v1 = vpop.f32.mrf.mxu2  ;;  %v6019_v39 = vld [vmem:[%s9043_s5 + $0x18] sm:$0xff] }
 0x40e   :  { %v3338_v49 = vpop.f32.mrf.mxu0 }
 0x40f   :  { %v3339_v52 = vadd.f32 %v3338_v49, %v2748_v13  ;;  %v3440_v61 = vmax.f32 %v3379_v51, 0.0  ;;  %v6021_v13 = vld [vmem:[%s9043_s5 + $0x28] sm:$0xff] }
 0x410   :  { %v3352_v54 = vpop.f32.mrf.mxu1  ;;  %3734 = vmatpush.bf16.msra.mxu0 %v6021_v13  ;;  %v6042_v13 = vld [vmem:[%s9045_s7 + $0x8] sm:$0xff] }
 0x411   :  { %v3353_v55 = vadd.f32 %v3352_v54, %v3339_v52 }
 0x413   :  { %v3367_v56 = vadd.f32 %v3366_v28, %v3353_v55  ;;  %v6018_v28 = vld [vmem:[%s9043_s5 + $0x10] sm:$0xff] }
 0x414   :  { %3735 = vmatpush.bf16.msra.mxu0 %v6020_v38  ;;  %v6041_v38 = vld [vmem:[%s9045_s7] sm:$0xff] }
 0x415   :  { %v3381_v58 = vadd.f32 %v3380_v53, %v3367_v56  ;;  %v3422_v41 = vpop.f32.mrf.mxu2 }
 0x416   :  { %v3392_v59 = vpop.f32.mrf.mxu0  ;;  %v3434_v3 = vpop.f32.mrf.mxu3 }
 0x417   :  { %v3443_v62 = vmax.f32 %v3381_v58, 0.0  ;;  %v3393_v63 = vadd.f32 %v3392_v59, %v2749_v44 }
 0x418   :  { %v3406_v2 = vpop.f32.mrf.mxu1  ;;  %3736 = vmatpush.bf16.msra.mxu0 %v6019_v39 }
 0x419   :  { %v6180_v0 = vpack.i.bf16 %v3443_v62, %v3440_v61  ;;  %v3407_v4 = vadd.f32 %v3406_v2, %v3393_v63  ;;  %v6038_v63 = vld [vmem:[%s9043_s5 + $0xb0] sm:$0xff]  ;;  %v6031_v2 = vld [vmem:[%s9043_s5 + $0x78] sm:$0xff] }
 0x41a   :  { %3759 = vmatpush.bf16.msra.mxu2 %v6038_v63  ;;  %3745 = vmatpush.bf16.msra.mxu1 %v6031_v2 }
 0x41b   :  { %6181 = vrot.lane.b32.xlu2 %v6180_v0, %s6239_s3  ;;  %v3421_v24 = vadd.f32 %v3420_v1, %v3407_v4  ;;  %v6037_v1 = vld [vmem:[%s9043_s5 + $0xa8] sm:$0xff]  ;;  %v6036_v0 = vld [vmem:[%s9043_s5 + $0xa0] sm:$0xff] }
 0x41c   :  { %3737 = vmatpush.bf16.msra.mxu0 %v6018_v28  ;;  %v6040_v4 = vld [vmem:[%s9043_s5 + $0xc0] sm:$0xff]  ;;  %v6051_v28 = vld [vmem:[%s9047_s9 + $0x18] sm:$0xff] }
 0x41d   :  { %v3435_v11 = vadd.f32 %v3434_v3, %v3421_v24  ;;  %v6030_v3 = vld [vmem:[%s9043_s5 + $0x70] sm:$0xff]  ;;  %3778 = vmatpush.bf16.msra.mxu3 %v6040_v4  ;;  %v6029_v24 = vld [vmem:[%s9043_s5 + $0x68] sm:$0xff]  ;;  %v6202_v4 = vld [vmem:[%s9048_s10] ss:$0 sm:$0xff] }
 0x41e   :  { %v3394_v46 = vpop.f32.mrf.mxu0  ;;  %v3436_v12 = vpop.f32.mrf.mxu3  ;;  %3760 = vmatpush.bf16.msra.mxu2 %v6037_v1  ;;  %3746 = vmatpush.bf16.msra.mxu1 %v6030_v3 }
 0x41f   :  { %v3395_v8 = vadd.f32 %v3394_v46, %v2749_v44  ;;  %v3441_v36 = vmax.f32 %v3435_v11, 0.0  ;;  %v6035_v46 = vld [vmem:[%s9043_s5 + $0x98] sm:$0xff]  ;;  %v6032_v11 = vld [vmem:[%s9043_s5 + $0x80] sm:$0xff] }
 0x420   :  { %v3408_v18 = vpop.f32.mrf.mxu1  ;;  %3738 = vmatpush.bf16.msra.mxu0 %v6017_v14 }
 0x421   :  { %v3409_v47 = vadd.f32 %v3408_v18, %v3395_v8  ;;  %v6034_v8 = vld [vmem:[%s9043_s5 + $0x90] sm:$0xff]  ;;  %v6028_v18 = vld [vmem:[%s9043_s5 + $0x60] sm:$0xff] }
 0x422   :  { %3761 = vmatpush.bf16.msra.mxu2 %v6036_v0  ;;  %3747 = vmatpush.bf16.msra.mxu1 %v6029_v24 }
 0x423   :  { %v3423_v23 = vadd.f32 %v3422_v41, %v3409_v47  ;;  %v6033_v47 = vld [vmem:[%s9043_s5 + $0x88] sm:$0xff]  ;;  %v6027_v41 = vld [vmem:[%s9043_s5 + $0x58] sm:$0xff] }
 0x425   :  { %v3437_v29 = vadd.f32 %v3436_v12, %v3423_v23  ;;  %v6026_v23 = vld [vmem:[%s9043_s5 + $0x50] sm:$0xff]  ;;  %v6025_v12 = vld [vmem:[%s9043_s5 + $0x48] sm:$0xff] }
 0x426   :  { %3762 = vmatpush.bf16.msra.mxu2 %v6035_v46  ;;  %3748 = vmatpush.bf16.msra.mxu1 %v6028_v18 }
 0x427   :  { %v3444_v15 = vmax.f32 %v3437_v29, 0.0 }
 0x429   :  { %v6185_v16 = vpack.i.bf16 %v3444_v15, %v3441_v36  ;;  %v6024_v36 = vld [vmem:[%s9043_s5 + $0x40] sm:$0xff] }
 0x42a   :  { %3763 = vmatpush.bf16.msra.mxu2 %v6034_v8  ;;  %3749 = vmatpush.bf16.msra.mxu1 %v6027_v41 }
 0x42b   :  { %6186 = vrot.lane.b32.xlu0 %v6185_v16, %s6239_s3 }
 0x42e   :  { %3764 = vmatpush.bf16.msra.mxu2 %v6033_v47  ;;  %3750 = vmatpush.bf16.msra.mxu1 %v6026_v23 }
 0x432   :  { %3765 = vmatpush.bf16.msra.mxu2 %v6032_v11  ;;  %3751 = vmatpush.bf16.msra.mxu1 %v6025_v12 }
 0x436   :  { %3752 = vmatpush.bf16.msra.mxu1 %v6024_v36 }
 0x475   :  { %v6182_v35 = vpop.permute.xlu2 %6181 }
 0x476   :  { %v6184_v17 = vunpack.i.h.bf16 %v6182_v35  ;;  %v6183_v10 = vunpack.i.l.bf16 %v6182_v35 }
 0x47d   :  { %v6192_v7 = vpop.permute.xlu1 %6191 }
 0x47e   :  { %v6194_v57 = vunpack.i.h.bf16 %v6192_v7  ;;  %v6193_v25 = vunpack.i.l.bf16 %v6192_v7 }
 0x480   :  { %v3459_v33 = vsel %vm3457_vm15, %v6194_v57, %v6184_v17  ;;  %v3458_v26 = vsel %vm3457_vm15, %v6193_v25, %v6183_v10 }
 0x481   :  { %v3462_v48 = vmax.f32 %v3439_v42, %v3458_v26  ;;  %v3463_v20 = vmax.f32 %v3442_v43, %v3459_v33 }
 0x49d   :  { %v6187_v60 = vpop.permute.xlu0 %6186 }
 0x49e   :  { %v6189_v5 = vunpack.i.h.bf16 %v6187_v60  ;;  %v6188_v27 = vunpack.i.l.bf16 %v6187_v60 }
 0x4a0   :  { %v3470_v6 = vsel %vm3457_vm15, %v6183_v10, %v6188_v27  ;;  %v3471_v37 = vsel %vm3457_vm15, %v6184_v17, %v6189_v5  ;;  %v3800_v5 = vld [vmem:[%s9045_s7 + $0x38] sm:$0xf] }
 0x4a1   :  { %v3474_v19 = vmax.f32 %v3440_v61, %v3470_v6  ;;  %v3475_v30 = vmax.f32 %v3443_v62, %v3471_v37  ;;  %v6016_v62 = vld [vmem:[%s9043_s5] sm:$0xff]  ;;  %v3834_v27 = vunpack.c.l.b16 %v3800_v5 }
 0x4a2   :  { %3739 = vmatpush.bf16.msra.mxu0 %v6016_v62  ;;  %v6201_v62 = vld [vmem:[%s9046_s8] ss:$0 sm:$0xff] }
 0x4a3   :  { %v6195_v31 = vpack.i.bf16 %v3475_v30, %v3474_v19  ;;  %v3842_v6 = vpack.c.b16 %v3834_v27, %v3834_v27  ;;  %v6047_v19 = vld [vmem:[%s9045_s7 + $0x30] sm:$0xff]  ;;  %v6046_v30 = vld [vmem:[%s9045_s7 + $0x28] sm:$0xff] }
 0x4a5   :  { %6196 = vrot.lane.b32.xlu2 %v6195_v31, %s6231_s17  ;;  %v3854_v37 = vsel %vm3261_vm7, %v3842_v6, 0  ;;  %v6045_v31 = vld [vmem:[%s9045_s7 + $0x20] sm:$0xff] }
 0x4a6   :  { %3856 = vmatpush.bf16.msrb.mxu3 %v3854_v37 }
 0x4aa   :  { %3857 = vmatpush.bf16.msrb.mxu3 %v6047_v19 }
 0x4ae   :  { %3858 = vmatpush.bf16.msrb.mxu3 %v6046_v30 }
 0x4b2   :  { %3859 = vmatpush.bf16.msrb.mxu3 %v6045_v31 }
 0x4b6   :  { %3860 = vmatpush.bf16.msrb.mxu3 %v6044_v34 }
 0x4ba   :  { %3861 = vmatpush.bf16.msrb.mxu3 %v6043_v9 }
 0x4be   :  { %3862 = vmatpush.bf16.msrb.mxu3 %v6042_v13 }
 0x4c2   :  { %3863 = vmatpush.bf16.msrb.mxu3 %v6041_v38 }
 0x4ff   :  { %v6197_v40 = vpop.permute.xlu2 %6196 }
 0x500   :  { %v6199_v45 = vunpack.i.h.bf16 %v6197_v40  ;;  %v6198_v22 = vunpack.i.l.bf16 %v6197_v40  ;;  %v3881_v40 = vld [vmem:[%s9047_s9 + $0x28] sm:$0x3] }
 0x502   :  { %v3484_v49 = vmax.f32 %v3462_v48, %v6198_v22  ;;  %v3485_v50 = vmax.f32 %v3463_v20, %v6199_v45  ;;  %v3907_v45 = vunpack.c.l.b16 %v3881_v40  ;;  %v6052_v20 = vld [vmem:[%s9047_s9 + $0x20] sm:$0xff] }
 0x504   :  { %v3509_v52 = vrot.slane %v3484_v49, 4  ;;  %v3510_v53 = vrot.slane %v3485_v50, 3  ;;  %v3503_v54 = vrot.slane %v3484_v49, 3  ;;  %v3504_v55 = vrot.slane %v3485_v50, 2 }
 0x505   :  { %v3492_v51 = vrot.slane %v3484_v49, 1  ;;  %v3497_v56 = vrot.slane %v3484_v49, 2  ;;  %v3498_v44 = vrot.slane %v3485_v50, 1  ;;  %v3488_v32 = vrot.slane %v3485_v50, 7 }
 0x506   :  { %v3511_v42 = vsel %vm3489_vm0, %v3510_v53, %v3509_v52  ;;  %v3505_v43 = vsel %vm3489_vm0, %v3504_v55, %v3503_v54  ;;  %v3913_v22 = vpack.c.b16 %v3907_v45, %v3907_v45 }
 0x507   :  { %3512 = vrot.lane.b32.xlu1 %v3511_v42, %s6230_s12  ;;  %3506 = vrot.lane.b32.xlu0 %v3505_v43, %s6240_s2  ;;  %v3493_v58 = vsel %vm3489_vm0, %v3485_v50, %v3492_v51  ;;  %v3499_v59 = vsel %vm3489_vm0, %v3498_v44, %v3497_v56  ;;  %v3490_v61 = vsel %vm3489_vm0, %v3488_v32, %v3484_v49  ;;  %v6050_v49 = vld [vmem:[%s9047_s9 + $0x10] sm:$0xff]  ;;  %v6200_v50 = vld [vmem:[%s9044_s6] ss:$0 sm:$0xff] }
 0x508   :  { %3494 = vrot.lane.b32.xlu2 %v3493_v58, %s6235_s16 }
 0x50f   :  { %3500 = vrot.lane.b32.xlu0 %v3499_v59, %s6232_s18  ;;  %v6049_v59 = vld [vmem:[%s9047_s9 + $0x8] sm:$0xff] }
 0x562   :  { %v3495_v29 = vpop.permute.xlu2 %3494 }
 0x563   :  { %v3515_v15 = vsel %vm2609_vm8, %v3490_v61, %v3495_v29  ;;  %v6048_v61 = vld [vmem:[%s9047_s9] sm:$0xff] }
 0x564   :  { %v3520_v16 = vpack.c.bf16 %v3515_v15, %v3515_v15 }
 0x566   :  { %3740 = vmatmul.bf16.vlgmr.msra.gmra.mxu0 %v3520_v16 }
 0x579   :  { %v3513_v35 = vpop.permute.xlu1 %3512  ;;  %v3507_v7 = vpop.permute.xlu0 %3506 }
 0x57a   :  { %v3523_v17 = vpack.c.bf16 %v3513_v35, %v3513_v35  ;;  %v3519_v10 = vsel %vm124_vm2, %v3507_v7, %v3513_v35  ;;  %vm3922_vm2 = vcmask 1041408  }
 0x57b   :  { %v3522_v57 = vpack.c.bf16 %v3519_v10, %v3519_v10  ;;  %v3924_v48 = vsel %vm3922_vm2, %v3913_v22, 0 }
 0x57c   :  { %5584 = vmatmul.msk.bf16.vlgmr.msra.gmra.mxu3 %vm3728_vm1, %v3523_v17  ;;  %3928 = vmatpush.bf16.msrb.mxu0 %v3924_v48 }
 0x57d   :  { %3766 = vmatmul.bf16.vlgmr.msra.gmra.mxu2 %v3522_v57 }
 0x580   :  { %3929 = vmatpush.bf16.msrb.mxu0 %v6052_v20 }
 0x581   :  { %v3501_v25 = vpop.permute.xlu0 %3500 }
 0x582   :  { %v3516_v33 = vsel %vm127_vm3, %v3495_v29, %v3501_v25  ;;  %vm3939_vm3 = vcmask 74752  }
 0x583   :  { %v3518_v26 = vsel %vm3517_vm4, %v3516_v33, %v3507_v7 }
 0x584   :  { %v3521_v60 = vpack.c.bf16 %v3518_v26, %v3518_v26  ;;  %3930 = vmatpush.bf16.msrb.mxu0 %v6051_v28 }
 0x586   :  { %3753 = vmatmul.bf16.vlgmr.msra.gmra.mxu1 %v3521_v60 }
 0x588   :  { %3931 = vmatpush.bf16.msrb.mxu0 %v6050_v49 }
 0x58c   :  { %3932 = vmatpush.bf16.msrb.mxu0 %v6049_v59 }
 0x590   :  { %3933 = vmatpush.bf16.msrb.mxu0 %v6048_v61 }
 0x5e3   :  { %v3741_v21 = vpop.f32.mrf.mxu0 }
 0x5e4   :  { %v3742_v54 = vadd.f32 %v6200_v50, %v3741_v21 }
 0x5eb   :  { %v3743_v39 = vpop.f32.mrf.mxu0 }
 0x5ff   :  { %v3780_v52 = vpop.f32.mrf.mxu3 }
 0x600   :  { %v3767_v53 = vpop.f32.mrf.mxu2 }
 0x603   :  { %v3754_v55 = vpop.f32.mrf.mxu1 }
 0x604   :  { %v3755_v51 = vadd.f32 %v3754_v55, %v3742_v54 }
 0x606   :  { %v3768_v56 = vadd.f32 %v3767_v53, %v3755_v51 }
 0x607   :  { %v3782_v44 = vpop.f32.mrf.mxu3 }
 0x608   :  { %v3781_v14 = vadd.f32 %v3780_v52, %v3768_v56  ;;  %v3769_v32 = vpop.f32.mrf.mxu2 }
 0x60a   :  { %v3784_v42 = vmax.f32 %v3781_v14, 0.0 }
 0x60b   :  { %v3756_v43 = vpop.f32.mrf.mxu1 }
 0x60c   :  { %v3785_v58 = vpack.c.bf16 %v3784_v42, %v3784_v42 }
 0x60e   :  { %5613 = vmatmul.msk.bf16.vlgmr.msrb.gmra.mxu3 %vm3257_vm11, %v3785_v58 }
 0x691   :  { %v3865_v63 = vpop.f32.mrf.mxu3 }
 0x692   :  { %v3866_v1 = vadd.f32 %v6201_v62, %v3865_v63 }
 0x694   :  { %v3869_v2 = vmax.f32 %v3866_v1, 0.0 }
 0x696   :  { %v3870_v0 = vpack.c.bf16 %v3869_v2, %v3869_v2 }
 0x698   :  { %5634 = vmatmul.msk.bf16.vlgmr.msrb.gmra.mxu0 %vm2596_vm10, %v3870_v0 }
 0x699   :  { %v3867_v3 = vpop.f32.mrf.mxu3 }
 0x715   :  { %v3935_v46 = vpop.f32.mrf.mxu0 }
 0x716   :  { %v3936_v24 = vadd.f32 %v6202_v4, %v3935_v46 }
 0x718   :  { %3940 = vst.msk [vmem:[#allocation2] sm:$0x3] %vm3939_vm3, %v3936_v24 }
 0x719   :  { %3951 = dma.vmem_to_hbm [thread:$0]  %s3947_s29, 32, %s3949_s13, [#allocation3]  }
 0x71d   :  { %v3937_v8 = vpop.f32.mrf.mxu0 }
 0x71e   :  { %6228 = dma.done.wait [#allocation3], 32  }
 0x71f   :  { %6229 = vsyncadd [#allocation3], 4294967264 }
 0x720   :  { %3956 = vsyncpa [#allocation3], 1 }

</bundles_post_ra>
